<compile_context>
chip_gen: v5e
topology: v5e:2x2
jax: 0.10.0
libtpu: 0.0.40
codegen_flags: <defaults>
</compile_context>

<pallas_src>
import functools

import numpy as np
import jax
import jax.numpy as jnp
from jax.experimental import pallas as pl
from jax.experimental.pallas import tpu as pltpu


# Synthetic config equivalent to a small yolo.yaml:
#   backbone: 4x Conv blocks (Conv2d(k=3, autopad) + BatchNorm2d + SiLU)
#   head:     Detect(nc=2, 3 anchors/level) on backbone layers 2 (/4) and 3 (/8)
CFG = dict(
    nc=2,
    anchors=[[10, 13, 16, 30, 33, 23], [30, 61, 62, 45, 59, 119]],
    backbone=[(8, 3, 2), (16, 3, 2), (16, 3, 1), (32, 3, 2)],   # (c_out, k, stride)
    detect_from=(2, 3),
)


# ------------------------------ Pallas kernel ------------------------------ #

def _fused_forward_kernel(x_ref,
                          t1_ref, b1_ref, t2_ref, b2_ref,
                          t3_ref, b3_ref, t4_ref, b4_ref,
                          dw1_ref, db1_ref, dc1_ref,
                          dw2_ref, db2_ref, dc2_ref,
                          raw1_ref, raw2_ref, dec1_ref, dec2_ref,
                          *, stride1, stride2):
    """Whole network forward: 4x (matmul + bias + SiLU) + 2x fused Detect."""

    def conv_bn_silu(h, t_ref, b_ref):
        y = jnp.dot(h, t_ref[...], preferred_element_type=jnp.float32) + b_ref[...]
        return y * jax.nn.sigmoid(y)                       # SiLU

    def detect(h, dw_ref, db_ref, dc_ref, stride, raw_ref, dec_ref):
        logits = jnp.dot(h, dw_ref[...],
                         preferred_element_type=jnp.float32) + db_ref[...]
        raw_ref[...] = logits                              # raw per-anchor logits

        c = dc_ref[...]                                    # (4, CO) compile-time consts
        grid_v = c[0:1, :]                                 # grid x (f==0) / grid y (f==1)
        anch_v = c[1:2, :]                                 # pixel anchor w (f==2) / h (f==3)
        m_xy = c[2:3, :]                                   # 1.0 where f in {0,1}
        m_wh = c[3:4, :]                                   # 1.0 where f in {2,3}

        s = jax.nn.sigmoid(logits)
        xy = (s * 2.0 - 0.5 + grid_v) * stride
        wh = (s * 2.0) ** 2 * anch_v
        dec_ref[...] = m_xy * xy + m_wh * wh + (1.0 - m_xy - m_wh) * s

    x = x_ref[...]
    h1 = conv_bn_silu(x, t1_ref, b1_ref)
    h2 = conv_bn_silu(h1, t2_ref, b2_ref)
    h3 = conv_bn_silu(h2, t3_ref, b3_ref)
    h4 = conv_bn_silu(h3, t4_ref, b4_ref)
    detect(h3, dw1_ref, db1_ref, dc1_ref, stride1, raw1_ref, dec1_ref)
    detect(h4, dw2_ref, db2_ref, dc2_ref, stride2, raw2_ref, dec2_ref)


# --------------------- host-side (init-time) operator build ----------------- #

def _conv_as_dense(w, gamma, beta, mean, var, H, W, stride, in_order):
    """Fold Conv2d(k, autopad) + eval-mode BatchNorm2d into one dense matmul.

    w: (k, k, Cin, Cout) numpy.  Input rows flattened in `in_order`
    ('nchw' or 'nhwc'); output columns flattened NHWC: (y*OW + x)*Cout + c.
    """
    k, _, Cin, Cout = w.shape
    pad = k // 2
    OH = (H + 2 * pad - k) // stride + 1
    OW = (W + 2 * pad - k) // stride + 1
    scale = gamma / np.sqrt(var + 1e-5)                    # BN fold (eval mode)
    bias_c = beta - mean * scale
    wf = (w * scale).astype(np.float32)                    # scale per output channel

    T = np.zeros((H * W * Cin, OH * OW * Cout), np.float32)
    for oy in range(OH):
        for ox in range(OW):
            ocol = (oy * OW + ox) * Cout
            for ky in range(k):
                for kx in range(k):
                    iy = oy * stride + ky - pad
                    ix = ox * stride + kx - pad
                    if not (0 <= iy < H and 0 <= ix < W):
                        continue                           # zero padding -> zero rows
                    for c in range(Cin):
                        if in_order == 'nchw':
                            row = (c * H + iy) * W + ix
                        else:
                            row = (iy * W + ix) * Cin + c
                        T[row, ocol:ocol + Cout] += wf[ky, kx, c]
    bias = np.tile(bias_c.astype(np.float32), OH * OW)
    return T, bias, OH, OW


def _detect_as_dense(w, b, H, W, Cin, na, no):
    """Detect 1x1 conv as dense matmul; output columns ((a*H+y)*W + x)*no + f."""
    T = np.zeros((H * W * Cin, na * H * W * no), np.float32)
    bias = np.zeros((na * H * W * no,), np.float32)
    for y in range(H):
        for x in range(W):
            p = y * W + x
            for a in range(na):
                col = ((a * H + y) * W + x) * no
                T[p * Cin:(p + 1) * Cin, col:col + no] = w[:, a * no:(a + 1) * no]
                bias[col:col + no] = b[a * no:(a + 1) * no]
    return T, bias


def _decode_consts(H, W, na, no, anchors_px):
    """(4, CO) decode constants: grid value, pixel anchor, xy mask, wh mask."""
    CO = na * H * W * no
    grid_v = np.zeros((CO,), np.float32)
    anch_v = np.zeros((CO,), np.float32)
    m_xy = np.zeros((CO,), np.float32)
    m_wh = np.zeros((CO,), np.float32)
    for a in range(na):
        for y in range(H):
            for x in range(W):
                base = ((a * H + y) * W + x) * no
                grid_v[base + 0] = float(x)
                grid_v[base + 1] = float(y)
                anch_v[base + 2] = float(anchors_px[a][0])
                anch_v[base + 3] = float(anchors_px[a][1])
                m_xy[base + 0] = 1.0
                m_xy[base + 1] = 1.0
                m_wh[base + 2] = 1.0
                m_wh[base + 3] = 1.0
    return np.stack([grid_v, anch_v, m_xy, m_wh], axis=0)


# --------------------------------- model ----------------------------------- #

class PallasYoloModel:
    """Pallas port of yolo.py::Model built from the synthetic CFG above."""

    def __init__(self, key, ch=3, H=16, W=16):
        nc = CFG['nc']
        self.nc = nc
        self.na = len(CFG['anchors'][0]) // 2
        self.nl = len(CFG['anchors'])
        self.no = nc + 5
        self.in_hw = (H, W)
        self.ch = ch
        anchors_px = np.asarray(CFG['anchors'], np.float32).reshape(self.nl, self.na, 2)

        keys = iter(jax.random.split(key, 40))

        def rnd(shape, scale=0.1):
            return np.asarray(scale * jax.random.normal(next(keys), shape, jnp.float32))

        # Backbone conv blocks -> per-layer dense operators (BN folded).
        self.mats = []
        feat_hwc = []
        cum_strides = []
        cin, h, w, cum = ch, H, W, 1
        for li, (cout, k, s) in enumerate(CFG['backbone']):
            wconv = rnd((k, k, cin, cout))
            gamma = 1.0 + rnd((cout,))
            beta = rnd((cout,))
            mean = rnd((cout,))
            var = 1.0 + np.abs(rnd((cout,)))
            order = 'nchw' if li == 0 else 'nhwc'   # layer 0 takes NCHW-flattened input
            T, bias, oh, ow = _conv_as_dense(wconv, gamma, beta, mean, var, h, w, s, order)
            self.mats.append((jnp.asarray(T), jnp.asarray(bias[None, :])))
            cin, h, w = cout, oh, ow
            cum *= s
            feat_hwc.append((h, w, cout))
            cum_strides.append(cum)

        # Detect: strides are fully determined by the conv strides (PyTorch's
        # 256x256 dry-run gives the same values), computed analytically.
        self.stride = tuple(float(cum_strides[i]) for i in CFG['detect_from'])
        self.det = []
        self.feat_hw = []
        for lvl, src in enumerate(CFG['detect_from']):
            fh, fw, fc = feat_hwc[src]
            wdet = rnd((fc, self.na * self.no))
            bdet = rnd((self.na * self.no,))
            Td, bd = _detect_as_dense(wdet, bdet, fh, fw, fc, self.na, self.no)
            dc = _decode_consts(fh, fw, self.na, self.no, anchors_px[lvl])
            self.det.append((jnp.asarray(Td), jnp.asarray(bd[None, :]), jnp.asarray(dc)))
            self.feat_hw.append((fh, fw))

    def __call__(self, x_nchw):
        N = x_nchw.shape[0]
        # NCHW flattening matches layer 0's dense-operator row order -> no transpose.
        x_flat = x_nchw.reshape(N, -1).astype(jnp.float32)

        (t1, b1), (t2, b2), (t3, b3), (t4, b4) = self.mats
        (dw1, db1, dc1), (dw2, db2, dc2) = self.det
        (h1, w1), (h2, w2) = self.feat_hw
        co1 = self.na * h1 * w1 * self.no
        co2 = self.na * h2 * w2 * self.no

        kernel = functools.partial(_fused_forward_kernel,
                                   stride1=self.stride[0], stride2=self.stride[1])
        raw1, raw2, dec1, dec2 = pl.pallas_call(
            kernel,
            out_shape=(jax.ShapeDtypeStruct((N, co1), jnp.float32),
                       jax.ShapeDtypeStruct((N, co2), jnp.float32),
                       jax.ShapeDtypeStruct((N, co1), jnp.float32),
                       jax.ShapeDtypeStruct((N, co2), jnp.float32)),
            compiler_params=pltpu.CompilerParams(vmem_limit_bytes=32 * 1024 * 1024),
        )(x_flat, t1, b1, t2, b2, t3, b3, t4, b4,
          dw1, db1, dc1, dw2, db2, dc2)

        # Column order (a, y, x, f) was chosen in the dense operators so these
        # reshapes need no transpose.
        x_out = [raw1.reshape(N, self.na, h1, w1, self.no),
                 raw2.reshape(N, self.na, h2, w2, self.no)]
        z = jnp.concatenate([dec1.reshape(N, self.na * h1 * w1, self.no),
                             dec2.reshape(N, self.na * h2 * w2, self.no)], axis=1)
        # inference path (training=False, end2end=False, include_nms=False, concat=False)
        return z, x_out


if __name__ == "__main__":
    key = jax.random.PRNGKey(0)
    pkey, xkey = jax.random.split(key)
    model = PallasYoloModel(pkey, ch=3, H=16, W=16)
    x = jax.random.normal(xkey, (2, 3, 16, 16), jnp.float32)   # NCHW, like PyTorch

    fwd = jax.jit(model.__call__)   # fuse the tiny reshape/concat glue around the kernel
    pred, raw = fwd(x)
    jax.block_until_ready(pred)
    for r in raw:
        jax.block_until_ready(r)

    assert pred.shape == (2, 60, 7), pred.shape              # (bs, sum na*ny*nx, no)
    assert raw[0].shape == (2, 3, 4, 4, 7), raw[0].shape      # (bs, na, ny, nx, no)
    assert raw[1].shape == (2, 3, 2, 2, 7), raw[1].shape
    assert bool(jnp.all(jnp.isfinite(pred)))
    print("KERNEL_OK")
</pallas_src>

<mosaic_0001>
module attributes {stable_mosaic.version = 11 : i64} {
  func.func @_fused_forward_kernel(%arg0: memref<2x768xf32, #tpu.memory_space<vmem>>, %arg1: memref<768x512xf32, #tpu.memory_space<vmem>>, %arg2: memref<1x512xf32, #tpu.memory_space<vmem>>, %arg3: memref<512x256xf32, #tpu.memory_space<vmem>>, %arg4: memref<1x256xf32, #tpu.memory_space<vmem>>, %arg5: memref<256x256xf32, #tpu.memory_space<vmem>>, %arg6: memref<1x256xf32, #tpu.memory_space<vmem>>, %arg7: memref<256x128xf32, #tpu.memory_space<vmem>>, %arg8: memref<1x128xf32, #tpu.memory_space<vmem>>, %arg9: memref<256x336xf32, #tpu.memory_space<vmem>>, %arg10: memref<1x336xf32, #tpu.memory_space<vmem>>, %arg11: memref<4x336xf32, #tpu.memory_space<vmem>>, %arg12: memref<128x84xf32, #tpu.memory_space<vmem>>, %arg13: memref<1x84xf32, #tpu.memory_space<vmem>>, %arg14: memref<4x84xf32, #tpu.memory_space<vmem>>, %arg15: memref<2x336xf32, #tpu.memory_space<vmem>>, %arg16: memref<2x84xf32, #tpu.memory_space<vmem>>, %arg17: memref<2x336xf32, #tpu.memory_space<vmem>>, %arg18: memref<2x84xf32, #tpu.memory_space<vmem>>) attributes {dimension_semantics = [], scalar_prefetch = 0 : i64, scratch_operands = 0 : i64, tpu.core_type = #tpu.core_type<tc>} {
    %c0 = arith.constant 0 : index
    %c0_0 = arith.constant 0 : index
    %0 = vector.load %arg0[%c0, %c0_0] : memref<2x768xf32, #tpu.memory_space<vmem>>, vector<2x768xf32>
    %c0_1 = arith.constant 0 : index
    %c0_2 = arith.constant 0 : index
    %1 = vector.load %arg1[%c0_1, %c0_2] : memref<768x512xf32, #tpu.memory_space<vmem>>, vector<768x512xf32>
    %cst = arith.constant dense<0.000000e+00> : vector<2x512xf32>
    %2 = tpu.matmul %0, %1, %cst {dimension_numbers = #tpu.dot_dimension_numbers<[1], [0], [0], [1], [0, 0, 1, 1], [], []>} : vector<2x768xf32>, vector<768x512xf32>, vector<2x512xf32> -> vector<2x512xf32>
    %c0_3 = arith.constant 0 : index
    %c0_4 = arith.constant 0 : index
    %3 = vector.load %arg2[%c0_3, %c0_4] : memref<1x512xf32, #tpu.memory_space<vmem>>, vector<1x512xf32>
    %4 = vector.broadcast %3 : vector<1x512xf32> to vector<2x512xf32>
    %5 = arith.addf %2, %4 : vector<2x512xf32>
    %6 = arith.negf %5 : vector<2x512xf32>
    %7 = math.exp %6 : vector<2x512xf32>
    %cst_5 = arith.constant 1.000000e+00 : f32
    %8 = vector.broadcast %cst_5 : f32 to vector<2x512xf32>
    %9 = arith.addf %8, %7 : vector<2x512xf32>
    %10 = arith.divf %8, %9 : vector<2x512xf32>
    %11 = arith.mulf %5, %10 : vector<2x512xf32>
    %c0_6 = arith.constant 0 : index
    %c0_7 = arith.constant 0 : index
    %12 = vector.load %arg3[%c0_6, %c0_7] : memref<512x256xf32, #tpu.memory_space<vmem>>, vector<512x256xf32>
    %cst_8 = arith.constant dense<0.000000e+00> : vector<2x256xf32>
    %13 = tpu.matmul %11, %12, %cst_8 {dimension_numbers = #tpu.dot_dimension_numbers<[1], [0], [0], [1], [0, 0, 1, 1], [], []>} : vector<2x512xf32>, vector<512x256xf32>, vector<2x256xf32> -> vector<2x256xf32>
    %c0_9 = arith.constant 0 : index
    %c0_10 = arith.constant 0 : index
    %14 = vector.load %arg4[%c0_9, %c0_10] : memref<1x256xf32, #tpu.memory_space<vmem>>, vector<1x256xf32>
    %15 = vector.broadcast %14 : vector<1x256xf32> to vector<2x256xf32>
    %16 = arith.addf %13, %15 : vector<2x256xf32>
    %17 = arith.negf %16 : vector<2x256xf32>
    %18 = math.exp %17 : vector<2x256xf32>
    %cst_11 = arith.constant 1.000000e+00 : f32
    %19 = vector.broadcast %cst_11 : f32 to vector<2x256xf32>
    %20 = arith.addf %19, %18 : vector<2x256xf32>
    %21 = arith.divf %19, %20 : vector<2x256xf32>
    %22 = arith.mulf %16, %21 : vector<2x256xf32>
    %c0_12 = arith.constant 0 : index
    %c0_13 = arith.constant 0 : index
    %23 = vector.load %arg5[%c0_12, %c0_13] : memref<256x256xf32, #tpu.memory_space<vmem>>, vector<256x256xf32>
    %cst_14 = arith.constant dense<0.000000e+00> : vector<2x256xf32>
    %24 = tpu.matmul %22, %23, %cst_14 {dimension_numbers = #tpu.dot_dimension_numbers<[1], [0], [0], [1], [0, 0, 1, 1], [], []>} : vector<2x256xf32>, vector<256x256xf32>, vector<2x256xf32> -> vector<2x256xf32>
    %c0_15 = arith.constant 0 : index
    %c0_16 = arith.constant 0 : index
    %25 = vector.load %arg6[%c0_15, %c0_16] : memref<1x256xf32, #tpu.memory_space<vmem>>, vector<1x256xf32>
    %26 = vector.broadcast %25 : vector<1x256xf32> to vector<2x256xf32>
    %27 = arith.addf %24, %26 : vector<2x256xf32>
    %28 = arith.negf %27 : vector<2x256xf32>
    %29 = math.exp %28 : vector<2x256xf32>
    %cst_17 = arith.constant 1.000000e+00 : f32
    %30 = vector.broadcast %cst_17 : f32 to vector<2x256xf32>
    %31 = arith.addf %30, %29 : vector<2x256xf32>
    %32 = arith.divf %30, %31 : vector<2x256xf32>
    %33 = arith.mulf %27, %32 : vector<2x256xf32>
    %c0_18 = arith.constant 0 : index
    %c0_19 = arith.constant 0 : index
    %34 = vector.load %arg7[%c0_18, %c0_19] : memref<256x128xf32, #tpu.memory_space<vmem>>, vector<256x128xf32>
    %cst_20 = arith.constant dense<0.000000e+00> : vector<2x128xf32>
    %35 = tpu.matmul %33, %34, %cst_20 {dimension_numbers = #tpu.dot_dimension_numbers<[1], [0], [0], [1], [0, 0, 1, 1], [], []>} : vector<2x256xf32>, vector<256x128xf32>, vector<2x128xf32> -> vector<2x128xf32>
    %c0_21 = arith.constant 0 : index
    %c0_22 = arith.constant 0 : index
    %36 = vector.load %arg8[%c0_21, %c0_22] : memref<1x128xf32, #tpu.memory_space<vmem>>, vector<1x128xf32>
    %37 = vector.broadcast %36 : vector<1x128xf32> to vector<2x128xf32>
    %38 = arith.addf %35, %37 : vector<2x128xf32>
    %39 = arith.negf %38 : vector<2x128xf32>
    %40 = math.exp %39 : vector<2x128xf32>
    %cst_23 = arith.constant 1.000000e+00 : f32
    %41 = vector.broadcast %cst_23 : f32 to vector<2x128xf32>
    %42 = arith.addf %41, %40 : vector<2x128xf32>
    %43 = arith.divf %41, %42 : vector<2x128xf32>
    %44 = arith.mulf %38, %43 : vector<2x128xf32>
    %c0_24 = arith.constant 0 : index
    %c0_25 = arith.constant 0 : index
    %45 = vector.load %arg9[%c0_24, %c0_25] : memref<256x336xf32, #tpu.memory_space<vmem>>, vector<256x336xf32>
    %cst_26 = arith.constant dense<0.000000e+00> : vector<2x336xf32>
    %46 = tpu.matmul %33, %45, %cst_26 {dimension_numbers = #tpu.dot_dimension_numbers<[1], [0], [0], [1], [0, 0, 1, 1], [], []>} : vector<2x256xf32>, vector<256x336xf32>, vector<2x336xf32> -> vector<2x336xf32>
    %c0_27 = arith.constant 0 : index
    %c0_28 = arith.constant 0 : index
    %47 = vector.load %arg10[%c0_27, %c0_28] : memref<1x336xf32, #tpu.memory_space<vmem>>, vector<1x336xf32>
    %48 = vector.broadcast %47 : vector<1x336xf32> to vector<2x336xf32>
    %49 = arith.addf %46, %48 : vector<2x336xf32>
    %c0_29 = arith.constant 0 : index
    %c0_30 = arith.constant 0 : index
    %50 = vector.load %arg15[%c0_29, %c0_30] : memref<2x336xf32, #tpu.memory_space<vmem>>, vector<2x336xf32>
    tpu.vector_store %arg15[%c0_29, %c0_30], %49 {strides = array<i32>} : memref<2x336xf32, #tpu.memory_space<vmem>>, vector<2x336xf32>,
    %c0_31 = arith.constant 0 : index
    %c0_32 = arith.constant 0 : index
    %51 = vector.load %arg11[%c0_31, %c0_32] : memref<4x336xf32, #tpu.memory_space<vmem>>, vector<4x336xf32>
    %52 = vector.extract_strided_slice %51 {offsets = [0, 0], sizes = [1, 336], strides = [1, 1]} : vector<4x336xf32> to vector<1x336xf32>
    %53 = vector.extract_strided_slice %51 {offsets = [1, 0], sizes = [1, 336], strides = [1, 1]} : vector<4x336xf32> to vector<1x336xf32>
    %54 = vector.extract_strided_slice %51 {offsets = [2, 0], sizes = [1, 336], strides = [1, 1]} : vector<4x336xf32> to vector<1x336xf32>
    %55 = vector.extract_strided_slice %51 {offsets = [3, 0], sizes = [1, 336], strides = [1, 1]} : vector<4x336xf32> to vector<1x336xf32>
    %56 = arith.negf %49 : vector<2x336xf32>
    %57 = math.exp %56 : vector<2x336xf32>
    %cst_33 = arith.constant 1.000000e+00 : f32
    %58 = vector.broadcast %cst_33 : f32 to vector<2x336xf32>
    %59 = arith.addf %58, %57 : vector<2x336xf32>
    %60 = arith.divf %58, %59 : vector<2x336xf32>
    %cst_34 = arith.constant 2.000000e+00 : f32
    %61 = vector.broadcast %cst_34 : f32 to vector<2x336xf32>
    %62 = arith.mulf %60, %61 : vector<2x336xf32>
    %cst_35 = arith.constant 5.000000e-01 : f32
    %63 = vector.broadcast %cst_35 : f32 to vector<2x336xf32>
    %64 = arith.subf %62, %63 : vector<2x336xf32>
    %65 = vector.broadcast %52 : vector<1x336xf32> to vector<2x336xf32>
    %66 = arith.addf %64, %65 : vector<2x336xf32>
    %cst_36 = arith.constant 4.000000e+00 : f32
    %67 = vector.broadcast %cst_36 : f32 to vector<2x336xf32>
    %68 = arith.mulf %66, %67 : vector<2x336xf32>
    %cst_37 = arith.constant 2.000000e+00 : f32
    %69 = vector.broadcast %cst_37 : f32 to vector<2x336xf32>
    %70 = arith.mulf %60, %69 : vector<2x336xf32>
    %71 = arith.mulf %70, %70 : vector<2x336xf32>
    %72 = vector.broadcast %53 : vector<1x336xf32> to vector<2x336xf32>
    %73 = arith.mulf %71, %72 : vector<2x336xf32>
    %74 = vector.broadcast %54 : vector<1x336xf32> to vector<2x336xf32>
    %75 = arith.mulf %74, %68 : vector<2x336xf32>
    %76 = vector.broadcast %55 : vector<1x336xf32> to vector<2x336xf32>
    %77 = arith.mulf %76, %73 : vector<2x336xf32>
    %78 = arith.addf %75, %77 : vector<2x336xf32>
    %cst_38 = arith.constant 1.000000e+00 : f32
    %79 = vector.broadcast %cst_38 : f32 to vector<1x336xf32>
    %80 = arith.subf %79, %54 : vector<1x336xf32>
    %81 = arith.subf %80, %55 : vector<1x336xf32>
    %82 = vector.broadcast %81 : vector<1x336xf32> to vector<2x336xf32>
    %83 = arith.mulf %82, %60 : vector<2x336xf32>
    %84 = arith.addf %78, %83 : vector<2x336xf32>
    %c0_39 = arith.constant 0 : index
    %c0_40 = arith.constant 0 : index
    %85 = vector.load %arg17[%c0_39, %c0_40] : memref<2x336xf32, #tpu.memory_space<vmem>>, vector<2x336xf32>
    tpu.vector_store %arg17[%c0_39, %c0_40], %84 {strides = array<i32>} : memref<2x336xf32, #tpu.memory_space<vmem>>, vector<2x336xf32>,
    %c0_41 = arith.constant 0 : index
    %c0_42 = arith.constant 0 : index
    %86 = vector.load %arg12[%c0_41, %c0_42] : memref<128x84xf32, #tpu.memory_space<vmem>>, vector<128x84xf32>
    %cst_43 = arith.constant dense<0.000000e+00> : vector<2x84xf32>
    %87 = tpu.matmul %44, %86, %cst_43 {dimension_numbers = #tpu.dot_dimension_numbers<[1], [0], [0], [1], [0, 0, 1, 1], [], []>} : vector<2x128xf32>, vector<128x84xf32>, vector<2x84xf32> -> vector<2x84xf32>
    %c0_44 = arith.constant 0 : index
    %c0_45 = arith.constant 0 : index
    %88 = vector.load %arg13[%c0_44, %c0_45] : memref<1x84xf32, #tpu.memory_space<vmem>>, vector<1x84xf32>
    %89 = vector.broadcast %88 : vector<1x84xf32> to vector<2x84xf32>
    %90 = arith.addf %87, %89 : vector<2x84xf32>
    %c0_46 = arith.constant 0 : index
    %c0_47 = arith.constant 0 : index
    %91 = vector.load %arg16[%c0_46, %c0_47] : memref<2x84xf32, #tpu.memory_space<vmem>>, vector<2x84xf32>
    tpu.vector_store %arg16[%c0_46, %c0_47], %90 {strides = array<i32>} : memref<2x84xf32, #tpu.memory_space<vmem>>, vector<2x84xf32>,
    %c0_48 = arith.constant 0 : index
    %c0_49 = arith.constant 0 : index
    %92 = vector.load %arg14[%c0_48, %c0_49] : memref<4x84xf32, #tpu.memory_space<vmem>>, vector<4x84xf32>
    %93 = vector.extract_strided_slice %92 {offsets = [0, 0], sizes = [1, 84], strides = [1, 1]} : vector<4x84xf32> to vector<1x84xf32>
    %94 = vector.extract_strided_slice %92 {offsets = [1, 0], sizes = [1, 84], strides = [1, 1]} : vector<4x84xf32> to vector<1x84xf32>
    %95 = vector.extract_strided_slice %92 {offsets = [2, 0], sizes = [1, 84], strides = [1, 1]} : vector<4x84xf32> to vector<1x84xf32>
    %96 = vector.extract_strided_slice %92 {offsets = [3, 0], sizes = [1, 84], strides = [1, 1]} : vector<4x84xf32> to vector<1x84xf32>
    %97 = arith.negf %90 : vector<2x84xf32>
    %98 = math.exp %97 : vector<2x84xf32>
    %cst_50 = arith.constant 1.000000e+00 : f32
    %99 = vector.broadcast %cst_50 : f32 to vector<2x84xf32>
    %100 = arith.addf %99, %98 : vector<2x84xf32>
    %101 = arith.divf %99, %100 : vector<2x84xf32>
    %cst_51 = arith.constant 2.000000e+00 : f32
    %102 = vector.broadcast %cst_51 : f32 to vector<2x84xf32>
    %103 = arith.mulf %101, %102 : vector<2x84xf32>
    %cst_52 = arith.constant 5.000000e-01 : f32
    %104 = vector.broadcast %cst_52 : f32 to vector<2x84xf32>
    %105 = arith.subf %103, %104 : vector<2x84xf32>
    %106 = vector.broadcast %93 : vector<1x84xf32> to vector<2x84xf32>
    %107 = arith.addf %105, %106 : vector<2x84xf32>
    %cst_53 = arith.constant 8.000000e+00 : f32
    %108 = vector.broadcast %cst_53 : f32 to vector<2x84xf32>
    %109 = arith.mulf %107, %108 : vector<2x84xf32>
    %cst_54 = arith.constant 2.000000e+00 : f32
    %110 = vector.broadcast %cst_54 : f32 to vector<2x84xf32>
    %111 = arith.mulf %101, %110 : vector<2x84xf32>
    %112 = arith.mulf %111, %111 : vector<2x84xf32>
    %113 = vector.broadcast %94 : vector<1x84xf32> to vector<2x84xf32>
    %114 = arith.mulf %112, %113 : vector<2x84xf32>
    %115 = vector.broadcast %95 : vector<1x84xf32> to vector<2x84xf32>
    %116 = arith.mulf %115, %109 : vector<2x84xf32>
    %117 = vector.broadcast %96 : vector<1x84xf32> to vector<2x84xf32>
    %118 = arith.mulf %117, %114 : vector<2x84xf32>
    %119 = arith.addf %116, %118 : vector<2x84xf32>
    %cst_55 = arith.constant 1.000000e+00 : f32
    %120 = vector.broadcast %cst_55 : f32 to vector<1x84xf32>
    %121 = arith.subf %120, %95 : vector<1x84xf32>
    %122 = arith.subf %121, %96 : vector<1x84xf32>
    %123 = vector.broadcast %122 : vector<1x84xf32> to vector<2x84xf32>
    %124 = arith.mulf %123, %101 : vector<2x84xf32>
    %125 = arith.addf %119, %124 : vector<2x84xf32>
    %c0_56 = arith.constant 0 : index
    %c0_57 = arith.constant 0 : index
    %126 = vector.load %arg18[%c0_56, %c0_57] : memref<2x84xf32, #tpu.memory_space<vmem>>, vector<2x84xf32>
    tpu.vector_store %arg18[%c0_56, %c0_57], %125 {strides = array<i32>} : memref<2x84xf32, #tpu.memory_space<vmem>>, vector<2x84xf32>,
    return
  }
}

</mosaic_0001>

<bundles_post_ra>
// kernel: a_call__.1
= control target key start
LH: loop header
LB: loop body
LE: loop exit
PB: predicated region body
PF: predicated region fallthrough
CT: control target
= control target key end

     0   :  { %s3149_s0 = inlined_call_operand.vmem [shape: f32[2,768], index: 0, kind: input, shape index: {}]   ;;  %s3150_s1 = inlined_call_operand.hbm [shape: f32[768,512], index: 1, kind: input, shape index: {}]   ;;  %s3151_s2 = inlined_call_operand.hbm [shape: f32[1,512], index: 2, kind: input, shape index: {}]   ;;  %s3152_s3 = inlined_call_operand.hbm [shape: f32[512,256], index: 3, kind: input, shape index: {}]   ;;  %s3153_s4 = inlined_call_operand.hbm [shape: f32[1,256], index: 4, kind: input, shape index: {}]   ;;  %s3154_s5 = inlined_call_operand.hbm [shape: f32[256,256], index: 5, kind: input, shape index: {}]   ;;  %s3155_s6 = inlined_call_operand.hbm [shape: f32[1,256], index: 6, kind: input, shape index: {}]   ;;  %s3156_s7 = inlined_call_operand.hbm [shape: f32[256,128], index: 7, kind: input, shape index: {}]   ;;  %s3157_s8 = inlined_call_operand.hbm [shape: f32[1,128], index: 8, kind: input, shape index: {}]   ;;  %s3158_s9 = inlined_call_operand.hbm [shape: f32[256,336], index: 9, kind: input, shape index: {}]   ;;  %s3159_s10 = inlined_call_operand.hbm [shape: f32[1,336], index: 10, kind: input, shape index: {}]   ;;  %s3160_s11 = inlined_call_operand.hbm [shape: f32[4,336], index: 11, kind: input, shape index: {}]   ;;  %s3161_s12 = inlined_call_operand.hbm [shape: f32[128,84], index: 12, kind: input, shape index: {}]   ;;  %s3162_s13 = inlined_call_operand.hbm [shape: f32[1,84], index: 13, kind: input, shape index: {}]   ;;  %s3163_s14 = inlined_call_operand.hbm [shape: f32[4,84], index: 14, kind: input, shape index: {}]   ;;  %s3164_s15 = inlined_call_operand.vmem [shape: f32[2,336], index: 15, kind: output, shape index: {0}]   ;;  %s3165_s16 = inlined_call_operand.vmem [shape: f32[2,84], index: 16, kind: output, shape index: {1}]   ;;  %s3166_s17 = inlined_call_operand.vmem [shape: f32[2,336], index: 17, kind: output, shape index: {2}]   ;;  %s3167_s18 = inlined_call_operand.vmem [shape: f32[2,84], index: 18, kind: output, shape index: {3}]  }
   0x1   :  { %3169 = sst [smem:[#allocation32_spill]] %s3149_s0 }
   0x2   :  { %3170 = sst [smem:[#allocation33_spill]] %s3150_s1 }
   0x3   :  { %3171 = sst [smem:[#allocation34_spill]] %s3151_s2 }
   0x4   :  { %24 = vsyncpa [#allocation3], 0 }
   0x5   :  { %25 = vsyncpa [#allocation5], 0 }
   0x6   :  { %26 = vsyncpa [#allocation8], 0 }
   0x7   :  { %27 = vsyncpa [#allocation11], 0 }
   0x8   :  { %28 = vsyncpa [#allocation14], 0 }
   0x9   :  { %29 = vsyncpa [#allocation17], 0 }
   0xa   :  { %30 = vsyncpa [#allocation20], 0  ;;  %s3172_s29 = sld [smem:[#allocation34_spill]] }
  0x10   :  { %s52_s30 = sshll.u32 %s3172_s29, 4  ;;  %s53_s30 = int_to_ptr.hbm [resolvable:$true] %s52_s30 }
  0x11   :  { %31 = vsyncpa [#allocation23], 0  ;;  %s2809_s0 = smov [#allocation4]   ;;  %s76_s21 = sshll.u32 %s3153_s4, 4  ;;  %s77_s21 = int_to_ptr.hbm [resolvable:$true] %s76_s21 }
  0x12   :  { %s54_s19 = sshll.u32 %s2809_s0, 4  ;;  %s2810_s22 = smov [#allocation7]   ;;  %s55_s19 = int_to_ptr.vmem [resolvable:$true] %s54_s19 }
  0x13   :  { %57 = dma.hbm_to_vmem [thread:$0]  %s53_s30, 64, %s55_s19, [#allocation5]  }
  0x14   :  { %s78_s2 = sshll.u32 %s2810_s22, 4  ;;  %s100_s25 = sshll.u32 %s3155_s6, 4  ;;  %s79_s2 = int_to_ptr.vmem [resolvable:$true] %s78_s2  ;;  %s101_s25 = int_to_ptr.hbm [resolvable:$true] %s100_s25 }
  0x15   :  { %81 = dma.hbm_to_vmem [thread:$0]  %s77_s21, 32, %s79_s2, [#allocation8]  }
  0x16   :  { %s124_s28 = sshll.u32 %s3157_s8, 4  ;;  %s2811_s29 = smov [#allocation10]   ;;  %s125_s28 = int_to_ptr.hbm [resolvable:$true] %s124_s28 }
  0x17   :  { %s102_s0 = sshll.u32 %s2811_s29, 4  ;;  %s2812_s4 = smov [#allocation13]   ;;  %s103_s0 = int_to_ptr.vmem [resolvable:$true] %s102_s0 }
  0x18   :  { %105 = dma.hbm_to_vmem [thread:$0]  %s101_s25, 32, %s103_s0, [#allocation11]  }
  0x19   :  { %s126_s30 = sshll.u32 %s2812_s4, 4  ;;  %s148_s20 = sshll.u32 %s3159_s10, 4  ;;  %s127_s30 = int_to_ptr.vmem [resolvable:$true] %s126_s30  ;;  %s149_s20 = int_to_ptr.hbm [resolvable:$true] %s148_s20 }
  0x1a   :  { %129 = dma.hbm_to_vmem [thread:$0]  %s125_s28, 16, %s127_s30, [#allocation14]  }
  0x1b   :  { %s2813_s6 = smov [#allocation16]   ;;  %s169_s8 = sshll.u32 %s3161_s12, 4  ;;  %s170_s8 = int_to_ptr.hbm [resolvable:$true] %s169_s8 }
  0x1c   :  { %s150_s21 = sshll.u32 %s2813_s6, 4  ;;  %s2814_s23 = smov [#allocation19]   ;;  %s151_s21 = int_to_ptr.vmem [resolvable:$true] %s150_s21 }
  0x1d   :  { %153 = dma.hbm_to_vmem [thread:$0]  %s149_s20, 48, %s151_s21, [#allocation17]  }
  0x1e   :  { %s171_s24 = sshll.u32 %s2814_s23, 4  ;;  %s3173_s27 = sld [smem:[#allocation33_spill]]  ;;  %s172_s24 = int_to_ptr.vmem [resolvable:$true] %s171_s24 }
  0x1f   :  { %s2815_s10 = smov 128   ;;  %s2816_s0 = smov 8  }
  0x20   :  { %177 = dma.hbm_to_vmem [thread:$0]  %s170_s8, 2048, %s172_s24, [#allocation20], %s2815_s10, %s2815_s10, %s2816_s0  }
  0x21   :  { %s2817_s28 = smov [#allocation2]   ;;  %s62_s19 = sshll.u32 %s3152_s3, 4  ;;  %s63_s19 = int_to_ptr.hbm [resolvable:$true] %s62_s19 }
  0x22   :  { %s40_s4 = sshll.u32 %s2817_s28, 4  ;;  %s2818_s1 = smov 512   ;;  %s41_s4 = int_to_ptr.vmem [resolvable:$true] %s40_s4 }
  0x23   :  { %s2819_s20 = smov 32   ;;  %s2820_s6 = smov [#allocation6]  }
  0x24   :  { %s38_s29 = sshll.u32 %s3173_s27, 4  ;;  %s64_s21 = sshll.u32 %s2820_s6, 4  ;;  %s39_s29 = int_to_ptr.hbm [resolvable:$true] %s38_s29  ;;  %s65_s21 = int_to_ptr.vmem [resolvable:$true] %s64_s21 }
  0x25   :  { %46 = dma.hbm_to_vmem [thread:$0]  %s39_s29, 49152, %s41_s4, [#allocation3], %s2818_s1, %s2818_s1, %s2819_s20  }
  0x26   :  { %s2821_s22 = smov 256   ;;  %s2822_s2 = smov 16  }
  0x27   :  { %70 = dma.hbm_to_vmem [thread:$0]  %s63_s19, 16384, %s65_s21, [#allocation5], %s2821_s22, %s2821_s22, %s2822_s2  }
  0x28   :  { %s86_s8 = sshll.u32 %s3154_s5, 4  ;;  %s2823_s24 = smov [#allocation9]   ;;  %s87_s8 = int_to_ptr.hbm [resolvable:$true] %s86_s8 }
  0x29   :  { %s88_s26 = sshll.u32 %s2823_s24, 4  ;;  %s110_s28 = sshll.u32 %s3156_s7, 4  ;;  %s89_s26 = int_to_ptr.vmem [resolvable:$true] %s88_s26  ;;  %s111_s28 = int_to_ptr.hbm [resolvable:$true] %s110_s28 }
  0x2a   :  { %94 = dma.hbm_to_vmem [thread:$0]  %s87_s8, 8192, %s89_s26, [#allocation8], %s2821_s22, %s2821_s22, %s2822_s2  }
  0x2b   :  { %s2824_s29 = smov [#allocation12]   ;;  %s134_s19 = sshll.u32 %s3158_s9, 4  ;;  %s135_s19 = int_to_ptr.hbm [resolvable:$true] %s134_s19 }
  0x2c   :  { %s112_s4 = sshll.u32 %s2824_s29, 4  ;;  %s2825_s5 = smov [#allocation15]   ;;  %s113_s4 = int_to_ptr.vmem [resolvable:$true] %s112_s4 }
  0x2d   :  { %118 = dma.hbm_to_vmem [thread:$0]  %s111_s28, 4096, %s113_s4, [#allocation11], %s2815_s10, %s2815_s10, %s2816_s0  }
  0x2e   :  { %s136_s1 = sshll.u32 %s2825_s5, 4  ;;  %s159_s7 = sshll.u32 %s3160_s11, 4  ;;  %s137_s1 = int_to_ptr.vmem [resolvable:$true] %s136_s1  ;;  %s160_s7 = int_to_ptr.hbm [resolvable:$true] %s159_s7 }
  0x2f   :  { %s2826_s21 = smov 384   ;;  %s2827_s22 = smov 24  }
  0x30   :  { %142 = dma.hbm_to_vmem [thread:$0]  %s135_s19, 12288, %s137_s1, [#allocation14], %s2826_s21, %s2826_s21, %s2827_s22  }
  0x31   :  { %s2828_s2 = smov [#allocation18]   ;;  %s183_s8 = sshll.u32 %s3162_s13, 4  ;;  %s184_s8 = int_to_ptr.hbm [resolvable:$true] %s183_s8 }
  0x32   :  { %s161_s23 = sshll.u32 %s2828_s2, 4  ;;  %s194_s24 = sshll.u32 %s3163_s14, 4  ;;  %s162_s23 = int_to_ptr.vmem [resolvable:$true] %s161_s23  ;;  %s195_s24 = int_to_ptr.hbm [resolvable:$true] %s194_s24 }
  0x33   :  { %164 = dma.hbm_to_vmem [thread:$0]  %s160_s7, 192, %s162_s23, [#allocation17]  }
  0x34   :  { %s2829_s26 = smov [#allocation21]   ;;  %s2830_s11 = smov [#allocation22]  }
  0x35   :  { %s185_s27 = sshll.u32 %s2829_s26, 4  ;;  %s196_s3 = sshll.u32 %s2830_s11, 4  ;;  %s186_s27 = int_to_ptr.vmem [resolvable:$true] %s185_s27  ;;  %s197_s3 = int_to_ptr.vmem [resolvable:$true] %s196_s3 }
  0x36   :  { %188 = dma.hbm_to_vmem [thread:$0]  %s184_s8, 16, %s186_s27, [#allocation20]  }
  0x37   :  { %199 = dma.hbm_to_vmem [thread:$0]  %s195_s24, 64, %s197_s3, [#allocation23]  }
  0x38   :  { %2793 = dma.done.wait [#allocation3], 49152  }
  0x39   :  { %2794 = vsyncadd [#allocation3], 4294918144 }
  0x3a   :  { %2795 = dma.done.wait [#allocation5], 16448  }
  0x3b   :  { %2796 = vsyncadd [#allocation5], 4294950848 }
  0x3c   :  { %2797 = dma.done.wait [#allocation8], 8224  }
  0x3d   :  { %2798 = vsyncadd [#allocation8], 4294959072 }
  0x3e   :  { %2799 = dma.done.wait [#allocation11], 4128  }
  0x3f   :  { %2800 = vsyncadd [#allocation11], 4294963168 }
  0x40   :  { %2801 = dma.done.wait [#allocation14], 12304  }
  0x41   :  { %2802 = vsyncadd [#allocation14], 4294954992 }
  0x42   :  { %2803 = dma.done.wait [#allocation17], 240  }
  0x43   :  { %2804 = vsyncadd [#allocation17], 4294967056 }
  0x44   :  { %2805 = dma.done.wait [#allocation20], 2064  }
  0x45   :  { %2806 = vsyncadd [#allocation20], 4294965232 }
  0x46   :  { %2807 = dma.done.wait [#allocation23], 64  }
  0x47   :  { %2808 = vsyncadd [#allocation23], 4294967232  ;;  %v318_v0 = vld [vmem:[#allocation2 + $0x1e0] sm:$0xff]  ;;  %v319_v63 = vld [vmem:[#allocation2 + $0x1e8] sm:$0xff]  ;;  %s3174_s28 = sld [smem:[#allocation32_spill]] }
  0x48   :  { %v446_v1 = vld [vmem:[#allocation2 + $0x5e0] sm:$0xff]  ;;  %669 = vmatpush.msra.mxu0 %v318_v0 }
  0x49   :  { %v314_v2 = vld [vmem:[#allocation2 + $0x1c0] sm:$0xff]  ;;  %709 = vmatpush.msra.mxu2 %v446_v1 }
  0x4a   :  { %v382_v3 = vld [vmem:[#allocation2 + $0x3e0] sm:$0xff]  ;;  %670 = vmatpush.msra.mxu0 %v314_v2 }
  0x4b   :  { %v442_v4 = vld [vmem:[#allocation2 + $0x5c0] sm:$0xff]  ;;  %689 = vmatpush.msra.mxu1 %v382_v3 }
  0x4c   :  { %v510_v5 = vld [vmem:[#allocation2 + $0x7e0] sm:$0xff]  ;;  %710 = vmatpush.msra.mxu2 %v442_v4  ;;  %v315_v4 = vld [vmem:[#allocation2 + $0x1c8] sm:$0xff] }
  0x4d   :  { %729 = vmatpush.msra.mxu3 %v510_v5  ;;  %v310_v6 = vld [vmem:[#allocation2 + $0x1a0] sm:$0xff]  ;;  %v383_v5 = vld [vmem:[#allocation2 + $0x3e8] sm:$0xff] }
  0x4e   :  { %v378_v7 = vld [vmem:[#allocation2 + $0x3c0] sm:$0xff]  ;;  %671 = vmatpush.msra.mxu0 %v310_v6 }
  0x4f   :  { %v438_v8 = vld [vmem:[#allocation2 + $0x5a0] sm:$0xff]  ;;  %690 = vmatpush.msra.mxu1 %v378_v7 }
  0x50   :  { %v506_v9 = vld [vmem:[#allocation2 + $0x7c0] sm:$0xff]  ;;  %711 = vmatpush.msra.mxu2 %v438_v8  ;;  %v311_v8 = vld [vmem:[#allocation2 + $0x1a8] sm:$0xff] }
  0x51   :  { %v374_v10 = vld [vmem:[#allocation2 + $0x3a0] sm:$0xff]  ;;  %730 = vmatpush.msra.mxu3 %v506_v9  ;;  %v379_v9 = vld [vmem:[#allocation2 + $0x3c8] sm:$0xff] }
  0x52   :  { %v306_v11 = vld [vmem:[#allocation2 + $0x180] sm:$0xff]  ;;  %691 = vmatpush.msra.mxu1 %v374_v10 }
  0x53   :  { %v434_v12 = vld [vmem:[#allocation2 + $0x580] sm:$0xff]  ;;  %672 = vmatpush.msra.mxu0 %v306_v11 }
  0x54   :  { %v502_v13 = vld [vmem:[#allocation2 + $0x7a0] sm:$0xff]  ;;  %712 = vmatpush.msra.mxu2 %v434_v12  ;;  %v256_v12 = vld [vmem:[%s3174_s28] sm:$0xff] }
  0x55   :  { %v370_v14 = vld [vmem:[#allocation2 + $0x380] sm:$0xff]  ;;  %731 = vmatpush.msra.mxu3 %v502_v13  ;;  %v307_v13 = vld [vmem:[#allocation2 + $0x188] sm:$0xff]  ;;  %654 = vst [vmem:[#allocation1] ss:$4 sm:$0xff] %v256_v12 }
  0x56   :  { %v498_v15 = vld [vmem:[#allocation2 + $0x780] sm:$0xff]  ;;  %692 = vmatpush.msra.mxu1 %v370_v14  ;;  %v375_v14 = vld [vmem:[#allocation2 + $0x3a8] sm:$0xff] }
  0x57   :  { %v302_v16 = vld [vmem:[#allocation2 + $0x160] sm:$0xff]  ;;  %732 = vmatpush.msra.mxu3 %v498_v15  ;;  %v571_v12 = vld [vmem:[#allocation2 + $0x9c8] sm:$0xff] }
  0x58   :  { %v430_v17 = vld [vmem:[#allocation2 + $0x560] sm:$0xff]  ;;  %673 = vmatpush.msra.mxu0 %v302_v16 }
  0x59   :  { %v366_v18 = vld [vmem:[#allocation2 + $0x360] sm:$0xff]  ;;  %713 = vmatpush.msra.mxu2 %v430_v17  ;;  %v303_v17 = vld [vmem:[#allocation2 + $0x168] sm:$0xff] }
  0x5a   :  { %v494_v19 = vld [vmem:[#allocation2 + $0x760] sm:$0xff]  ;;  %693 = vmatpush.msra.mxu1 %v366_v18  ;;  %v371_v18 = vld [vmem:[#allocation2 + $0x388] sm:$0xff] }
  0x5b   :  { %v298_v20 = vld [vmem:[#allocation2 + $0x140] sm:$0xff]  ;;  %733 = vmatpush.msra.mxu3 %v494_v19 }
  0x5c   :  { %v426_v21 = vld [vmem:[#allocation2 + $0x540] sm:$0xff]  ;;  %674 = vmatpush.msra.mxu0 %v298_v20 }
  0x5d   :  { %v362_v22 = vld [vmem:[#allocation2 + $0x340] sm:$0xff]  ;;  %714 = vmatpush.msra.mxu2 %v426_v21  ;;  %v299_v21 = vld [vmem:[#allocation2 + $0x148] sm:$0xff] }
  0x5e   :  { %v490_v23 = vld [vmem:[#allocation2 + $0x740] sm:$0xff]  ;;  %694 = vmatpush.msra.mxu1 %v362_v22  ;;  %v367_v22 = vld [vmem:[#allocation2 + $0x368] sm:$0xff] }
  0x5f   :  { %v294_v24 = vld [vmem:[#allocation2 + $0x120] sm:$0xff]  ;;  %734 = vmatpush.msra.mxu3 %v490_v23 }
  0x60   :  { %v422_v25 = vld [vmem:[#allocation2 + $0x520] sm:$0xff]  ;;  %675 = vmatpush.msra.mxu0 %v294_v24 }
  0x61   :  { %v358_v26 = vld [vmem:[#allocation2 + $0x320] sm:$0xff]  ;;  %715 = vmatpush.msra.mxu2 %v422_v25  ;;  %v295_v25 = vld [vmem:[#allocation2 + $0x128] sm:$0xff] }
  0x62   :  { %v486_v27 = vld [vmem:[#allocation2 + $0x720] sm:$0xff]  ;;  %695 = vmatpush.msra.mxu1 %v358_v26  ;;  %v363_v26 = vld [vmem:[#allocation2 + $0x348] sm:$0xff] }
  0x63   :  { %v290_v28 = vld [vmem:[#allocation2 + $0x100] sm:$0xff]  ;;  %735 = vmatpush.msra.mxu3 %v486_v27 }
  0x64   :  { %v418_v29 = vld [vmem:[#allocation2 + $0x500] sm:$0xff]  ;;  %676 = vmatpush.msra.mxu0 %v290_v28 }
  0x65   :  { %v354_v30 = vld [vmem:[#allocation2 + $0x300] sm:$0xff]  ;;  %716 = vmatpush.msra.mxu2 %v418_v29 }
  0x66   :  { %v482_v31 = vld [vmem:[#allocation2 + $0x700] sm:$0xff]  ;;  %696 = vmatpush.msra.mxu1 %v354_v30  ;;  %v291_v30 = vld [vmem:[#allocation2 + $0x108] sm:$0xff] }
  0x67   :  { %v286_v32 = vld [vmem:[#allocation2 + $0xe0] sm:$0xff]  ;;  %736 = vmatpush.msra.mxu3 %v482_v31  ;;  %v359_v31 = vld [vmem:[#allocation2 + $0x328] sm:$0xff] }
  0x68   :  { %v414_v33 = vld [vmem:[#allocation2 + $0x4e0] sm:$0xff]  ;;  %677 = vmatpush.msra.mxu0 %v286_v32 }
  0x69   :  { %v350_v34 = vld [vmem:[#allocation2 + $0x2e0] sm:$0xff]  ;;  %717 = vmatpush.msra.mxu2 %v414_v33 }
  0x6a   :  { %v478_v35 = vld [vmem:[#allocation2 + $0x6e0] sm:$0xff]  ;;  %697 = vmatpush.msra.mxu1 %v350_v34  ;;  %v287_v34 = vld [vmem:[#allocation2 + $0xe8] sm:$0xff] }
  0x6b   :  { %v282_v36 = vld [vmem:[#allocation2 + $0xc0] sm:$0xff]  ;;  %737 = vmatpush.msra.mxu3 %v478_v35  ;;  %v355_v35 = vld [vmem:[#allocation2 + $0x308] sm:$0xff] }
  0x6c   :  { %v410_v37 = vld [vmem:[#allocation2 + $0x4c0] sm:$0xff]  ;;  %678 = vmatpush.msra.mxu0 %v282_v36 }
  0x6d   :  { %v346_v38 = vld [vmem:[#allocation2 + $0x2c0] sm:$0xff]  ;;  %718 = vmatpush.msra.mxu2 %v410_v37 }
  0x6e   :  { %v474_v39 = vld [vmem:[#allocation2 + $0x6c0] sm:$0xff]  ;;  %698 = vmatpush.msra.mxu1 %v346_v38  ;;  %v283_v38 = vld [vmem:[#allocation2 + $0xc8] sm:$0xff] }
  0x6f   :  { %v278_v40 = vld [vmem:[#allocation2 + $0xa0] sm:$0xff]  ;;  %738 = vmatpush.msra.mxu3 %v474_v39  ;;  %v351_v39 = vld [vmem:[#allocation2 + $0x2e8] sm:$0xff] }
  0x70   :  { %v406_v41 = vld [vmem:[#allocation2 + $0x4a0] sm:$0xff]  ;;  %679 = vmatpush.msra.mxu0 %v278_v40 }
  0x71   :  { %v342_v42 = vld [vmem:[#allocation2 + $0x2a0] sm:$0xff]  ;;  %719 = vmatpush.msra.mxu2 %v406_v41 }
  0x72   :  { %v470_v43 = vld [vmem:[#allocation2 + $0x6a0] sm:$0xff]  ;;  %699 = vmatpush.msra.mxu1 %v342_v42  ;;  %v279_v42 = vld [vmem:[#allocation2 + $0xa8] sm:$0xff] }
  0x73   :  { %v274_v44 = vld [vmem:[#allocation2 + $0x80] sm:$0xff]  ;;  %739 = vmatpush.msra.mxu3 %v470_v43  ;;  %v347_v43 = vld [vmem:[#allocation2 + $0x2c8] sm:$0xff] }
  0x74   :  { %v402_v45 = vld [vmem:[#allocation2 + $0x480] sm:$0xff]  ;;  %680 = vmatpush.msra.mxu0 %v274_v44  ;;  %v2980_v44 = vld.sshfl [vmem:[#allocation1 + $0x10] sm:$0xff pattern:$0x73625140] }
  0x75   :  { %v338_v46 = vld [vmem:[#allocation2 + $0x280] sm:$0xff]  ;;  %720 = vmatpush.msra.mxu2 %v402_v45 }
  0x76   :  { %v466_v47 = vld [vmem:[#allocation2 + $0x680] sm:$0xff]  ;;  %700 = vmatpush.msra.mxu1 %v338_v46 }
  0x77   :  { %v270_v48 = vld [vmem:[#allocation2 + $0x60] sm:$0xff]  ;;  %740 = vmatpush.msra.mxu3 %v466_v47  ;;  %v275_v47 = vld [vmem:[#allocation2 + $0x88] sm:$0xff] }
  0x78   :  { %v398_v49 = vld [vmem:[#allocation2 + $0x460] sm:$0xff]  ;;  %681 = vmatpush.msra.mxu0 %v270_v48  ;;  %v343_v48 = vld [vmem:[#allocation2 + $0x2a8] sm:$0xff] }
  0x79   :  { %v334_v50 = vld [vmem:[#allocation2 + $0x260] sm:$0xff]  ;;  %721 = vmatpush.msra.mxu2 %v398_v49  ;;  %v2982_v49 = vld.sshfl [vmem:[#allocation1] sm:$0xff pattern:$0x73625140] }
  0x7a   :  { %v462_v51 = vld [vmem:[#allocation2 + $0x660] sm:$0xff]  ;;  %701 = vmatpush.msra.mxu1 %v334_v50  ;;  %v2985_v50 = vld.sshfl [vmem:[#allocation1 + $0x18] sm:$0xff pattern:$0x73625140] }
  0x7b   :  { %v266_v52 = vld [vmem:[#allocation2 + $0x40] sm:$0xff]  ;;  %741 = vmatpush.msra.mxu3 %v462_v51 }
  0x7c   :  { %v394_v53 = vld [vmem:[#allocation2 + $0x440] sm:$0xff]  ;;  %682 = vmatpush.msra.mxu0 %v266_v52 }
  0x7d   :  { %v330_v54 = vld [vmem:[#allocation2 + $0x240] sm:$0xff]  ;;  %722 = vmatpush.msra.mxu2 %v394_v53  ;;  %v271_v53 = vld [vmem:[#allocation2 + $0x68] sm:$0xff] }
  0x7e   :  { %v458_v55 = vld [vmem:[#allocation2 + $0x640] sm:$0xff]  ;;  %702 = vmatpush.msra.mxu1 %v330_v54  ;;  %v339_v54 = vld [vmem:[#allocation2 + $0x288] sm:$0xff] }
  0x7f   :  { %v262_v56 = vld [vmem:[#allocation2 + $0x20] sm:$0xff]  ;;  %742 = vmatpush.msra.mxu3 %v458_v55 }
  0x80   :  { %v390_v57 = vld [vmem:[#allocation2 + $0x420] sm:$0xff]  ;;  %683 = vmatpush.msra.mxu0 %v262_v56 }
  0x81   :  { %v326_v58 = vld [vmem:[#allocation2 + $0x220] sm:$0xff]  ;;  %723 = vmatpush.msra.mxu2 %v390_v57 }
  0x82   :  { %v454_v59 = vld [vmem:[#allocation2 + $0x620] sm:$0xff]  ;;  %703 = vmatpush.msra.mxu1 %v326_v58  ;;  %v267_v58 = vld [vmem:[#allocation2 + $0x48] sm:$0xff] }
  0x83   :  { %v258_v60 = vld [vmem:[#allocation2] sm:$0xff]  ;;  %743 = vmatpush.msra.mxu3 %v454_v59  ;;  %v335_v59 = vld [vmem:[#allocation2 + $0x268] sm:$0xff] }
  0x84   :  { %v386_v61 = vld [vmem:[#allocation2 + $0x400] sm:$0xff]  ;;  %684 = vmatpush.msra.mxu0 %v258_v60 }
  0x85   :  { %v574_v62 = vld [vmem:[#allocation2 + $0x9e0] sm:$0xff]  ;;  %724 = vmatpush.msra.mxu2 %v386_v61  ;;  %685 = vmatmul.f32.vlgmr.msra.gmra.mxu0 %v2982_v49 }
  0x86   :  { %v322_v0 = vld [vmem:[#allocation2 + $0x200] sm:$0xff]  ;;  %749 = vmatpush.msrb.mxu0 %v574_v62  ;;  %725 = vmatmul.f32.vlgmr.msra.gmra.mxu2 %v2980_v44  ;;  %v263_v62 = vld [vmem:[#allocation2 + $0x28] sm:$0xff] }
  0x87   :  { %v450_v1 = vld [vmem:[#allocation2 + $0x600] sm:$0xff]  ;;  %789 = vmatpush.msrb.mxu2 %v319_v63  ;;  %704 = vmatpush.msra.mxu1 %v322_v0  ;;  %v331_v63 = vld [vmem:[#allocation2 + $0x248] sm:$0xff] }
  0x88   :  { %v570_v2 = vld [vmem:[#allocation2 + $0x9c0] sm:$0xff]  ;;  %744 = vmatpush.msra.mxu3 %v450_v1 }
  0x89   :  { %v638_v3 = vld [vmem:[#allocation2 + $0xbe0] sm:$0xff]  ;;  %750 = vmatpush.msrb.mxu0 %v570_v2  ;;  %790 = vmatpush.msrb.mxu2 %v315_v4  ;;  %v259_v2 = vld [vmem:[#allocation2 + $0x8] sm:$0xff] }
  0x8a   :  { %v566_v6 = vld [vmem:[#allocation2 + $0x9a0] sm:$0xff]  ;;  %769 = vmatpush.msrb.mxu1 %v638_v3  ;;  %809 = vmatpush.msrb.mxu3 %v383_v5  ;;  %v327_v3 = vld [vmem:[#allocation2 + $0x228] sm:$0xff] }
  0x8b   :  { %v634_v7 = vld [vmem:[#allocation2 + $0xbc0] sm:$0xff]  ;;  %751 = vmatpush.msrb.mxu0 %v566_v6  ;;  %791 = vmatpush.msrb.mxu2 %v311_v8  ;;  %v575_v5 = vld [vmem:[#allocation2 + $0x9e8] sm:$0xff] }
  0x8c   :  { %v562_v10 = vld [vmem:[#allocation2 + $0x980] sm:$0xff]  ;;  %770 = vmatpush.msrb.mxu1 %v634_v7  ;;  %810 = vmatpush.msrb.mxu3 %v379_v9  ;;  %v447_v6 = vld [vmem:[#allocation2 + $0x5e8] sm:$0xff] }
  0x8d   :  { %v630_v11 = vld [vmem:[#allocation2 + $0xba0] sm:$0xff]  ;;  %752 = vmatpush.msrb.mxu0 %v562_v10  ;;  %792 = vmatpush.msrb.mxu2 %v307_v13  ;;  %v323_v8 = vld [vmem:[#allocation2 + $0x208] sm:$0xff] }
  0x8e   :  { %v558_v15 = vld [vmem:[#allocation2 + $0x960] sm:$0xff]  ;;  %771 = vmatpush.msrb.mxu1 %v630_v11  ;;  %811 = vmatpush.msrb.mxu3 %v375_v14  ;;  %v443_v10 = vld [vmem:[#allocation2 + $0x5c8] sm:$0xff] }
  0x8f   :  { %v626_v16 = vld [vmem:[#allocation2 + $0xb80] sm:$0xff]  ;;  %753 = vmatpush.msrb.mxu0 %v558_v15  ;;  %793 = vmatpush.msrb.mxu2 %v303_v17  ;;  %v511_v11 = vld [vmem:[#allocation2 + $0x7e8] sm:$0xff] }
  0x90   :  { %v554_v19 = vld [vmem:[#allocation2 + $0x940] sm:$0xff]  ;;  %772 = vmatpush.msrb.mxu1 %v626_v16  ;;  %812 = vmatpush.msrb.mxu3 %v371_v18  ;;  %v639_v13 = vld [vmem:[#allocation2 + $0xbe8] sm:$0xff] }
  0x91   :  { %v622_v20 = vld [vmem:[#allocation2 + $0xb60] sm:$0xff]  ;;  %754 = vmatpush.msrb.mxu0 %v554_v19  ;;  %794 = vmatpush.msrb.mxu2 %v299_v21  ;;  %v439_v14 = vld [vmem:[#allocation2 + $0x5a8] sm:$0xff] }
  0x92   :  { %v550_v23 = vld [vmem:[#allocation2 + $0x920] sm:$0xff]  ;;  %773 = vmatpush.msrb.mxu1 %v622_v20  ;;  %813 = vmatpush.msrb.mxu3 %v367_v22  ;;  %v507_v15 = vld [vmem:[#allocation2 + $0x7c8] sm:$0xff] }
  0x93   :  { %v618_v24 = vld [vmem:[#allocation2 + $0xb40] sm:$0xff]  ;;  %755 = vmatpush.msrb.mxu0 %v550_v23  ;;  %795 = vmatpush.msrb.mxu2 %v295_v25  ;;  %v567_v16 = vld [vmem:[#allocation2 + $0x9a8] sm:$0xff] }
  0x94   :  { %v257_v27 = vld [vmem:[%s3174_s28 + $0x8] sm:$0xf]  ;;  %774 = vmatpush.msrb.mxu1 %v618_v24  ;;  %814 = vmatpush.msrb.mxu3 %v363_v26  ;;  %v635_v17 = vld [vmem:[#allocation2 + $0xbc8] sm:$0xff] }
  0x95   :  { %v546_v28 = vld [vmem:[#allocation2 + $0x900] sm:$0xff]  ;;  %656 = vst [vmem:[#allocation1 + $0x20] ss:$4 sm:$0xff] %v257_v27  ;;  %796 = vmatpush.msrb.mxu2 %v291_v30  ;;  %745 = vmatmul.f32.vlgmr.msra.gmra.mxu3 %v2985_v50  ;;  %v435_v18 = vld [vmem:[#allocation2 + $0x588] sm:$0xff] }
  0x96   :  { %v614_v29 = vld [vmem:[#allocation2 + $0xb20] sm:$0xff]  ;;  %756 = vmatpush.msrb.mxu0 %v546_v28  ;;  %815 = vmatpush.msrb.mxu3 %v359_v31  ;;  %v503_v19 = vld [vmem:[#allocation2 + $0x7a8] sm:$0xff] }
  0x97   :  { %v542_v32 = vld [vmem:[#allocation2 + $0x8e0] sm:$0xff]  ;;  %775 = vmatpush.msrb.mxu1 %v614_v29  ;;  %797 = vmatpush.msrb.mxu2 %v287_v34  ;;  %v563_v20 = vld [vmem:[#allocation2 + $0x988] sm:$0xff] }
  0x98   :  { %v610_v33 = vld [vmem:[#allocation2 + $0xb00] sm:$0xff]  ;;  %757 = vmatpush.msrb.mxu0 %v542_v32  ;;  %816 = vmatpush.msrb.mxu3 %v355_v35  ;;  %v631_v21 = vld [vmem:[#allocation2 + $0xba8] sm:$0xff] }
  0x99   :  { %v538_v36 = vld [vmem:[#allocation2 + $0x8c0] sm:$0xff]  ;;  %776 = vmatpush.msrb.mxu1 %v610_v33  ;;  %798 = vmatpush.msrb.mxu2 %v283_v38  ;;  %v431_v22 = vld [vmem:[#allocation2 + $0x568] sm:$0xff] }
  0x9a   :  { %v606_v37 = vld [vmem:[#allocation2 + $0xae0] sm:$0xff]  ;;  %758 = vmatpush.msrb.mxu0 %v538_v36  ;;  %817 = vmatpush.msrb.mxu3 %v351_v39  ;;  %v499_v23 = vld [vmem:[#allocation2 + $0x788] sm:$0xff] }
  0x9b   :  { %v534_v40 = vld [vmem:[#allocation2 + $0x8a0] sm:$0xff]  ;;  %777 = vmatpush.msrb.mxu1 %v606_v37  ;;  %799 = vmatpush.msrb.mxu2 %v279_v42  ;;  %v559_v24 = vld [vmem:[#allocation2 + $0x968] sm:$0xff] }
  0x9c   :  { %v602_v41 = vld [vmem:[#allocation2 + $0xac0] sm:$0xff]  ;;  %759 = vmatpush.msrb.mxu0 %v534_v40  ;;  %818 = vmatpush.msrb.mxu3 %v347_v43  ;;  %v2992_v4 = vld.sshfl [vmem:[#allocation1 + $0x20] sm:$0xff pattern:$0x73625140]  ;;  %v627_v25 = vld [vmem:[#allocation2 + $0xb88] sm:$0xff] }
  0x9d   :  { %v530_v45 = vld [vmem:[#allocation2 + $0x880] sm:$0xff]  ;;  %778 = vmatpush.msrb.mxu1 %v602_v41  ;;  %800 = vmatpush.msrb.mxu2 %v275_v47  ;;  %v427_v26 = vld [vmem:[#allocation2 + $0x548] sm:$0xff] }
  0x9e   :  { %v598_v46 = vld [vmem:[#allocation2 + $0xaa0] sm:$0xff]  ;;  %760 = vmatpush.msrb.mxu0 %v530_v45  ;;  %819 = vmatpush.msrb.mxu3 %v343_v48  ;;  %v495_v27 = vld [vmem:[#allocation2 + $0x768] sm:$0xff] }
  0x9f   :  { %v526_v51 = vld [vmem:[#allocation2 + $0x860] sm:$0xff]  ;;  %779 = vmatpush.msrb.mxu1 %v598_v46  ;;  %801 = vmatpush.msrb.mxu2 %v271_v53  ;;  %v555_v28 = vld [vmem:[#allocation2 + $0x948] sm:$0xff] }
  0xa0   :  { %v594_v52 = vld [vmem:[#allocation2 + $0xa80] sm:$0xff]  ;;  %761 = vmatpush.msrb.mxu0 %v526_v51  ;;  %820 = vmatpush.msrb.mxu3 %v339_v54  ;;  %v623_v29 = vld [vmem:[#allocation2 + $0xb68] sm:$0xff] }
  0xa1   :  { %v2988_v55 = vld.sshfl [vmem:[#allocation1 + $0x8] sm:$0xff pattern:$0x73625140]  ;;  %780 = vmatpush.msrb.mxu1 %v594_v52  ;;  %802 = vmatpush.msrb.mxu2 %v267_v58  ;;  %v423_v30 = vld [vmem:[#allocation2 + $0x528] sm:$0xff] }
  0xa2   :  { %v522_v56 = vld [vmem:[#allocation2 + $0x840] sm:$0xff]  ;;  %705 = vmatmul.f32.vlgmr.msra.gmra.mxu1 %v2988_v55  ;;  %821 = vmatpush.msrb.mxu3 %v335_v59  ;;  %v491_v31 = vld [vmem:[#allocation2 + $0x748] sm:$0xff] }
  0xa3   :  { %v590_v57 = vld [vmem:[#allocation2 + $0xa60] sm:$0xff]  ;;  %762 = vmatpush.msrb.mxu0 %v522_v56  ;;  %803 = vmatpush.msrb.mxu2 %v263_v62  ;;  %v551_v32 = vld [vmem:[#allocation2 + $0x928] sm:$0xff] }
  0xa4   :  { %v518_v60 = vld [vmem:[#allocation2 + $0x820] sm:$0xff]  ;;  %781 = vmatpush.msrb.mxu1 %v590_v57  ;;  %822 = vmatpush.msrb.mxu3 %v331_v63  ;;  %v619_v33 = vld [vmem:[#allocation2 + $0xb48] sm:$0xff] }
  0xa5   :  { %v586_v61 = vld [vmem:[#allocation2 + $0xa40] sm:$0xff]  ;;  %763 = vmatpush.msrb.mxu0 %v518_v60  ;;  %804 = vmatpush.msrb.mxu2 %v259_v2  ;;  %v419_v34 = vld [vmem:[#allocation2 + $0x508] sm:$0xff] }
  0xa6   :  { %v514_v0 = vld [vmem:[#allocation2 + $0x800] sm:$0xff]  ;;  %782 = vmatpush.msrb.mxu1 %v586_v61  ;;  %823 = vmatpush.msrb.mxu3 %v327_v3  ;;  %v487_v35 = vld [vmem:[#allocation2 + $0x728] sm:$0xff] }
  0xa7   :  { %v582_v1 = vld [vmem:[#allocation2 + $0xa20] sm:$0xff]  ;;  %764 = vmatpush.msrb.mxu0 %v514_v0  ;;  %869 = vmatpush.msra.mxu2 %v575_v5  ;;  %v547_v36 = vld [vmem:[#allocation2 + $0x908] sm:$0xff] }
  0xa8   :  { %783 = vmatpush.msrb.mxu1 %v582_v1  ;;  %v578_v7 = vld [vmem:[#allocation2 + $0xa00] sm:$0xff]  ;;  %765 = vmatmul.f32.vlgmr.msrb.gmra.mxu0 %v2992_v4  ;;  %v615_v37 = vld [vmem:[#allocation2 + $0xb28] sm:$0xff] }
  0xa9   :  { %v2994_v9 = vld.sshfl [vmem:[#allocation1 + $0x28] sm:$0xff pattern:$0x73625140]  ;;  %829 = vmatpush.msra.mxu0 %v447_v6  ;;  %824 = vmatpush.msrb.mxu3 %v323_v8  ;;  %v415_v38 = vld [vmem:[#allocation2 + $0x4e8] sm:$0xff] }
  0xaa   :  { %784 = vmatpush.msrb.mxu1 %v578_v7  ;;  %870 = vmatpush.msra.mxu2 %v571_v12  ;;  %v483_v39 = vld [vmem:[#allocation2 + $0x708] sm:$0xff]  ;;  %v320_v12 = vld [vmem:[#allocation2 + $0x1f0] sm:$0xff] }
  0xab   :  { %785 = vmatmul.f32.vlgmr.msrb.gmra.mxu1 %v2994_v9  ;;  %830 = vmatpush.msra.mxu0 %v443_v10  ;;  %v543_v40 = vld [vmem:[#allocation2 + $0x8e8] sm:$0xff] }
  0xac   :  { %849 = vmatpush.msra.mxu1 %v511_v11  ;;  %889 = vmatpush.msra.mxu3 %v639_v13  ;;  %v611_v41 = vld [vmem:[#allocation2 + $0xb08] sm:$0xff]  ;;  %v448_v13 = vld [vmem:[#allocation2 + $0x5f0] sm:$0xff] }
  0xad   :  { %831 = vmatpush.msra.mxu0 %v439_v14  ;;  %871 = vmatpush.msra.mxu2 %v567_v16  ;;  %v411_v42 = vld [vmem:[#allocation2 + $0x4c8] sm:$0xff]  ;;  %v316_v16 = vld [vmem:[#allocation2 + $0x1d0] sm:$0xff] }
  0xae   :  { %850 = vmatpush.msra.mxu1 %v507_v15  ;;  %890 = vmatpush.msra.mxu3 %v635_v17  ;;  %v479_v43 = vld [vmem:[#allocation2 + $0x6e8] sm:$0xff]  ;;  %v384_v17 = vld [vmem:[#allocation2 + $0x3f0] sm:$0xff] }
  0xaf   :  { %832 = vmatpush.msra.mxu0 %v435_v18  ;;  %872 = vmatpush.msra.mxu2 %v563_v20  ;;  %v539_v45 = vld [vmem:[#allocation2 + $0x8c8] sm:$0xff]  ;;  %v444_v18 = vld [vmem:[#allocation2 + $0x5d0] sm:$0xff] }
  0xb0   :  { %851 = vmatpush.msra.mxu1 %v503_v19  ;;  %891 = vmatpush.msra.mxu3 %v631_v21  ;;  %v607_v46 = vld [vmem:[#allocation2 + $0xae8] sm:$0xff]  ;;  %v512_v19 = vld [vmem:[#allocation2 + $0x7f0] sm:$0xff] }
  0xb1   :  { %833 = vmatpush.msra.mxu0 %v431_v22  ;;  %873 = vmatpush.msra.mxu2 %v559_v24  ;;  %v407_v47 = vld [vmem:[#allocation2 + $0x4a8] sm:$0xff]  ;;  %v312_v20 = vld [vmem:[#allocation2 + $0x1b0] sm:$0xff] }
  0xb2   :  { %852 = vmatpush.msra.mxu1 %v499_v23  ;;  %892 = vmatpush.msra.mxu3 %v627_v25  ;;  %v475_v48 = vld [vmem:[#allocation2 + $0x6c8] sm:$0xff]  ;;  %v380_v21 = vld [vmem:[#allocation2 + $0x3d0] sm:$0xff] }
  0xb3   :  { %834 = vmatpush.msra.mxu0 %v427_v26  ;;  %874 = vmatpush.msra.mxu2 %v555_v28  ;;  %v535_v51 = vld [vmem:[#allocation2 + $0x8a8] sm:$0xff]  ;;  %v440_v22 = vld [vmem:[#allocation2 + $0x5b0] sm:$0xff] }
  0xb4   :  { %853 = vmatpush.msra.mxu1 %v495_v27  ;;  %893 = vmatpush.msra.mxu3 %v623_v29  ;;  %v603_v52 = vld [vmem:[#allocation2 + $0xac8] sm:$0xff]  ;;  %v508_v23 = vld [vmem:[#allocation2 + $0x7d0] sm:$0xff] }
  0xb5   :  { %835 = vmatpush.msra.mxu0 %v423_v30  ;;  %875 = vmatpush.msra.mxu2 %v551_v32  ;;  %v403_v53 = vld [vmem:[#allocation2 + $0x488] sm:$0xff]  ;;  %v308_v24 = vld [vmem:[#allocation2 + $0x190] sm:$0xff] }
  0xb6   :  { %854 = vmatpush.msra.mxu1 %v491_v31  ;;  %894 = vmatpush.msra.mxu3 %v619_v33  ;;  %v471_v54 = vld [vmem:[#allocation2 + $0x6a8] sm:$0xff]  ;;  %v376_v25 = vld [vmem:[#allocation2 + $0x3b0] sm:$0xff] }
  0xb7   :  { %836 = vmatpush.msra.mxu0 %v419_v34  ;;  %876 = vmatpush.msra.mxu2 %v547_v36  ;;  %v531_v56 = vld [vmem:[#allocation2 + $0x888] sm:$0xff]  ;;  %v436_v26 = vld [vmem:[#allocation2 + $0x590] sm:$0xff] }
  0xb8   :  { %855 = vmatpush.msra.mxu1 %v487_v35  ;;  %895 = vmatpush.msra.mxu3 %v615_v37  ;;  %v599_v57 = vld [vmem:[#allocation2 + $0xaa8] sm:$0xff]  ;;  %v504_v27 = vld [vmem:[#allocation2 + $0x7b0] sm:$0xff] }
  0xb9   :  { %837 = vmatpush.msra.mxu0 %v415_v38  ;;  %877 = vmatpush.msra.mxu2 %v543_v40  ;;  %v399_v58 = vld [vmem:[#allocation2 + $0x468] sm:$0xff]  ;;  %v304_v28 = vld [vmem:[#allocation2 + $0x170] sm:$0xff] }
  0xba   :  { %856 = vmatpush.msra.mxu1 %v483_v39  ;;  %896 = vmatpush.msra.mxu3 %v611_v41  ;;  %v467_v59 = vld [vmem:[#allocation2 + $0x688] sm:$0xff]  ;;  %v372_v29 = vld [vmem:[#allocation2 + $0x390] sm:$0xff] }
  0xbb   :  { %838 = vmatpush.msra.mxu0 %v411_v42  ;;  %878 = vmatpush.msra.mxu2 %v539_v45  ;;  %v527_v60 = vld [vmem:[#allocation2 + $0x868] sm:$0xff]  ;;  %v432_v30 = vld [vmem:[#allocation2 + $0x570] sm:$0xff] }
  0xbc   :  { %857 = vmatpush.msra.mxu1 %v479_v43  ;;  %897 = vmatpush.msra.mxu3 %v607_v46  ;;  %v595_v61 = vld [vmem:[#allocation2 + $0xa88] sm:$0xff]  ;;  %v500_v31 = vld [vmem:[#allocation2 + $0x790] sm:$0xff] }
  0xbd   :  { %839 = vmatpush.msra.mxu0 %v407_v47  ;;  %879 = vmatpush.msra.mxu2 %v535_v51  ;;  %v395_v62 = vld [vmem:[#allocation2 + $0x448] sm:$0xff]  ;;  %v300_v32 = vld [vmem:[#allocation2 + $0x150] sm:$0xff] }
  0xbe   :  { %858 = vmatpush.msra.mxu1 %v475_v48  ;;  %898 = vmatpush.msra.mxu3 %v603_v52  ;;  %v463_v63 = vld [vmem:[#allocation2 + $0x668] sm:$0xff]  ;;  %v368_v33 = vld [vmem:[#allocation2 + $0x370] sm:$0xff] }
  0xbf   :  { %840 = vmatpush.msra.mxu0 %v403_v53  ;;  %880 = vmatpush.msra.mxu2 %v531_v56  ;;  %v523_v0 = vld [vmem:[#allocation2 + $0x848] sm:$0xff]  ;;  %v428_v34 = vld [vmem:[#allocation2 + $0x550] sm:$0xff] }
  0xc0   :  { %859 = vmatpush.msra.mxu1 %v471_v54  ;;  %899 = vmatpush.msra.mxu3 %v599_v57  ;;  %v591_v1 = vld [vmem:[#allocation2 + $0xa68] sm:$0xff]  ;;  %v496_v35 = vld [vmem:[#allocation2 + $0x770] sm:$0xff] }
  0xc1   :  { %805 = vmatmul.f32.vlgmr.msrb.gmra.mxu2 %v2982_v49  ;;  %841 = vmatpush.msra.mxu0 %v399_v58  ;;  %v391_v2 = vld [vmem:[#allocation2 + $0x428] sm:$0xff]  ;;  %v296_v36 = vld [vmem:[#allocation2 + $0x130] sm:$0xff] }
  0xc2   :  { %860 = vmatpush.msra.mxu1 %v467_v59  ;;  %881 = vmatpush.msra.mxu2 %v527_v60  ;;  %v459_v3 = vld [vmem:[#allocation2 + $0x648] sm:$0xff]  ;;  %v364_v37 = vld [vmem:[#allocation2 + $0x350] sm:$0xff] }
  0xc3   :  { %900 = vmatpush.msra.mxu3 %v595_v61  ;;  %842 = vmatpush.msra.mxu0 %v395_v62  ;;  %v519_v5 = vld [vmem:[#allocation2 + $0x828] sm:$0xff]  ;;  %v424_v38 = vld [vmem:[#allocation2 + $0x530] sm:$0xff] }
  0xc4   :  { %825 = vmatmul.f32.vlgmr.msrb.gmra.mxu3 %v2988_v55  ;;  %861 = vmatpush.msra.mxu1 %v463_v63  ;;  %v587_v6 = vld [vmem:[#allocation2 + $0xa48] sm:$0xff]  ;;  %v492_v39 = vld [vmem:[#allocation2 + $0x750] sm:$0xff] }
  0xc5   :  { %882 = vmatpush.msra.mxu2 %v523_v0  ;;  %901 = vmatpush.msra.mxu3 %v591_v1  ;;  %v387_v7 = vld [vmem:[#allocation2 + $0x408] sm:$0xff]  ;;  %v292_v40 = vld [vmem:[#allocation2 + $0x110] sm:$0xff] }
  0xc6   :  { %v455_v8 = vld [vmem:[#allocation2 + $0x628] sm:$0xff]  ;;  %843 = vmatpush.msra.mxu0 %v391_v2  ;;  %862 = vmatpush.msra.mxu1 %v459_v3  ;;  %v360_v41 = vld [vmem:[#allocation2 + $0x330] sm:$0xff] }
  0xc7   :  { %v515_v10 = vld [vmem:[#allocation2 + $0x808] sm:$0xff]  ;;  %883 = vmatpush.msra.mxu2 %v519_v5  ;;  %902 = vmatpush.msra.mxu3 %v587_v6  ;;  %v420_v42 = vld [vmem:[#allocation2 + $0x510] sm:$0xff] }
  0xc8   :  { %v583_v11 = vld [vmem:[#allocation2 + $0xa28] sm:$0xff]  ;;  %844 = vmatpush.msra.mxu0 %v387_v7  ;;  %863 = vmatpush.msra.mxu1 %v455_v8  ;;  %v488_v43 = vld [vmem:[#allocation2 + $0x730] sm:$0xff] }
  0xc9   :  { %v451_v14 = vld [vmem:[#allocation2 + $0x608] sm:$0xff]  ;;  %884 = vmatpush.msra.mxu2 %v515_v10  ;;  %903 = vmatpush.msra.mxu3 %v583_v11  ;;  %v288_v45 = vld [vmem:[#allocation2 + $0xf0] sm:$0xff] }
  0xca   :  { %v579_v15 = vld [vmem:[#allocation2 + $0xa08] sm:$0xff]  ;;  %885 = vmatmul.f32.vlgmr.msra.gmra.mxu2 %v2992_v4  ;;  %909 = vmatpush.msrb.mxu0 %v320_v12  ;;  %v356_v46 = vld [vmem:[#allocation2 + $0x310] sm:$0xff] }
  0xcb   :  { %949 = vmatpush.msrb.mxu2 %v448_v13  ;;  %864 = vmatpush.msra.mxu1 %v451_v14  ;;  %v416_v47 = vld [vmem:[#allocation2 + $0x4f0] sm:$0xff] }
  0xcc   :  { %904 = vmatpush.msra.mxu3 %v579_v15  ;;  %845 = vmatmul.f32.vlgmr.msra.gmra.mxu0 %v2980_v44  ;;  %v484_v48 = vld [vmem:[#allocation2 + $0x710] sm:$0xff] }
  0xcd   :  { %905 = vmatmul.f32.vlgmr.msra.gmra.mxu3 %v2994_v9  ;;  %910 = vmatpush.msrb.mxu0 %v316_v16  ;;  %v284_v51 = vld [vmem:[#allocation2 + $0xd0] sm:$0xff] }
  0xce   :  { %929 = vmatpush.msrb.mxu1 %v384_v17  ;;  %950 = vmatpush.msrb.mxu2 %v444_v18  ;;  %v352_v52 = vld [vmem:[#allocation2 + $0x2f0] sm:$0xff] }
  0xcf   :  { %969 = vmatpush.msrb.mxu3 %v512_v19  ;;  %865 = vmatmul.f32.vlgmr.msra.gmra.mxu1 %v2985_v50  ;;  %v412_v53 = vld [vmem:[#allocation2 + $0x4d0] sm:$0xff]  ;;  %v321_v19 = vld [vmem:[#allocation2 + $0x1f8] sm:$0xff] }
  0xd0   :  { %911 = vmatpush.msrb.mxu0 %v312_v20  ;;  %930 = vmatpush.msrb.mxu1 %v380_v21  ;;  %v480_v54 = vld [vmem:[#allocation2 + $0x6f0] sm:$0xff] }
  0xd1   :  { %951 = vmatpush.msrb.mxu2 %v440_v22  ;;  %970 = vmatpush.msrb.mxu3 %v508_v23  ;;  %v280_v56 = vld [vmem:[#allocation2 + $0xb0] sm:$0xff] }
  0xd2   :  { %912 = vmatpush.msrb.mxu0 %v308_v24  ;;  %931 = vmatpush.msrb.mxu1 %v376_v25  ;;  %v348_v57 = vld [vmem:[#allocation2 + $0x2d0] sm:$0xff]  ;;  %v317_v24 = vld [vmem:[#allocation2 + $0x1d8] sm:$0xff] }
  0xd3   :  { %952 = vmatpush.msrb.mxu2 %v436_v26  ;;  %971 = vmatpush.msrb.mxu3 %v504_v27  ;;  %v408_v58 = vld [vmem:[#allocation2 + $0x4b0] sm:$0xff]  ;;  %v385_v25 = vld [vmem:[#allocation2 + $0x3f8] sm:$0xff] }
  0xd4   :  { %913 = vmatpush.msrb.mxu0 %v304_v28  ;;  %932 = vmatpush.msrb.mxu1 %v372_v29  ;;  %v476_v59 = vld [vmem:[#allocation2 + $0x6d0] sm:$0xff]  ;;  %v313_v28 = vld [vmem:[#allocation2 + $0x1b8] sm:$0xff] }
  0xd5   :  { %953 = vmatpush.msrb.mxu2 %v432_v30  ;;  %972 = vmatpush.msrb.mxu3 %v500_v31  ;;  %v276_v60 = vld [vmem:[#allocation2 + $0x90] sm:$0xff]  ;;  %v381_v29 = vld [vmem:[#allocation2 + $0x3d8] sm:$0xff] }
  0xd6   :  { %914 = vmatpush.msrb.mxu0 %v300_v32  ;;  %933 = vmatpush.msrb.mxu1 %v368_v33  ;;  %v344_v61 = vld [vmem:[#allocation2 + $0x2b0] sm:$0xff]  ;;  %v309_v32 = vld [vmem:[#allocation2 + $0x198] sm:$0xff] }
  0xd7   :  { %954 = vmatpush.msrb.mxu2 %v428_v34  ;;  %973 = vmatpush.msrb.mxu3 %v496_v35  ;;  %v404_v62 = vld [vmem:[#allocation2 + $0x490] sm:$0xff]  ;;  %v377_v33 = vld [vmem:[#allocation2 + $0x3b8] sm:$0xff] }
  0xd8   :  { %915 = vmatpush.msrb.mxu0 %v296_v36  ;;  %934 = vmatpush.msrb.mxu1 %v364_v37  ;;  %v472_v63 = vld [vmem:[#allocation2 + $0x6b0] sm:$0xff]  ;;  %v305_v36 = vld [vmem:[#allocation2 + $0x178] sm:$0xff] }
  0xd9   :  { %955 = vmatpush.msrb.mxu2 %v424_v38  ;;  %974 = vmatpush.msrb.mxu3 %v492_v39  ;;  %v272_v0 = vld [vmem:[#allocation2 + $0x70] sm:$0xff]  ;;  %v373_v37 = vld [vmem:[#allocation2 + $0x398] sm:$0xff] }
  0xda   :  { %916 = vmatpush.msrb.mxu0 %v292_v40  ;;  %935 = vmatpush.msrb.mxu1 %v360_v41  ;;  %v340_v1 = vld [vmem:[#allocation2 + $0x290] sm:$0xff]  ;;  %v301_v40 = vld [vmem:[#allocation2 + $0x158] sm:$0xff] }
  0xdb   :  { %956 = vmatpush.msrb.mxu2 %v420_v42  ;;  %975 = vmatpush.msrb.mxu3 %v488_v43  ;;  %v400_v2 = vld [vmem:[#allocation2 + $0x470] sm:$0xff]  ;;  %v369_v41 = vld [vmem:[#allocation2 + $0x378] sm:$0xff] }
  0xdc   :  { %917 = vmatpush.msrb.mxu0 %v288_v45  ;;  %936 = vmatpush.msrb.mxu1 %v356_v46  ;;  %v468_v3 = vld [vmem:[#allocation2 + $0x690] sm:$0xff]  ;;  %v297_v45 = vld [vmem:[#allocation2 + $0x138] sm:$0xff] }
  0xdd   :  { %957 = vmatpush.msrb.mxu2 %v416_v47  ;;  %976 = vmatpush.msrb.mxu3 %v484_v48  ;;  %v268_v5 = vld [vmem:[#allocation2 + $0x50] sm:$0xff]  ;;  %v365_v46 = vld [vmem:[#allocation2 + $0x358] sm:$0xff] }
  0xde   :  { %918 = vmatpush.msrb.mxu0 %v284_v51  ;;  %937 = vmatpush.msrb.mxu1 %v352_v52  ;;  %v336_v6 = vld [vmem:[#allocation2 + $0x270] sm:$0xff]  ;;  %v293_v51 = vld [vmem:[#allocation2 + $0x118] sm:$0xff] }
  0xdf   :  { %958 = vmatpush.msrb.mxu2 %v412_v53  ;;  %977 = vmatpush.msrb.mxu3 %v480_v54  ;;  %v396_v7 = vld [vmem:[#allocation2 + $0x450] sm:$0xff]  ;;  %v361_v52 = vld [vmem:[#allocation2 + $0x338] sm:$0xff] }
  0xe0   :  { %919 = vmatpush.msrb.mxu0 %v280_v56  ;;  %938 = vmatpush.msrb.mxu1 %v348_v57  ;;  %v464_v8 = vld [vmem:[#allocation2 + $0x670] sm:$0xff]  ;;  %v289_v56 = vld [vmem:[#allocation2 + $0xf8] sm:$0xff] }
  0xe1   :  { %959 = vmatpush.msrb.mxu2 %v408_v58  ;;  %978 = vmatpush.msrb.mxu3 %v476_v59  ;;  %v264_v10 = vld [vmem:[#allocation2 + $0x30] sm:$0xff]  ;;  %v357_v57 = vld [vmem:[#allocation2 + $0x318] sm:$0xff] }
  0xe2   :  { %920 = vmatpush.msrb.mxu0 %v276_v60  ;;  %939 = vmatpush.msrb.mxu1 %v344_v61  ;;  %v332_v11 = vld [vmem:[#allocation2 + $0x250] sm:$0xff]  ;;  %v285_v60 = vld [vmem:[#allocation2 + $0xd8] sm:$0xff] }
  0xe3   :  { %960 = vmatpush.msrb.mxu2 %v404_v62  ;;  %979 = vmatpush.msrb.mxu3 %v472_v63  ;;  %v392_v12 = vld [vmem:[#allocation2 + $0x430] sm:$0xff]  ;;  %v353_v61 = vld [vmem:[#allocation2 + $0x2f8] sm:$0xff] }
  0xe4   :  { %921 = vmatpush.msrb.mxu0 %v272_v0  ;;  %940 = vmatpush.msrb.mxu1 %v340_v1  ;;  %v460_v13 = vld [vmem:[#allocation2 + $0x650] sm:$0xff]  ;;  %v281_v0 = vld [vmem:[#allocation2 + $0xb8] sm:$0xff] }
  0xe5   :  { %961 = vmatpush.msrb.mxu2 %v400_v2  ;;  %980 = vmatpush.msrb.mxu3 %v468_v3  ;;  %v260_v14 = vld [vmem:[#allocation2 + $0x10] sm:$0xff]  ;;  %v349_v1 = vld [vmem:[#allocation2 + $0x2d8] sm:$0xff] }
  0xe6   :  { %922 = vmatpush.msrb.mxu0 %v268_v5  ;;  %941 = vmatpush.msrb.mxu1 %v336_v6  ;;  %v328_v15 = vld [vmem:[#allocation2 + $0x230] sm:$0xff]  ;;  %v277_v5 = vld [vmem:[#allocation2 + $0x98] sm:$0xff] }
  0xe7   :  { %962 = vmatpush.msrb.mxu2 %v396_v7  ;;  %981 = vmatpush.msrb.mxu3 %v464_v8  ;;  %v388_v16 = vld [vmem:[#allocation2 + $0x410] sm:$0xff]  ;;  %v345_v6 = vld [vmem:[#allocation2 + $0x2b8] sm:$0xff] }
  0xe8   :  { %923 = vmatpush.msrb.mxu0 %v264_v10  ;;  %942 = vmatpush.msrb.mxu1 %v332_v11  ;;  %v456_v17 = vld [vmem:[#allocation2 + $0x630] sm:$0xff]  ;;  %v273_v10 = vld [vmem:[#allocation2 + $0x78] sm:$0xff] }
  0xe9   :  { %963 = vmatpush.msrb.mxu2 %v392_v12  ;;  %982 = vmatpush.msrb.mxu3 %v460_v13  ;;  %v576_v18 = vld [vmem:[#allocation2 + $0x9f0] sm:$0xff]  ;;  %v341_v11 = vld [vmem:[#allocation2 + $0x298] sm:$0xff] }
  0xea   :  { %924 = vmatpush.msrb.mxu0 %v260_v14  ;;  %943 = vmatpush.msrb.mxu1 %v328_v15  ;;  %v324_v20 = vld [vmem:[#allocation2 + $0x210] sm:$0xff]  ;;  %v269_v14 = vld [vmem:[#allocation2 + $0x58] sm:$0xff] }
  0xeb   :  { %v452_v21 = vld [vmem:[#allocation2 + $0x610] sm:$0xff]  ;;  %964 = vmatpush.msrb.mxu2 %v388_v16  ;;  %983 = vmatpush.msrb.mxu3 %v456_v17  ;;  %v337_v15 = vld [vmem:[#allocation2 + $0x278] sm:$0xff] }
  0xec   :  { %v572_v22 = vld [vmem:[#allocation2 + $0x9d0] sm:$0xff]  ;;  %989 = vmatpush.msra.mxu0 %v576_v18  ;;  %944 = vmatpush.msrb.mxu1 %v324_v20  ;;  %v265_v17 = vld [vmem:[#allocation2 + $0x38] sm:$0xff] }
  0xed   :  { %v640_v23 = vld [vmem:[#allocation2 + $0xbf0] sm:$0xff]  ;;  %1029 = vmatpush.msra.mxu2 %v321_v19  ;;  %984 = vmatpush.msrb.mxu3 %v452_v21  ;;  %v333_v18 = vld [vmem:[#allocation2 + $0x258] sm:$0xff] }
  0xee   :  { %v568_v26 = vld [vmem:[#allocation2 + $0x9b0] sm:$0xff]  ;;  %990 = vmatpush.msra.mxu0 %v572_v22  ;;  %1009 = vmatpush.msra.mxu1 %v640_v23  ;;  %v261_v19 = vld [vmem:[#allocation2 + $0x18] sm:$0xff] }
  0xef   :  { %v636_v27 = vld [vmem:[#allocation2 + $0xbd0] sm:$0xff]  ;;  %1030 = vmatpush.msra.mxu2 %v317_v24  ;;  %1049 = vmatpush.msra.mxu3 %v385_v25  ;;  %v329_v20 = vld [vmem:[#allocation2 + $0x238] sm:$0xff] }
  0xf0   :  { %v564_v30 = vld [vmem:[#allocation2 + $0x990] sm:$0xff]  ;;  %991 = vmatpush.msra.mxu0 %v568_v26  ;;  %1010 = vmatpush.msra.mxu1 %v636_v27  ;;  %v577_v21 = vld [vmem:[#allocation2 + $0x9f8] sm:$0xff] }
  0xf1   :  { %v632_v31 = vld [vmem:[#allocation2 + $0xbb0] sm:$0xff]  ;;  %1031 = vmatpush.msra.mxu2 %v313_v28  ;;  %1050 = vmatpush.msra.mxu3 %v381_v29  ;;  %v325_v23 = vld [vmem:[#allocation2 + $0x218] sm:$0xff] }
  0xf2   :  { %v560_v34 = vld [vmem:[#allocation2 + $0x970] sm:$0xff]  ;;  %992 = vmatpush.msra.mxu0 %v564_v30  ;;  %1011 = vmatpush.msra.mxu1 %v632_v31  ;;  %v445_v24 = vld [vmem:[#allocation2 + $0x5d8] sm:$0xff] }
  0xf3   :  { %v628_v35 = vld [vmem:[#allocation2 + $0xb90] sm:$0xff]  ;;  %1032 = vmatpush.msra.mxu2 %v309_v32  ;;  %1051 = vmatpush.msra.mxu3 %v377_v33  ;;  %v573_v25 = vld [vmem:[#allocation2 + $0x9d8] sm:$0xff] }
  0xf4   :  { %v556_v38 = vld [vmem:[#allocation2 + $0x950] sm:$0xff]  ;;  %993 = vmatpush.msra.mxu0 %v560_v34  ;;  %1012 = vmatpush.msra.mxu1 %v628_v35  ;;  %v641_v26 = vld [vmem:[#allocation2 + $0xbf8] sm:$0xff] }
  0xf5   :  { %v624_v39 = vld [vmem:[#allocation2 + $0xb70] sm:$0xff]  ;;  %1033 = vmatpush.msra.mxu2 %v305_v36  ;;  %1052 = vmatpush.msra.mxu3 %v373_v37  ;;  %v513_v27 = vld [vmem:[#allocation2 + $0x7f8] sm:$0xff] }
  0xf6   :  { %v552_v42 = vld [vmem:[#allocation2 + $0x930] sm:$0xff]  ;;  %994 = vmatpush.msra.mxu0 %v556_v38  ;;  %1013 = vmatpush.msra.mxu1 %v624_v39  ;;  %v441_v28 = vld [vmem:[#allocation2 + $0x5b8] sm:$0xff]  ;;  %v3010_v38 = vld [vmem:[#allocation4] sm:$0xf] }
  0xf7   :  { %v620_v43 = vld [vmem:[#allocation2 + $0xb50] sm:$0xff]  ;;  %1034 = vmatpush.msra.mxu2 %v301_v40  ;;  %1053 = vmatpush.msra.mxu3 %v369_v41  ;;  %v569_v29 = vld [vmem:[#allocation2 + $0x9b8] sm:$0xff] }
  0xf8   :  { %v548_v47 = vld [vmem:[#allocation2 + $0x910] sm:$0xff]  ;;  %995 = vmatpush.msra.mxu0 %v552_v42  ;;  %1014 = vmatpush.msra.mxu1 %v620_v43  ;;  %v637_v30 = vld [vmem:[#allocation2 + $0xbd8] sm:$0xff] }
  0xf9   :  { %v616_v48 = vld [vmem:[#allocation2 + $0xb30] sm:$0xff]  ;;  %1035 = vmatpush.msra.mxu2 %v297_v45  ;;  %1054 = vmatpush.msra.mxu3 %v365_v46  ;;  %v509_v31 = vld [vmem:[#allocation2 + $0x7d8] sm:$0xff]  ;;  %v644_v46 = vperm.slane %v3010_v38, 0 }
  0xfa   :  { %v544_v53 = vld [vmem:[#allocation2 + $0x8f0] sm:$0xff]  ;;  %996 = vmatpush.msra.mxu0 %v548_v47  ;;  %1015 = vmatpush.msra.mxu1 %v616_v48  ;;  %v437_v32 = vld [vmem:[#allocation2 + $0x598] sm:$0xff] }
  0xfb   :  { %v612_v54 = vld [vmem:[#allocation2 + $0xb10] sm:$0xff]  ;;  %1036 = vmatpush.msra.mxu2 %v293_v51  ;;  %1055 = vmatpush.msra.mxu3 %v361_v52  ;;  %v633_v33 = vld [vmem:[#allocation2 + $0xbb8] sm:$0xff] }
  0xfc   :  { %v540_v58 = vld [vmem:[#allocation2 + $0x8d0] sm:$0xff]  ;;  %997 = vmatpush.msra.mxu0 %v544_v53  ;;  %1016 = vmatpush.msra.mxu1 %v612_v54  ;;  %v505_v34 = vld [vmem:[#allocation2 + $0x7b8] sm:$0xff] }
  0xfd   :  { %v608_v59 = vld [vmem:[#allocation2 + $0xaf0] sm:$0xff]  ;;  %1037 = vmatpush.msra.mxu2 %v289_v56  ;;  %1056 = vmatpush.msra.mxu3 %v357_v57  ;;  %v433_v35 = vld [vmem:[#allocation2 + $0x578] sm:$0xff] }
  0xfe   :  { %v536_v62 = vld [vmem:[#allocation2 + $0x8b0] sm:$0xff]  ;;  %998 = vmatpush.msra.mxu0 %v540_v58  ;;  %1017 = vmatpush.msra.mxu1 %v608_v59  ;;  %v561_v36 = vld [vmem:[#allocation2 + $0x978] sm:$0xff] }
  0xff   :  { %v604_v63 = vld [vmem:[#allocation2 + $0xad0] sm:$0xff]  ;;  %1038 = vmatpush.msra.mxu2 %v285_v60  ;;  %1057 = vmatpush.msra.mxu3 %v353_v61  ;;  %v501_v37 = vld [vmem:[#allocation2 + $0x798] sm:$0xff] }
 0x100   :  { %v532_v2 = vld [vmem:[#allocation2 + $0x890] sm:$0xff]  ;;  %999 = vmatpush.msra.mxu0 %v536_v62  ;;  %1018 = vmatpush.msra.mxu1 %v604_v63  ;;  %v429_v39 = vld [vmem:[#allocation2 + $0x558] sm:$0xff] }
 0x101   :  { %v600_v3 = vld [vmem:[#allocation2 + $0xab0] sm:$0xff]  ;;  %1039 = vmatpush.msra.mxu2 %v281_v0  ;;  %1058 = vmatpush.msra.mxu3 %v349_v1  ;;  %v557_v40 = vld [vmem:[#allocation2 + $0x958] sm:$0xff] }
 0x102   :  { %965 = vmatmul.f32.vlgmr.msrb.gmra.mxu2 %v2980_v44  ;;  %1000 = vmatpush.msra.mxu0 %v532_v2  ;;  %v528_v7 = vld [vmem:[#allocation2 + $0x870] sm:$0xff]  ;;  %v625_v41 = vld [vmem:[#allocation2 + $0xb78] sm:$0xff]  ;;  %v686_v56 = vpop.f32.mrf.mxu0 }
 0x103   :  { %1019 = vmatpush.msra.mxu1 %v600_v3  ;;  %1040 = vmatpush.msra.mxu2 %v277_v5  ;;  %v596_v8 = vld [vmem:[#allocation2 + $0xa90] sm:$0xff]  ;;  %v497_v42 = vld [vmem:[#allocation2 + $0x778] sm:$0xff]  ;;  %v687_v59 = vadd.f32 %v686_v56, %v644_v46  ;;  %v1249_v56 = vld [vmem:[#allocation6 + $0xa0] sm:$0xff] }
 0x104   :  { %1059 = vmatpush.msra.mxu3 %v345_v6  ;;  %925 = vmatmul.f32.vlgmr.msrb.gmra.mxu0 %v2982_v49  ;;  %v524_v12 = vld [vmem:[#allocation2 + $0x850] sm:$0xff]  ;;  %v425_v43 = vld [vmem:[#allocation2 + $0x538] sm:$0xff] }
 0x105   :  { %985 = vmatmul.f32.vlgmr.msrb.gmra.mxu3 %v2985_v50  ;;  %1001 = vmatpush.msra.mxu0 %v528_v7  ;;  %v592_v13 = vld [vmem:[#allocation2 + $0xa70] sm:$0xff]  ;;  %v553_v45 = vld [vmem:[#allocation2 + $0x938] sm:$0xff] }
 0x106   :  { %1020 = vmatpush.msra.mxu1 %v596_v8  ;;  %1041 = vmatpush.msra.mxu2 %v273_v10  ;;  %v520_v44 = vld [vmem:[#allocation2 + $0x830] sm:$0xff]  ;;  %v621_v47 = vld [vmem:[#allocation2 + $0xb58] sm:$0xff] }
 0x107   :  { %1060 = vmatpush.msra.mxu3 %v341_v11  ;;  %945 = vmatmul.f32.vlgmr.msrb.gmra.mxu1 %v2988_v55  ;;  %v588_v16 = vld [vmem:[#allocation2 + $0xa50] sm:$0xff]  ;;  %v449_v55 = vld [vmem:[#allocation2 + $0x5f8] sm:$0xff] }
 0x108   :  { %1002 = vmatpush.msra.mxu0 %v524_v12  ;;  %1021 = vmatpush.msra.mxu1 %v592_v13  ;;  %v516_v49 = vld [vmem:[#allocation2 + $0x810] sm:$0xff]  ;;  %v493_v48 = vld [vmem:[#allocation2 + $0x758] sm:$0xff] }
 0x109   :  { %1042 = vmatpush.msra.mxu2 %v269_v14  ;;  %1061 = vmatpush.msra.mxu3 %v337_v15  ;;  %v584_v50 = vld [vmem:[#allocation2 + $0xa30] sm:$0xff]  ;;  %v421_v51 = vld [vmem:[#allocation2 + $0x518] sm:$0xff]  ;;  %v726_v5 = vpop.f32.mrf.mxu2 }
 0x10a   :  { %1003 = vmatpush.msra.mxu0 %v520_v44  ;;  %1022 = vmatpush.msra.mxu1 %v588_v16  ;;  %v580_v22 = vld [vmem:[#allocation2 + $0xa10] sm:$0xff]  ;;  %v549_v52 = vld [vmem:[#allocation2 + $0x918] sm:$0xff] }
 0x10b   :  { %1043 = vmatpush.msra.mxu2 %v265_v17  ;;  %1062 = vmatpush.msra.mxu3 %v333_v18  ;;  %v617_v53 = vld [vmem:[#allocation2 + $0xb38] sm:$0xff] }
 0x10c   :  { %1004 = vmatpush.msra.mxu0 %v516_v49  ;;  %1023 = vmatpush.msra.mxu1 %v584_v50  ;;  %v489_v54 = vld [vmem:[#allocation2 + $0x738] sm:$0xff] }
 0x10d   :  { %1044 = vmatpush.msra.mxu2 %v261_v19  ;;  %1063 = vmatpush.msra.mxu3 %v329_v20  ;;  %v417_v57 = vld [vmem:[#allocation2 + $0x4f8] sm:$0xff] }
 0x10e   :  { %1005 = vmatmul.f32.vlgmr.msra.gmra.mxu0 %v2992_v4  ;;  %1024 = vmatpush.msra.mxu1 %v580_v22  ;;  %v565_v4 = vld [vmem:[#allocation2 + $0x998] sm:$0xff] }
 0x10f   :  { %1109 = vmatpush.msrb.mxu2 %v577_v21  ;;  %1069 = vmatpush.msrb.mxu0 %v449_v55  ;;  %v545_v58 = vld [vmem:[#allocation2 + $0x8f8] sm:$0xff] }
 0x110   :  { %1064 = vmatpush.msra.mxu3 %v325_v23  ;;  %1025 = vmatmul.f32.vlgmr.msra.gmra.mxu1 %v2994_v9  ;;  %v629_v9 = vld [vmem:[#allocation2 + $0xb98] sm:$0xff] }
 0x111   :  { %1070 = vmatpush.msrb.mxu0 %v445_v24  ;;  %1110 = vmatpush.msrb.mxu2 %v573_v25  ;;  %v613_v60 = vld [vmem:[#allocation2 + $0xb18] sm:$0xff] }
 0x112   :  { %1129 = vmatpush.msrb.mxu3 %v641_v26  ;;  %1089 = vmatpush.msrb.mxu1 %v513_v27  ;;  %v485_v61 = vld [vmem:[#allocation2 + $0x718] sm:$0xff]  ;;  %v2452_v27 = vld.sshfl [vmem:[#allocation1 + $0x8] sm:$0xff pattern:$0x73625140] }
 0x113   :  { %1071 = vmatpush.msrb.mxu0 %v441_v28  ;;  %1111 = vmatpush.msrb.mxu2 %v569_v29  ;;  %v413_v62 = vld [vmem:[#allocation2 + $0x4d8] sm:$0xff] }
 0x114   :  { %1130 = vmatpush.msrb.mxu3 %v637_v30  ;;  %1090 = vmatpush.msrb.mxu1 %v509_v31  ;;  %v541_v63 = vld [vmem:[#allocation2 + $0x8d8] sm:$0xff] }
 0x115   :  { %1072 = vmatpush.msrb.mxu0 %v437_v32  ;;  %1112 = vmatpush.msrb.mxu2 %v565_v4  ;;  %v609_v1 = vld [vmem:[#allocation2 + $0xaf8] sm:$0xff] }
 0x116   :  { %1131 = vmatpush.msrb.mxu3 %v633_v33  ;;  %1091 = vmatpush.msrb.mxu1 %v505_v34  ;;  %v481_v2 = vld [vmem:[#allocation2 + $0x6f8] sm:$0xff] }
 0x117   :  { %1073 = vmatpush.msrb.mxu0 %v433_v35  ;;  %1113 = vmatpush.msrb.mxu2 %v561_v36  ;;  %v409_v6 = vld [vmem:[#allocation2 + $0x4b8] sm:$0xff] }
 0x118   :  { %1132 = vmatpush.msrb.mxu3 %v629_v9  ;;  %1092 = vmatpush.msrb.mxu1 %v501_v37  ;;  %v537_v7 = vld [vmem:[#allocation2 + $0x8b8] sm:$0xff]  ;;  %v746_v14 = vpop.f32.mrf.mxu3 }
 0x119   :  { %1074 = vmatpush.msrb.mxu0 %v429_v39  ;;  %1114 = vmatpush.msrb.mxu2 %v557_v40  ;;  %v605_v8 = vld [vmem:[#allocation2 + $0xad8] sm:$0xff]  ;;  %v1257_v39 = vld [vmem:[#allocation6 + $0xe0] sm:$0xff] }
 0x11a   :  { %1133 = vmatpush.msrb.mxu3 %v625_v41  ;;  %1093 = vmatpush.msrb.mxu1 %v497_v42  ;;  %v477_v10 = vld [vmem:[#allocation2 + $0x6d8] sm:$0xff]  ;;  %v2454_v41 = vld.sshfl [vmem:[#allocation1 + $0x10] sm:$0xff pattern:$0x73625140] }
 0x11b   :  { %1075 = vmatpush.msrb.mxu0 %v425_v43  ;;  %1115 = vmatpush.msrb.mxu2 %v553_v45  ;;  %v405_v12 = vld [vmem:[#allocation2 + $0x498] sm:$0xff]  ;;  %v2455_v45 = vld.sshfl [vmem:[#allocation1 + $0x28] sm:$0xff pattern:$0x73625140] }
 0x11c   :  { %1134 = vmatpush.msrb.mxu3 %v621_v47  ;;  %1094 = vmatpush.msrb.mxu1 %v493_v48  ;;  %v533_v13 = vld [vmem:[#allocation2 + $0x898] sm:$0xff]  ;;  %v1253_v48 = vld [vmem:[#allocation6 + $0xc0] sm:$0xff] }
 0x11d   :  { %1076 = vmatpush.msrb.mxu0 %v421_v51  ;;  %1116 = vmatpush.msrb.mxu2 %v549_v52  ;;  %v601_v15 = vld [vmem:[#allocation2 + $0xab8] sm:$0xff]  ;;  %v2456_v51 = vld.sshfl [vmem:[#allocation1 + $0x18] sm:$0xff pattern:$0x73625140]  ;;  %v1289_v52 = vld [vmem:[#allocation6 + $0x1e0] sm:$0xff] }
 0x11e   :  { %1135 = vmatpush.msrb.mxu3 %v617_v53  ;;  %1095 = vmatpush.msrb.mxu1 %v489_v54  ;;  %v401_v16 = vld [vmem:[#allocation2 + $0x478] sm:$0xff] }
 0x11f   :  { %v706_v0 = vpop.f32.mrf.mxu1  ;;  %1077 = vmatpush.msrb.mxu0 %v417_v57  ;;  %1117 = vmatpush.msrb.mxu2 %v545_v58  ;;  %v473_v17 = vld [vmem:[#allocation2 + $0x6b8] sm:$0xff]  ;;  %v1285_v57 = vld [vmem:[#allocation6 + $0x1c0] sm:$0xff] }
 0x120   :  { %v707_v3 = vadd.f32 %v706_v0, %v687_v59  ;;  %1136 = vmatpush.msrb.mxu3 %v613_v60  ;;  %1096 = vmatpush.msrb.mxu1 %v485_v61  ;;  %v529_v18 = vld [vmem:[#allocation2 + $0x878] sm:$0xff]  ;;  %v1245_v61 = vld [vmem:[#allocation6 + $0x80] sm:$0xff] }
 0x121   :  { %1078 = vmatpush.msrb.mxu0 %v413_v62  ;;  %1118 = vmatpush.msrb.mxu2 %v541_v63  ;;  %v597_v49 = vld [vmem:[#allocation2 + $0xa98] sm:$0xff]  ;;  %v1281_v63 = vld [vmem:[#allocation6 + $0x1a0] sm:$0xff] }
 0x122   :  { %v727_v11 = vadd.f32 %v726_v5, %v707_v3  ;;  %1137 = vmatpush.msrb.mxu3 %v609_v1  ;;  %1097 = vmatpush.msrb.mxu1 %v481_v2  ;;  %v2451_v19 = vld.sshfl [vmem:[#allocation1] sm:$0xff pattern:$0x73625140]  ;;  %v1241_v3 = vld [vmem:[#allocation6 + $0x60] sm:$0xff] }
 0x123   :  { %1079 = vmatpush.msrb.mxu0 %v409_v6  ;;  %1119 = vmatpush.msrb.mxu2 %v537_v7  ;;  %v397_v20 = vld [vmem:[#allocation2 + $0x458] sm:$0xff]  ;;  %v1277_v6 = vld [vmem:[#allocation6 + $0x180] sm:$0xff] }
 0x124   :  { %v747_v44 = vadd.f32 %v746_v14, %v727_v11  ;;  %1138 = vmatpush.msrb.mxu3 %v605_v8  ;;  %1098 = vmatpush.msrb.mxu1 %v477_v10  ;;  %v469_v55 = vld [vmem:[#allocation2 + $0x698] sm:$0xff]  ;;  %v645_v8 = vperm.slane %v3010_v38, 1 }
 0x125   :  { %1080 = vmatpush.msrb.mxu0 %v405_v12  ;;  %1120 = vmatpush.msrb.mxu2 %v533_v13  ;;  %v766_v50 = vpop.f32.mrf.mxu0  ;;  %v525_v22 = vld [vmem:[#allocation2 + $0x858] sm:$0xff]  ;;  %v1237_v13 = vld [vmem:[#allocation6 + $0x40] sm:$0xff] }
 0x126   :  { %1139 = vmatpush.msrb.mxu3 %v601_v15  ;;  %1045 = vmatmul.f32.vlgmr.msra.gmra.mxu2 %v2451_v19  ;;  %v767_v21 = vadd.f32 %v766_v50, %v747_v44  ;;  %v593_v24 = vld [vmem:[#allocation2 + $0xa78] sm:$0xff]  ;;  %v1273_v44 = vld [vmem:[#allocation6 + $0x160] sm:$0xff] }
 0x127   :  { %1081 = vmatpush.msrb.mxu0 %v401_v16  ;;  %1099 = vmatpush.msrb.mxu1 %v473_v17  ;;  %v393_v25 = vld [vmem:[#allocation2 + $0x438] sm:$0xff]  ;;  %v1234_v16 = vld [vmem:[#allocation6 + $0x28] sm:$0xff] }
 0x128   :  { %v786_v23 = vpop.f32.mrf.mxu1  ;;  %1121 = vmatpush.msrb.mxu2 %v529_v18  ;;  %1140 = vmatpush.msrb.mxu3 %v597_v49  ;;  %v465_v28 = vld [vmem:[#allocation2 + $0x678] sm:$0xff] }
 0x129   :  { %v3013_v26 = vadd.f32 %v786_v23, %v767_v21  ;;  %1065 = vmatmul.f32.vlgmr.msra.gmra.mxu3 %v2452_v27  ;;  %1082 = vmatpush.msrb.mxu0 %v397_v20  ;;  %v521_v29 = vld [vmem:[#allocation2 + $0x838] sm:$0xff]  ;;  %v1233_v20 = vld [vmem:[#allocation6 + $0x20] sm:$0xff] }
 0x12a   :  { %1100 = vmatpush.msrb.mxu1 %v469_v55  ;;  %1122 = vmatpush.msrb.mxu2 %v525_v22  ;;  %v589_v30 = vld [vmem:[#allocation2 + $0xa58] sm:$0xff]  ;;  %v1269_v22 = vld [vmem:[#allocation6 + $0x140] sm:$0xff] }
 0x12b   :  { %v389_v31 = vld [vmem:[#allocation2 + $0x418] sm:$0xff]  ;;  %v2356_v32 = vmul.f32 -1.442695, %v3013_v26  ;;  %1141 = vmatpush.msrb.mxu3 %v593_v24  ;;  %1083 = vmatpush.msrb.mxu0 %v393_v25 }
 0x12c   :  { %v461_v4 = vld [vmem:[#allocation2 + $0x658] sm:$0xff]  ;;  %1101 = vmatpush.msrb.mxu1 %v465_v28  ;;  %1123 = vmatpush.msrb.mxu2 %v521_v29  ;;  %v1229_v29 = vld [vmem:[#allocation6] sm:$0xff] }
 0x12d   :  { %v517_v33 = vld [vmem:[#allocation2 + $0x818] sm:$0xff]  ;;  %2399 = vpow2.f32 %v2356_v32  ;;  %1142 = vmatpush.msrb.mxu3 %v589_v30  ;;  %1084 = vmatpush.msrb.mxu0 %v389_v31 }
 0x12e   :  { %v585_v34 = vld [vmem:[#allocation2 + $0xa38] sm:$0xff]  ;;  %1102 = vmatpush.msrb.mxu1 %v461_v4  ;;  %1124 = vmatpush.msrb.mxu2 %v517_v33  ;;  %v1265_v4 = vld [vmem:[#allocation6 + $0x120] sm:$0xff] }
 0x12f   :  { %v1259_v35 = vld [vmem:[#allocation6 + $0xf0] sm:$0xff]  ;;  %1143 = vmatpush.msrb.mxu3 %v585_v34  ;;  %1085 = vmatmul.f32.vlgmr.msrb.gmra.mxu0 %v2454_v41  ;;  %v1260_v31 = vld [vmem:[#allocation6 + $0xf8] sm:$0xff] }
 0x130   :  { %v457_v36 = vld [vmem:[#allocation2 + $0x638] sm:$0xff]  ;;  %1363 = vmatpush.msra.mxu0 %v1259_v35  ;;  %v1258_v35 = vld [vmem:[#allocation6 + $0xe8] sm:$0xff] }
 0x131   :  { %v581_v9 = vld [vmem:[#allocation2 + $0xa18] sm:$0xff]  ;;  %1103 = vmatpush.msrb.mxu1 %v457_v36 }
 0x132   :  { %v2453_v37 = vld.sshfl [vmem:[#allocation1 + $0x20] sm:$0xff pattern:$0x73625140]  ;;  %1144 = vmatpush.msrb.mxu3 %v581_v9  ;;  %1364 = vmatpush.msra.mxu0 %v1257_v39 }
 0x133   :  { %1125 = vmatmul.f32.vlgmr.msrb.gmra.mxu2 %v2453_v37  ;;  %v453_v40 = vld [vmem:[#allocation2 + $0x618] sm:$0xff]  ;;  %v2400_v43 = vpop.eup %2399  ;;  %1145 = vmatmul.f32.vlgmr.msrb.gmra.mxu3 %v2455_v45  ;;  %v1321_v45 = vld [vmem:[#allocation6 + $0x2e0] sm:$0xff] }
 0x134   :  { %v1255_v42 = vld [vmem:[#allocation6 + $0xd0] sm:$0xff]  ;;  %v1161_v47 = vadd.f32 1.0, %v2400_v43  ;;  %1104 = vmatpush.msrb.mxu1 %v453_v40  ;;  %v1256_v37 = vld [vmem:[#allocation6 + $0xd8] sm:$0xff]  ;;  %v1261_v40 = vld [vmem:[#allocation6 + $0x100] sm:$0xff] }
 0x135   :  { %v1291_v46 = vld [vmem:[#allocation6 + $0x1f0] sm:$0xff]  ;;  %1105 = vmatmul.f32.vlgmr.msrb.gmra.mxu1 %v2456_v51  ;;  %1365 = vmatpush.msra.mxu0 %v1255_v42  ;;  %v1292_v41 = vld [vmem:[#allocation6 + $0x1f8] sm:$0xff]  ;;  %v1254_v43 = vld [vmem:[#allocation6 + $0xc8] sm:$0xff] }
 0x136   :  { %2401 = vrcp.f32 %v1161_v47  ;;  %v1251_v53 = vld [vmem:[#allocation6 + $0xb0] sm:$0xff]  ;;  %1383 = vmatpush.msra.mxu1 %v1291_v46  ;;  %vm1170_vm0 = vweird.f32 %v1161_v47  ;;  %v1176_v12 = vand.u32 2147483648, %v1161_v47  ;;  %v1174_v14 = vand.u32 2147483647, %v1161_v47  ;;  %v1252_v51 = vld [vmem:[#allocation6 + $0xb8] sm:$0xff] }
 0x137   :  { %1366 = vmatpush.msra.mxu0 %v1253_v48  ;;  %v1287_v54 = vld [vmem:[#allocation6 + $0x1d0] sm:$0xff] }
 0x138   :  { %1384 = vmatpush.msra.mxu1 %v1289_v52  ;;  %v1247_v58 = vld [vmem:[#allocation6 + $0x90] sm:$0xff]  ;;  %v1177_v19 = vor.u32 1.1754944e-38, %v1176_v12  ;;  %vm1175_vm3 = vcmp.eq.f32.partialorder %v1174_v14, 8.507059e+37  ;;  %v1288_v52 = vld [vmem:[#allocation6 + $0x1d8] sm:$0xff] }
 0x139   :  { %1367 = vmatpush.msra.mxu0 %v1251_v53  ;;  %v1283_v59 = vld [vmem:[#allocation6 + $0x1b0] sm:$0xff]  ;;  %v1317_v53 = vld [vmem:[#allocation6 + $0x2c0] sm:$0xff] }
 0x13a   :  { %1385 = vmatpush.msra.mxu1 %v1287_v54  ;;  %v1243_v0 = vld [vmem:[#allocation6 + $0x70] sm:$0xff]  ;;  %v1250_v54 = vld [vmem:[#allocation6 + $0xa8] sm:$0xff] }
 0x13b   :  { %1368 = vmatpush.msra.mxu0 %v1249_v56  ;;  %v1279_v2 = vld [vmem:[#allocation6 + $0x190] sm:$0xff]  ;;  %v1286_v56 = vld [vmem:[#allocation6 + $0x1c8] sm:$0xff] }
 0x13c   :  { %v2402_v60 = vpop.eup %2401  ;;  %1386 = vmatpush.msra.mxu1 %v1285_v57  ;;  %v1239_v7 = vld [vmem:[#allocation6 + $0x50] sm:$0xff]  ;;  %v1248_v57 = vld [vmem:[#allocation6 + $0x98] sm:$0xff] }
 0x13d   :  { %v1166_v62 = vmul.f32 %v2402_v60, %v1161_v47  ;;  %1369 = vmatpush.msra.mxu0 %v1247_v58  ;;  %vm1171_vm1 = vweird.f32 %v2402_v60  ;;  %v1275_v11 = vld [vmem:[#allocation6 + $0x170] sm:$0xff]  ;;  %v1290_v47 = vld [vmem:[#allocation6 + $0x1e8] sm:$0xff]  ;;  %v1284_v58 = vld [vmem:[#allocation6 + $0x1b8] sm:$0xff] }
 0x13e   :  { %1387 = vmatpush.msra.mxu1 %v1283_v59  ;;  %vm3017_vm2 = vmor %vm1170_vm0, %vm1171_vm1  ;;  %v1235_v17 = vld [vmem:[#allocation6 + $0x30] sm:$0xff] }
 0x13f   :  { %v1167_v1 = vsub.f32 1.0, %v1166_v62  ;;  %1370 = vmatpush.msra.mxu0 %v1245_v61  ;;  %v1271_v50 = vld [vmem:[#allocation6 + $0x150] sm:$0xff]  ;;  %v1246_v61 = vld [vmem:[#allocation6 + $0x88] sm:$0xff] }
 0x140   :  { %1388 = vmatpush.msra.mxu1 %v1281_v63  ;;  %v1231_v24 = vld [vmem:[#allocation6 + $0x10] sm:$0xff]  ;;  %v1282_v63 = vld [vmem:[#allocation6 + $0x1a8] sm:$0xff] }
 0x141   :  { %v1168_v5 = vmul.f32 %v2402_v60, %v1167_v1  ;;  %1371 = vmatpush.msra.mxu0 %v1243_v0  ;;  %v1267_v28 = vld [vmem:[#allocation6 + $0x130] sm:$0xff]  ;;  %v1244_v1 = vld [vmem:[#allocation6 + $0x78] sm:$0xff] }
 0x142   :  { %1389 = vmatpush.msra.mxu1 %v1279_v2  ;;  %v1263_v36 = vld [vmem:[#allocation6 + $0x110] sm:$0xff]  ;;  %v1280_v2 = vld [vmem:[#allocation6 + $0x198] sm:$0xff] }
 0x143   :  { %v1169_v10 = vadd.f32 %v2402_v60, %v1168_v5  ;;  %1372 = vmatpush.msra.mxu0 %v1241_v3  ;;  %v1323_v42 = vld [vmem:[#allocation6 + $0x2f0] sm:$0xff]  ;;  %v1242_v3 = vld [vmem:[#allocation6 + $0x68] sm:$0xff] }
 0x144   :  { %1390 = vmatpush.msra.mxu1 %v1277_v6  ;;  %v806_v15 = vpop.f32.mrf.mxu2  ;;  %1403 = vmatpush.msra.mxu2 %v1323_v42  ;;  %v1319_v48 = vld [vmem:[#allocation6 + $0x2d0] sm:$0xff]  ;;  %v1278_v5 = vld [vmem:[#allocation6 + $0x188] sm:$0xff]  ;;  %v1240_v6 = vld [vmem:[#allocation6 + $0x58] sm:$0xff] }
 0x145   :  { %1373 = vmatpush.msra.mxu0 %v1239_v7  ;;  %v807_v18 = vadd.f32 %v806_v15, %v645_v8  ;;  %v1173_v49 = vsel %vm3017_vm2, %v2402_v60, %v1169_v10  ;;  %v1315_v59 = vld [vmem:[#allocation6 + $0x2b0] sm:$0xff]  ;;  %v1313_v60 = vld [vmem:[#allocation6 + $0x2a0] sm:$0xff]  ;;  %v1276_v7 = vld [vmem:[#allocation6 + $0x178] sm:$0xff] }
 0x146   :  { %1391 = vmatpush.msra.mxu1 %v1275_v11  ;;  %v1178_v23 = vsel %vm1175_vm3, %v1177_v19, %v1173_v49  ;;  %1404 = vmatpush.msra.mxu2 %v1321_v45  ;;  %v1238_v8 = vld [vmem:[#allocation6 + $0x48] sm:$0xff]  ;;  %v1311_v10 = vld [vmem:[#allocation6 + $0x290] sm:$0xff]  ;;  %v1272_v15 = vld [vmem:[#allocation6 + $0x158] sm:$0xff] }
 0x147   :  { %1374 = vmatpush.msra.mxu0 %v1237_v13  ;;  %v826_v21 = vpop.f32.mrf.mxu3  ;;  %v3024_v30 = vmul.f32 %v1178_v23, %v3013_v26  ;;  %v1274_v11 = vld [vmem:[#allocation6 + $0x168] sm:$0xff]  ;;  %v1236_v13 = vld [vmem:[#allocation6 + $0x38] sm:$0xff]  ;;  %v1307_v49 = vld [vmem:[#allocation6 + $0x270] sm:$0xff] }
 0x148   :  { %1392 = vmatpush.msra.mxu1 %v1273_v44  ;;  %v827_v55 = vadd.f32 %v826_v21, %v807_v18  ;;  %1405 = vmatpush.msra.mxu2 %v1319_v48  ;;  %v1309_v44 = vld [vmem:[#allocation6 + $0x280] sm:$0xff]  ;;  %v1270_v18 = vld [vmem:[#allocation6 + $0x148] sm:$0xff]  ;;  %v1232_v19 = vld [vmem:[#allocation6 + $0x18] sm:$0xff] }
 0x149   :  { %1375 = vmatpush.msra.mxu0 %v1235_v17  ;;  %v846_v25 = vpop.f32.mrf.mxu0  ;;  %v1230_v23 = vld [vmem:[#allocation6 + $0x8] sm:$0xff]  ;;  %v1353_v45 = vld [vmem:[#allocation6 + $0x3e0] sm:$0xff]  ;;  %v1351_v48 = vld [vmem:[#allocation6 + $0x3d0] sm:$0xff] }
 0x14a   :  { %1393 = vmatpush.msra.mxu1 %v1271_v50  ;;  %v847_v27 = vadd.f32 %v846_v25, %v827_v55  ;;  %1406 = vmatpush.msra.mxu2 %v1317_v53  ;;  %v1268_v55 = vld [vmem:[#allocation6 + $0x138] sm:$0xff]  ;;  %v1266_v25 = vld [vmem:[#allocation6 + $0x128] sm:$0xff] }
 0x14b   :  { %1376 = vmatpush.msra.mxu0 %v1233_v20  ;;  %v1318_v42 = vld [vmem:[#allocation6 + $0x2c8] sm:$0xff] }
 0x14c   :  { %1394 = vmatpush.msra.mxu1 %v1269_v22  ;;  %v866_v32 = vpop.f32.mrf.mxu1  ;;  %1407 = vmatpush.msra.mxu2 %v1315_v59  ;;  %v1305_v22 = vld [vmem:[#allocation6 + $0x260] sm:$0xff]  ;;  %v1347_v59 = vld [vmem:[#allocation6 + $0x3b0] sm:$0xff] }
 0x14d   :  { %1377 = vmatpush.msra.mxu0 %v1231_v24  ;;  %v867_v33 = vadd.f32 %v866_v32, %v847_v27  ;;  %v886_v34 = vpop.f32.mrf.mxu2 }
 0x14e   :  { %1395 = vmatpush.msra.mxu1 %v1267_v28  ;;  %1408 = vmatpush.msra.mxu2 %v1313_v60  ;;  %v1303_v28 = vld [vmem:[#allocation6 + $0x250] sm:$0xff]  ;;  %v1310_v60 = vld [vmem:[#allocation6 + $0x288] sm:$0xff] }
 0x14f   :  { %1378 = vmatpush.msra.mxu0 %v1229_v29  ;;  %v887_v9 = vadd.f32 %v886_v34, %v867_v33  ;;  %v1262_v33 = vld [vmem:[#allocation6 + $0x108] sm:$0xff]  ;;  %v1301_v34 = vld [vmem:[#allocation6 + $0x240] sm:$0xff] }
 0x150   :  { %1396 = vmatpush.msra.mxu1 %v1265_v4  ;;  %1379 = vmatmul.f32.vlgmr.msra.gmra.mxu0 %v3024_v30  ;;  %v906_v39 = vpop.f32.mrf.mxu3 }
 0x151   :  { %1443 = vmatpush.msrb.mxu0 %v1260_v31  ;;  %v3027_v26 = vadd.f32 %v906_v39, %v887_v9  ;;  %1409 = vmatpush.msra.mxu2 %v1311_v10  ;;  %v1264_v31 = vld [vmem:[#allocation6 + $0x118] sm:$0xff]  ;;  %v1295_v9 = vld [vmem:[#allocation6 + $0x210] sm:$0xff] }
 0x152   :  { %1397 = vmatpush.msra.mxu1 %v1263_v36  ;;  %v1297_v36 = vld [vmem:[#allocation6 + $0x220] sm:$0xff]  ;;  %v1324_v39 = vld [vmem:[#allocation6 + $0x2f8] sm:$0xff] }
 0x153   :  { %1444 = vmatpush.msrb.mxu0 %v1258_v35  ;;  %v2357_v46 = vmul.f32 -1.442695, %v3027_v26  ;;  %1410 = vmatpush.msra.mxu2 %v1309_v44  ;;  %v1299_v35 = vld [vmem:[#allocation6 + $0x230] sm:$0xff] }
 0x154   :  { %1398 = vmatpush.msra.mxu1 %v1261_v40  ;;  %v1320_v40 = vld [vmem:[#allocation6 + $0x2d8] sm:$0xff]  ;;  %v1335_v44 = vld [vmem:[#allocation6 + $0x350] sm:$0xff] }
 0x155   :  { %1445 = vmatpush.msrb.mxu0 %v1256_v37  ;;  %2403 = vpow2.f32 %v2357_v46  ;;  %1411 = vmatpush.msra.mxu2 %v1307_v49  ;;  %v1293_v37 = vld [vmem:[#allocation6 + $0x200] sm:$0xff]  ;;  %v1316_v46 = vld [vmem:[#allocation6 + $0x2b8] sm:$0xff]  ;;  %v1331_v49 = vld [vmem:[#allocation6 + $0x330] sm:$0xff] }
 0x156   :  { %1463 = vmatpush.msrb.mxu1 %v1292_v41  ;;  %v1355_v41 = vld [vmem:[#allocation6 + $0x3f0] sm:$0xff] }
 0x157   :  { %1446 = vmatpush.msrb.mxu0 %v1254_v43  ;;  %1412 = vmatpush.msra.mxu2 %v1305_v22  ;;  %v1325_v22 = vld [vmem:[#allocation6 + $0x300] sm:$0xff] }
 0x158   :  { %1464 = vmatpush.msrb.mxu1 %v1290_v47  ;;  %1423 = vmatpush.msra.mxu3 %v1355_v41 }
 0x159   :  { %1447 = vmatpush.msrb.mxu0 %v1252_v51  ;;  %1413 = vmatpush.msra.mxu2 %v1303_v28  ;;  %v1314_v51 = vld [vmem:[#allocation6 + $0x2a8] sm:$0xff]  ;;  %v1352_v28 = vld [vmem:[#allocation6 + $0x3d8] sm:$0xff] }
 0x15a   :  { %1465 = vmatpush.msrb.mxu1 %v1288_v52  ;;  %1424 = vmatpush.msra.mxu3 %v1353_v45 }
 0x15b   :  { %1448 = vmatpush.msrb.mxu0 %v1250_v54  ;;  %v2404_v62 = vpop.eup %2403  ;;  %1414 = vmatpush.msra.mxu2 %v1301_v34 }
 0x15c   :  { %1466 = vmatpush.msrb.mxu1 %v1286_v56  ;;  %v1162_v0 = vadd.f32 1.0, %v2404_v62  ;;  %1425 = vmatpush.msra.mxu3 %v1351_v48  ;;  %v1349_v56 = vld [vmem:[#allocation6 + $0x3c0] sm:$0xff] }
 0x15d   :  { %1449 = vmatpush.msrb.mxu0 %v1248_v57  ;;  %1415 = vmatpush.msra.mxu2 %v1299_v35  ;;  %v1312_v57 = vld [vmem:[#allocation6 + $0x298] sm:$0xff] }
 0x15e   :  { %1467 = vmatpush.msrb.mxu1 %v1284_v58  ;;  %2405 = vrcp.f32 %v1162_v0  ;;  %v1191_v50 = vand.u32 2147483648, %v1162_v0  ;;  %vm1185_vm4 = vweird.f32 %v1162_v0  ;;  %v1189_v21 = vand.u32 2147483647, %v1162_v0  ;;  %1426 = vmatpush.msra.mxu3 %v1349_v56  ;;  %v1348_v35 = vld [vmem:[#allocation6 + $0x3b8] sm:$0xff] }
 0x15f   :  { %1450 = vmatpush.msrb.mxu0 %v1246_v61  ;;  %1416 = vmatpush.msra.mxu2 %v1297_v36  ;;  %v1336_v56 = vld [vmem:[#allocation6 + $0x358] sm:$0xff] }
 0x160   :  { %1468 = vmatpush.msrb.mxu1 %v1282_v63  ;;  %v1192_v27 = vor.u32 1.1754944e-38, %v1191_v50  ;;  %vm1190_vm7 = vcmp.eq.f32.partialorder %v1189_v21, 8.507059e+37  ;;  %1427 = vmatpush.msra.mxu3 %v1347_v59  ;;  %v1345_v63 = vld [vmem:[#allocation6 + $0x3a0] sm:$0xff]  ;;  %v1294_v50 = vld [vmem:[#allocation6 + $0x208] sm:$0xff] }
 0x161   :  { %1451 = vmatpush.msrb.mxu0 %v1244_v1  ;;  %1417 = vmatpush.msra.mxu2 %v1295_v9  ;;  %v1329_v21 = vld [vmem:[#allocation6 + $0x320] sm:$0xff]  ;;  %v1346_v9 = vld [vmem:[#allocation6 + $0x3a8] sm:$0xff] }
 0x162   :  { %1469 = vmatpush.msrb.mxu1 %v1280_v2  ;;  %1428 = vmatpush.msra.mxu3 %v1345_v63  ;;  %v1343_v2 = vld [vmem:[#allocation6 + $0x390] sm:$0xff] }
 0x163   :  { %1452 = vmatpush.msrb.mxu0 %v1242_v3  ;;  %1418 = vmatpush.msra.mxu2 %v1293_v37  ;;  %v1306_v3 = vld [vmem:[#allocation6 + $0x268] sm:$0xff] }
 0x164   :  { %1470 = vmatpush.msrb.mxu1 %v1278_v5  ;;  %v2406_v12 = vpop.eup %2405  ;;  %1429 = vmatpush.msra.mxu3 %v1343_v2 }
 0x165   :  { %1453 = vmatpush.msrb.mxu0 %v1240_v6  ;;  %v1181_v14 = vmul.f32 %v2406_v12, %v1162_v0  ;;  %vm1186_vm5 = vweird.f32 %v2406_v12  ;;  %1483 = vmatpush.msrb.mxu2 %v1324_v39  ;;  %v1308_v0 = vld [vmem:[#allocation6 + $0x278] sm:$0xff] }
 0x166   :  { %1471 = vmatpush.msrb.mxu1 %v1276_v7  ;;  %vm1187_vm6 = vmor %vm1185_vm4, %vm1186_vm5  ;;  %v1341_v7 = vld [vmem:[#allocation6 + $0x380] sm:$0xff] }
 0x167   :  { %1454 = vmatpush.msrb.mxu0 %v1238_v8  ;;  %v1182_v17 = vsub.f32 1.0, %v1181_v14  ;;  %v1304_v8 = vld [vmem:[#allocation6 + $0x258] sm:$0xff]  ;;  %1430 = vmatpush.msra.mxu3 %v1341_v7  ;;  %v1337_v14 = vld [vmem:[#allocation6 + $0x360] sm:$0xff] }
 0x168   :  { %1472 = vmatpush.msrb.mxu1 %v1274_v11  ;;  %v1339_v11 = vld [vmem:[#allocation6 + $0x370] sm:$0xff] }
 0x169   :  { %1455 = vmatpush.msrb.mxu0 %v1236_v13  ;;  %v1183_v20 = vmul.f32 %v2406_v12, %v1182_v17  ;;  %1431 = vmatpush.msra.mxu3 %v1339_v11  ;;  %v1333_v17 = vld [vmem:[#allocation6 + $0x340] sm:$0xff] }
 0x16a   :  { %1473 = vmatpush.msrb.mxu1 %v1272_v15  ;;  %v1300_v15 = vld [vmem:[#allocation6 + $0x238] sm:$0xff] }
 0x16b   :  { %1456 = vmatpush.msrb.mxu0 %v1234_v16  ;;  %v1184_v24 = vadd.f32 %v2406_v12, %v1183_v20  ;;  %1432 = vmatpush.msra.mxu3 %v1337_v14  ;;  %v1298_v16 = vld [vmem:[#allocation6 + $0x228] sm:$0xff] }
 0x16c   :  { %1474 = vmatpush.msrb.mxu1 %v1270_v18  ;;  %v1296_v18 = vld [vmem:[#allocation6 + $0x218] sm:$0xff] }
 0x16d   :  { %1457 = vmatpush.msrb.mxu0 %v1232_v19  ;;  %v1188_v29 = vsel %vm1187_vm6, %v2406_v12, %v1184_v24  ;;  %v1302_v12 = vld [vmem:[#allocation6 + $0x248] sm:$0xff]  ;;  %1433 = vmatpush.msra.mxu3 %v1335_v44 }
 0x16e   :  { %1475 = vmatpush.msrb.mxu1 %v1268_v55  ;;  %v1193_v32 = vsel %vm1190_vm7, %v1192_v27, %v1188_v29  ;;  %v1327_v55 = vld [vmem:[#allocation6 + $0x310] sm:$0xff]  ;;  %v1354_v24 = vld [vmem:[#allocation6 + $0x3e8] sm:$0xff] }
 0x16f   :  { %1458 = vmatpush.msrb.mxu0 %v1230_v23  ;;  %v1226_v4 = vmul.f32 %v1193_v32, %v3027_v26  ;;  %v646_v26 = vperm.slane %v3010_v38, 2  ;;  %1434 = vmatpush.msra.mxu3 %v1333_v17  ;;  %v1356_v23 = vld [vmem:[#allocation6 + $0x3f8] sm:$0xff] }
 0x170   :  { %1459 = vmatmul.f32.vlgmr.msrb.gmra.mxu0 %v3024_v30  ;;  %1476 = vmatpush.msrb.mxu1 %v1266_v25  ;;  %v1322_v30 = vld [vmem:[#allocation6 + $0x2e8] sm:$0xff]  ;;  %v1594_v17 = vld [vmem:[#allocation9 + $0xf8] sm:$0xff] }
 0x171   :  { %1399 = vmatmul.f32.vlgmr.msra.gmra.mxu1 %v1226_v4  ;;  %1484 = vmatpush.msrb.mxu2 %v1322_v30 }
 0x172   :  { %1477 = vmatpush.msrb.mxu1 %v1264_v31  ;;  %1435 = vmatpush.msra.mxu3 %v1331_v49  ;;  %v1350_v31 = vld [vmem:[#allocation6 + $0x3c8] sm:$0xff] }
 0x173   :  { %1485 = vmatpush.msrb.mxu2 %v1320_v40  ;;  %v1592_v49 = vld [vmem:[#allocation9 + $0xe8] sm:$0xff] }
 0x174   :  { %1478 = vmatpush.msrb.mxu1 %v1262_v33  ;;  %1436 = vmatpush.msra.mxu3 %v1329_v21  ;;  %v1588_v21 = vld [vmem:[#allocation9 + $0xc8] sm:$0xff] }
 0x175   :  { %1486 = vmatpush.msrb.mxu2 %v1318_v42 }
 0x176   :  { %1437 = vmatpush.msra.mxu3 %v1327_v55  ;;  %v1585_v55 = vld [vmem:[#allocation9 + $0xb0] sm:$0xff] }
 0x177   :  { %1487 = vmatpush.msrb.mxu2 %v1316_v46 }
 0x178   :  { %1438 = vmatpush.msra.mxu3 %v1325_v22  ;;  %v1625_v22 = vld [vmem:[#allocation9 + $0x1f0] sm:$0xff] }
 0x179   :  { %1479 = vmatmul.f32.vlgmr.msrb.gmra.mxu1 %v1226_v4  ;;  %1488 = vmatpush.msrb.mxu2 %v1314_v51  ;;  %v647_v4 = vperm.slane %v3010_v38, 3  ;;  %v1338_v51 = vld [vmem:[#allocation6 + $0x368] sm:$0xff] }
 0x17a   :  { %1503 = vmatpush.msrb.mxu3 %v1356_v23  ;;  %v1586_v23 = vld [vmem:[#allocation9 + $0xb8] sm:$0xff]  ;;  %1653 = vmatpush.msra.mxu1 %v1625_v22  ;;  %v1599_v22 = vld [vmem:[#allocation9 + $0x120] sm:$0xff] }
 0x17b   :  { %1489 = vmatpush.msrb.mxu2 %v1312_v57 }
 0x17c   :  { %1504 = vmatpush.msrb.mxu3 %v1354_v24  ;;  %v1626_v24 = vld [vmem:[#allocation9 + $0x1f8] sm:$0xff] }
 0x17d   :  { %1490 = vmatpush.msrb.mxu2 %v1310_v60 }
 0x17e   :  { %1505 = vmatpush.msrb.mxu3 %v1352_v28  ;;  %v1584_v28 = vld [vmem:[#allocation9 + $0xa8] sm:$0xff] }
 0x17f   :  { %1491 = vmatpush.msrb.mxu2 %v1308_v0  ;;  %v1328_v0 = vld [vmem:[#allocation6 + $0x318] sm:$0xff] }
 0x180   :  { %1506 = vmatpush.msrb.mxu3 %v1350_v31  ;;  %v1581_v31 = vld [vmem:[#allocation9 + $0x90] sm:$0xff] }
 0x181   :  { %v926_v43 = vpop.f32.mrf.mxu0  ;;  %1492 = vmatpush.msrb.mxu2 %v1306_v3 }
 0x182   :  { %v927_v47 = vadd.f32 %v926_v43, %v646_v26  ;;  %1507 = vmatpush.msrb.mxu3 %v1348_v35  ;;  %v1344_v26 = vld [vmem:[#allocation6 + $0x398] sm:$0xff]  ;;  %v1342_v43 = vld [vmem:[#allocation6 + $0x388] sm:$0xff] }
 0x183   :  { %1493 = vmatpush.msrb.mxu2 %v1304_v8  ;;  %v1619_v35 = vld [vmem:[#allocation9 + $0x1c0] sm:$0xff] }
 0x184   :  { %v946_v52 = vpop.f32.mrf.mxu1  ;;  %1508 = vmatpush.msrb.mxu3 %v1346_v9  ;;  %v1620_v9 = vld [vmem:[#allocation9 + $0x1c8] sm:$0xff] }
 0x185   :  { %v947_v53 = vadd.f32 %v946_v52, %v927_v47  ;;  %v966_v54 = vpop.f32.mrf.mxu2  ;;  %1494 = vmatpush.msrb.mxu2 %v1302_v12  ;;  %v1340_v47 = vld [vmem:[#allocation6 + $0x378] sm:$0xff] }
 0x186   :  { %1509 = vmatpush.msrb.mxu3 %v1344_v26  ;;  %v1575_v26 = vld [vmem:[#allocation9 + $0x60] sm:$0xff] }
 0x187   :  { %v967_v58 = vadd.f32 %v966_v54, %v947_v53  ;;  %1495 = vmatpush.msrb.mxu2 %v1300_v15 }
 0x188   :  { %v986_v61 = vpop.f32.mrf.mxu3  ;;  %1510 = vmatpush.msrb.mxu3 %v1342_v43  ;;  %v1616_v43 = vld [vmem:[#allocation9 + $0x1a8] sm:$0xff] }
 0x189   :  { %v987_v62 = vadd.f32 %v986_v61, %v967_v58  ;;  %1496 = vmatpush.msrb.mxu2 %v1298_v16  ;;  %v1334_v58 = vld [vmem:[#allocation6 + $0x348] sm:$0xff]  ;;  %v1332_v61 = vld [vmem:[#allocation6 + $0x338] sm:$0xff] }
 0x18a   :  { %1511 = vmatpush.msrb.mxu3 %v1340_v47  ;;  %v1593_v16 = vld [vmem:[#allocation9 + $0xf0] sm:$0xff]  ;;  %v1574_v47 = vld [vmem:[#allocation9 + $0x58] sm:$0xff] }
 0x18b   :  { %v1006_v1 = vpop.f32.mrf.mxu0  ;;  %1497 = vmatpush.msrb.mxu2 %v1296_v18  ;;  %1633 = vmatpush.msra.mxu0 %v1593_v16  ;;  %v1591_v18 = vld [vmem:[#allocation9 + $0xe0] sm:$0xff] }
 0x18c   :  { %v1007_v5 = vadd.f32 %v1006_v1, %v987_v62  ;;  %1512 = vmatpush.msrb.mxu3 %v1338_v51  ;;  %v1330_v62 = vld [vmem:[#allocation6 + $0x328] sm:$0xff] }
 0x18d   :  { %v1026_v6 = vpop.f32.mrf.mxu1  ;;  %1498 = vmatpush.msrb.mxu2 %v1294_v50  ;;  %v1326_v1 = vld [vmem:[#allocation6 + $0x308] sm:$0xff]  ;;  %1634 = vmatpush.msra.mxu0 %v1591_v18  ;;  %v1589_v50 = vld [vmem:[#allocation9 + $0xd0] sm:$0xff] }
 0x18e   :  { %v3033_v10 = vadd.f32 %v1026_v6, %v1007_v5  ;;  %1513 = vmatpush.msrb.mxu3 %v1336_v56  ;;  %v1604_v18 = vld [vmem:[#allocation9 + $0x148] sm:$0xff] }
 0x18f   :  { %1635 = vmatpush.msra.mxu0 %v1589_v50  ;;  %v1601_v50 = vld [vmem:[#allocation9 + $0x130] sm:$0xff] }
 0x190   :  { %v2358_v13 = vmul.f32 -1.442695, %v3033_v10  ;;  %1514 = vmatpush.msrb.mxu3 %v1334_v58  ;;  %v1612_v58 = vld [vmem:[#allocation9 + $0x188] sm:$0xff] }
 0x192   :  { %2407 = vpow2.f32 %v2358_v13  ;;  %1515 = vmatpush.msrb.mxu3 %v1332_v61  ;;  %v1570_v61 = vld [vmem:[#allocation9 + $0x38] sm:$0xff] }
 0x194   :  { %1516 = vmatpush.msrb.mxu3 %v1330_v62 }
 0x196   :  { %1517 = vmatpush.msrb.mxu3 %v1328_v0 }
 0x198   :  { %v2408_v19 = vpop.eup %2407  ;;  %1518 = vmatpush.msrb.mxu3 %v1326_v1  ;;  %v1567_v1 = vld [vmem:[#allocation9 + $0x20] sm:$0xff] }
 0x199   :  { %v1163_v20 = vadd.f32 1.0, %v2408_v19  ;;  %v1590_v19 = vld [vmem:[#allocation9 + $0xd8] sm:$0xff] }
 0x19b   :  { %2409 = vrcp.f32 %v1163_v20  ;;  %v1206_v32 = vand.u32 2147483648, %v1163_v20  ;;  %vm1200_vm8 = vweird.f32 %v1163_v20  ;;  %v1204_v34 = vand.u32 2147483647, %v1163_v20 }
 0x19d   :  { %v1207_v37 = vor.u32 1.1754944e-38, %v1206_v32  ;;  %vm1205_vm11 = vcmp.eq.f32.partialorder %v1204_v34, 8.507059e+37  ;;  %v1621_v32 = vld [vmem:[#allocation9 + $0x1d0] sm:$0xff]  ;;  %v1579_v34 = vld [vmem:[#allocation9 + $0x80] sm:$0xff] }
 0x1a1   :  { %v2410_v25 = vpop.eup %2409 }
 0x1a2   :  { %v1196_v27 = vmul.f32 %v2410_v25, %v1163_v20  ;;  %vm1201_vm9 = vweird.f32 %v2410_v25  ;;  %v1587_v20 = vld [vmem:[#allocation9 + $0xc0] sm:$0xff] }
 0x1a3   :  { %vm1202_vm10 = vmor %vm1200_vm8, %vm1201_vm9  ;;  %1636 = vmatpush.msra.mxu0 %v1587_v20 }
 0x1a4   :  { %v1197_v29 = vsub.f32 1.0, %v1196_v27  ;;  %v1623_v27 = vld [vmem:[#allocation9 + $0x1e0] sm:$0xff] }
 0x1a5   :  { %1637 = vmatpush.msra.mxu0 %v1585_v55  ;;  %1654 = vmatpush.msra.mxu1 %v1623_v27  ;;  %v1597_v27 = vld [vmem:[#allocation9 + $0x110] sm:$0xff] }
 0x1a6   :  { %v1198_v33 = vmul.f32 %v2410_v25, %v1197_v29  ;;  %v1624_v29 = vld [vmem:[#allocation9 + $0x1e8] sm:$0xff] }
 0x1a7   :  { %1655 = vmatpush.msra.mxu1 %v1621_v32  ;;  %v1596_v32 = vld [vmem:[#allocation9 + $0x108] sm:$0xff] }
 0x1a8   :  { %v1199_v36 = vadd.f32 %v2410_v25, %v1198_v33  ;;  %v1622_v33 = vld [vmem:[#allocation9 + $0x1d8] sm:$0xff] }
 0x1a9   :  { %v1046_v39 = vpop.f32.mrf.mxu2  ;;  %1656 = vmatpush.msra.mxu1 %v1619_v35  ;;  %v1894_v35 = vld [vmem:[#allocation15 + $0x168] sm:$0xff] }
 0x1aa   :  { %v1203_v30 = vsel %vm1202_vm10, %v2410_v25, %v1199_v36  ;;  %v1047_v40 = vadd.f32 %v1046_v39, %v647_v4  ;;  %v1583_v25 = vld [vmem:[#allocation9 + $0xa0] sm:$0xff]  ;;  %v1582_v4 = vld [vmem:[#allocation9 + $0x98] sm:$0xff]  ;;  %v1580_v36 = vld [vmem:[#allocation9 + $0x88] sm:$0xff] }
 0x1ab   :  { %v1208_v41 = vsel %vm1205_vm11, %v1207_v37, %v1203_v30  ;;  %1638 = vmatpush.msra.mxu0 %v1583_v25  ;;  %v1577_v37 = vld [vmem:[#allocation9 + $0x70] sm:$0xff]  ;;  %v1578_v30 = vld [vmem:[#allocation9 + $0x78] sm:$0xff] }
 0x1ac   :  { %v1227_v38 = vmul.f32 %v1208_v41, %v3033_v10  ;;  %v1066_v42 = vpop.f32.mrf.mxu3  ;;  %v1086_v46 = vpop.f32.mrf.mxu0  ;;  %v1617_v39 = vld [vmem:[#allocation9 + $0x1b0] sm:$0xff]  ;;  %v1615_v41 = vld [vmem:[#allocation9 + $0x1a0] sm:$0xff] }
 0x1ad   :  { %v1067_v45 = vadd.f32 %v1066_v42, %v1047_v40  ;;  %1639 = vmatpush.msra.mxu0 %v1581_v31  ;;  %1657 = vmatpush.msra.mxu1 %v1617_v39  ;;  %v1618_v40 = vld [vmem:[#allocation9 + $0x1b8] sm:$0xff]  ;;  %v1595_v31 = vld [vmem:[#allocation9 + $0x100] sm:$0xff] }
 0x1ae   :  { %1419 = vmatmul.f32.vlgmr.msra.gmra.mxu2 %v1227_v38  ;;  %v3038_v42 = vld [vmem:[#allocation7] sm:$0x3] }
 0x1af   :  { %v1087_v48 = vadd.f32 %v1086_v46, %v1067_v45  ;;  %1673 = vmatpush.msra.mxu2 %v1594_v17  ;;  %1640 = vmatpush.msra.mxu0 %v1579_v34  ;;  %v1573_v45 = vld [vmem:[#allocation9 + $0x50] sm:$0xff]  ;;  %v1359_v51 = vperm.slane %v3038_v42, 0  ;;  %v1768_v34 = vld [vmem:[#allocation12 + $0x78] sm:$0xff] }
 0x1b0   :  { %1658 = vmatpush.msra.mxu1 %v1615_v41  ;;  %v1613_v46 = vld [vmem:[#allocation9 + $0x190] sm:$0xff] }
 0x1b1   :  { %1674 = vmatpush.msra.mxu2 %v1592_v49  ;;  %1641 = vmatpush.msra.mxu0 %v1577_v37 }
 0x1b2   :  { %v1106_v52 = vpop.f32.mrf.mxu1  ;;  %1659 = vmatpush.msra.mxu1 %v1613_v46  ;;  %v1939_v46 = vld [vmem:[#allocation15 + $0x2d0] sm:$0xff] }
 0x1b3   :  { %v1107_v53 = vadd.f32 %v1106_v52, %v1087_v48  ;;  %1675 = vmatpush.msra.mxu2 %v1590_v19  ;;  %1642 = vmatpush.msra.mxu0 %v1575_v26  ;;  %v1614_v48 = vld [vmem:[#allocation9 + $0x198] sm:$0xff]  ;;  %v1571_v52 = vld [vmem:[#allocation9 + $0x40] sm:$0xff] }
 0x1b4   :  { %v1602_v19 = vld [vmem:[#allocation9 + $0x138] sm:$0xff] }
 0x1b5   :  { %1676 = vmatpush.msra.mxu2 %v1588_v21  ;;  %1643 = vmatpush.msra.mxu0 %v1573_v45  ;;  %v1784_v26 = vld [vmem:[#allocation12 + $0xf8] sm:$0xff]  ;;  %v1885_v45 = vld [vmem:[#allocation15 + $0x120] sm:$0xff] }
 0x1b6   :  { %v1126_v54 = vpop.f32.mrf.mxu2  ;;  %v1146_v59 = vpop.f32.mrf.mxu3  ;;  %1499 = vmatmul.f32.vlgmr.msrb.gmra.mxu2 %v1227_v38  ;;  %v1576_v38 = vld [vmem:[#allocation9 + $0x68] sm:$0xff] }
 0x1b7   :  { %v1127_v57 = vadd.f32 %v1126_v54, %v1107_v53  ;;  %1677 = vmatpush.msra.mxu2 %v1586_v23  ;;  %v1611_v53 = vld [vmem:[#allocation9 + $0x180] sm:$0xff]  ;;  %v1572_v54 = vld [vmem:[#allocation9 + $0x48] sm:$0xff]  ;;  %1644 = vmatpush.msra.mxu0 %v1571_v52 }
 0x1b8   :  { %1660 = vmatpush.msra.mxu1 %v1611_v53  ;;  %v1600_v23 = vld [vmem:[#allocation9 + $0x128] sm:$0xff] }
 0x1b9   :  { %v1147_v60 = vadd.f32 %v1146_v59, %v1127_v57  ;;  %1678 = vmatpush.msra.mxu2 %v1584_v28  ;;  %v1569_v59 = vld [vmem:[#allocation9 + $0x30] sm:$0xff]  ;;  %v1598_v28 = vld [vmem:[#allocation9 + $0x118] sm:$0xff]  ;;  %v1781_v53 = vld [vmem:[#allocation12 + $0xe0] sm:$0xff] }
 0x1ba   :  { %1645 = vmatpush.msra.mxu0 %v1569_v59  ;;  %v1882_v52 = vld [vmem:[#allocation15 + $0x108] sm:$0xff] }
 0x1bb   :  { %v2359_v63 = vmul.f32 -1.442695, %v1147_v60  ;;  %1679 = vmatpush.msra.mxu2 %v1582_v4  ;;  %v1762_v59 = vld [vmem:[#allocation12 + $0x48] sm:$0xff] }
 0x1bc   :  { %1646 = vmatpush.msra.mxu0 %v1567_v1 }
 0x1bd   :  { %2411 = vpow2.f32 %v2359_v63  ;;  %1680 = vmatpush.msra.mxu2 %v1580_v36  ;;  %v1610_v63 = vld [vmem:[#allocation9 + $0x178] sm:$0xff] }
 0x1be   :  { %v1767_v36 = vld [vmem:[#allocation12 + $0x70] sm:$0xff] }
 0x1bf   :  { %1681 = vmatpush.msra.mxu2 %v1578_v30  ;;  %v1766_v30 = vld [vmem:[#allocation12 + $0x68] sm:$0xff] }
 0x1c1   :  { %1682 = vmatpush.msra.mxu2 %v1576_v38  ;;  %v1942_v38 = vld [vmem:[#allocation15 + $0x2e8] sm:$0xff] }
 0x1c3   :  { %v2412_v2 = vpop.eup %2411  ;;  %1683 = vmatpush.msra.mxu2 %v1574_v47  ;;  %v1782_v47 = vld [vmem:[#allocation12 + $0xe8] sm:$0xff] }
 0x1c4   :  { %v1164_v3 = vadd.f32 1.0, %v2412_v2  ;;  %v1607_v2 = vld [vmem:[#allocation9 + $0x160] sm:$0xff] }
 0x1c5   :  { %1684 = vmatpush.msra.mxu2 %v1572_v54  ;;  %v1933_v54 = vld [vmem:[#allocation15 + $0x2a0] sm:$0xff] }
 0x1c6   :  { %2413 = vrcp.f32 %v1164_v3  ;;  %v1221_v8 = vand.u32 2147483648, %v1164_v3  ;;  %v1219_v11 = vand.u32 2147483647, %v1164_v3  ;;  %vm1215_vm13 = vweird.f32 %v1164_v3 }
 0x1c7   :  { %1685 = vmatpush.msra.mxu2 %v1570_v61 }
 0x1c8   :  { %v1222_v13 = vor.u32 1.1754944e-38, %v1221_v8  ;;  %vm1220_vm15 = vcmp.eq.f32.partialorder %v1219_v11, 8.507059e+37  ;;  %v1605_v8 = vld [vmem:[#allocation9 + $0x150] sm:$0xff]  ;;  %v1606_v11 = vld [vmem:[#allocation9 + $0x158] sm:$0xff] }
 0x1cc   :  { %v2414_v5 = vpop.eup %2413 }
 0x1cd   :  { %v1211_v6 = vmul.f32 %v2414_v5, %v1164_v3  ;;  %vm1216_vm12 = vweird.f32 %v2414_v5  ;;  %v1380_v56 = vpop.f32.mrf.mxu0  ;;  %v1568_v3 = vld [vmem:[#allocation9 + $0x28] sm:$0xff] }
 0x1ce   :  { %vm1217_vm14 = vmor %vm1215_vm13, %vm1216_vm12  ;;  %v1381_v0 = vadd.f32 %v1380_v56, %v1359_v51  ;;  %1686 = vmatpush.msra.mxu2 %v1568_v3  ;;  %v1764_v51 = vld [vmem:[#allocation12 + $0x58] sm:$0xff]  ;;  %v1763_v56 = vld [vmem:[#allocation12 + $0x50] sm:$0xff] }
 0x1cf   :  { %v1212_v7 = vsub.f32 1.0, %v1211_v6 }
 0x1d1   :  { %v1213_v10 = vmul.f32 %v2414_v5, %v1212_v7  ;;  %v1565_v7 = vld [vmem:[#allocation9 + $0x10] sm:$0xff] }
 0x1d2   :  { %1647 = vmatpush.msra.mxu0 %v1565_v7 }
 0x1d3   :  { %v1214_v12 = vadd.f32 %v2414_v5, %v1213_v10  ;;  %v1566_v10 = vld [vmem:[#allocation9 + $0x18] sm:$0xff] }
 0x1d4   :  { %1687 = vmatpush.msra.mxu2 %v1566_v10 }
 0x1d5   :  { %v1218_v14 = vsel %vm1217_vm14, %v2414_v5, %v1214_v12  ;;  %v1608_v5 = vld [vmem:[#allocation9 + $0x168] sm:$0xff]  ;;  %v1360_v12 = vperm.slane %v3038_v42, 1  ;;  %v1783_v42 = vld [vmem:[#allocation12 + $0xf0] sm:$0xff] }
 0x1d6   :  { %v1223_v15 = vsel %vm1220_vm15, %v1222_v13, %v1218_v14  ;;  %v1563_v14 = vld [vmem:[#allocation9] sm:$0xff] }
 0x1d7   :  { %v1228_v44 = vmul.f32 %v1223_v15, %v1147_v60  ;;  %v1609_v60 = vld [vmem:[#allocation9 + $0x170] sm:$0xff]  ;;  %v1603_v15 = vld [vmem:[#allocation9 + $0x140] sm:$0xff]  ;;  %1648 = vmatpush.msra.mxu0 %v1563_v14 }
 0x1d8   :  { %1661 = vmatpush.msra.mxu1 %v1609_v60  ;;  %v1876_v60 = vld [vmem:[#allocation15 + $0xd8] sm:$0xff] }
 0x1d9   :  { %1439 = vmatmul.f32.vlgmr.msra.gmra.mxu3 %v1228_v44  ;;  %1789 = vmatpush.msrb.mxu0 %v1768_v34  ;;  %v1921_v34 = vld [vmem:[#allocation15 + $0x240] sm:$0xff] }
 0x1da   :  { %1693 = vmatpush.msra.mxu3 %v1626_v24  ;;  %1662 = vmatpush.msra.mxu1 %v1607_v2 }
 0x1db   :  { %1790 = vmatpush.msrb.mxu0 %v1767_v36  ;;  %v1776_v36 = vld [vmem:[#allocation12 + $0xb8] sm:$0xff] }
 0x1dc   :  { %1694 = vmatpush.msra.mxu3 %v1624_v29  ;;  %1663 = vmatpush.msra.mxu1 %v1605_v8 }
 0x1dd   :  { %1791 = vmatpush.msrb.mxu0 %v1766_v30  ;;  %v1775_v30 = vld [vmem:[#allocation12 + $0xb0] sm:$0xff] }
 0x1de   :  { %1695 = vmatpush.msra.mxu3 %v1622_v33  ;;  %1664 = vmatpush.msra.mxu1 %v1603_v15 }
 0x1e0   :  { %1696 = vmatpush.msra.mxu3 %v1620_v9  ;;  %1665 = vmatpush.msra.mxu1 %v1601_v50  ;;  %v1891_v9 = vld [vmem:[#allocation15 + $0x150] sm:$0xff] }
 0x1e1   :  { %1519 = vmatmul.f32.vlgmr.msrb.gmra.mxu3 %v1228_v44  ;;  %v1564_v44 = vld [vmem:[#allocation9 + $0x8] sm:$0xff] }
 0x1e2   :  { %1697 = vmatpush.msra.mxu3 %v1618_v40  ;;  %1688 = vmatpush.msra.mxu2 %v1564_v44  ;;  %v1888_v40 = vld [vmem:[#allocation15 + $0x138] sm:$0xff] }
 0x1e3   :  { %1666 = vmatpush.msra.mxu1 %v1599_v22  ;;  %v1760_v22 = vld [vmem:[#allocation12 + $0x38] sm:$0xff] }
 0x1e4   :  { %1698 = vmatpush.msra.mxu3 %v1616_v43  ;;  %1953 = vmatpush.msrb.mxu2 %v1894_v35  ;;  %v1765_v43 = vld [vmem:[#allocation12 + $0x60] sm:$0xff] }
 0x1e5   :  { %1667 = vmatpush.msra.mxu1 %v1597_v27  ;;  %1792 = vmatpush.msrb.mxu0 %v1765_v43  ;;  %v1759_v27 = vld [vmem:[#allocation12 + $0x30] sm:$0xff]  ;;  %v1757_v35 = vld [vmem:[#allocation12 + $0x20] sm:$0xff] }
 0x1e6   :  { %1699 = vmatpush.msra.mxu3 %v1614_v48  ;;  %1954 = vmatpush.msrb.mxu2 %v1891_v9  ;;  %v1936_v48 = vld [vmem:[#allocation15 + $0x2b8] sm:$0xff]  ;;  %v1861_v9 = vld [vmem:[#allocation15 + $0x60] sm:$0xff] }
 0x1e7   :  { %1668 = vmatpush.msra.mxu1 %v1595_v31  ;;  %1793 = vmatpush.msrb.mxu0 %v1764_v51  ;;  %v1924_v31 = vld [vmem:[#allocation15 + $0x258] sm:$0xff] }
 0x1e8   :  { %1700 = vmatpush.msra.mxu3 %v1612_v58  ;;  %1955 = vmatpush.msrb.mxu2 %v1888_v40  ;;  %v1858_v40 = vld [vmem:[#allocation15 + $0x48] sm:$0xff]  ;;  %v1912_v43 = vld [vmem:[#allocation15 + $0x1f8] sm:$0xff] }
 0x1e9   :  { %1809 = vmatpush.msrb.mxu1 %v1784_v26  ;;  %1794 = vmatpush.msrb.mxu0 %v1763_v56  ;;  %v1915_v26 = vld [vmem:[#allocation15 + $0x210] sm:$0xff]  ;;  %v1753_v51 = vld [vmem:[#allocation12] sm:$0xff] }
 0x1ea   :  { %1701 = vmatpush.msra.mxu3 %v1610_v63  ;;  %1956 = vmatpush.msrb.mxu2 %v1885_v45  ;;  %v1754_v45 = vld [vmem:[#allocation12 + $0x8] sm:$0xff]  ;;  %v1895_v56 = vld [vmem:[#allocation15 + $0x170] sm:$0xff] }
 0x1eb   :  { %1810 = vmatpush.msrb.mxu1 %v1783_v42  ;;  %1795 = vmatpush.msrb.mxu0 %v1762_v59  ;;  %v1855_v42 = vld [vmem:[#allocation15 + $0x30] sm:$0xff] }
 0x1ec   :  { %1702 = vmatpush.msra.mxu3 %v1608_v5  ;;  %1957 = vmatpush.msrb.mxu2 %v1882_v52  ;;  %v1772_v52 = vld [vmem:[#allocation12 + $0x98] sm:$0xff] }
 0x1ed   :  { %v1460_v16 = vpop.f32.mrf.mxu0  ;;  %1811 = vmatpush.msrb.mxu1 %v1782_v47  ;;  %v1852_v47 = vld [vmem:[#allocation15 + $0x18] sm:$0xff]  ;;  %v1903_v59 = vld [vmem:[#allocation15 + $0x1b0] sm:$0xff] }
 0x1ee   :  { %v1400_v57 = vpop.f32.mrf.mxu1  ;;  %1703 = vmatpush.msra.mxu3 %v1606_v11  ;;  %v1461_v21 = vadd.f32 %v1460_v16, %v1360_v12 }
 0x1ef   :  { %v1401_v6 = vadd.f32 %v1400_v57, %v1381_v0  ;;  %v1879_v57 = vld [vmem:[#allocation15 + $0xf0] sm:$0xff]  ;;  %1812 = vmatpush.msrb.mxu1 %v1781_v53  ;;  %v1849_v53 = vld [vmem:[#allocation15] sm:$0xff] }
 0x1f0   :  { %1704 = vmatpush.msra.mxu3 %v1604_v18  ;;  %1958 = vmatpush.msrb.mxu2 %v1879_v57  ;;  %v1896_v57 = vld [vmem:[#allocation15 + $0x178] sm:$0xff] }
 0x1f2   :  { %1705 = vmatpush.msra.mxu3 %v1602_v19  ;;  %1959 = vmatpush.msrb.mxu2 %v1876_v60  ;;  %v1892_v60 = vld [vmem:[#allocation15 + $0x158] sm:$0xff] }
 0x1f4   :  { %1706 = vmatpush.msra.mxu3 %v1600_v23  ;;  %v1779_v23 = vld [vmem:[#allocation12 + $0xd0] sm:$0xff] }
 0x1f6   :  { %v1480_v20 = vpop.f32.mrf.mxu1  ;;  %1707 = vmatpush.msra.mxu3 %v1598_v28  ;;  %v1778_v28 = vld [vmem:[#allocation12 + $0xc8] sm:$0xff] }
 0x1f7   :  { %v1481_v25 = vadd.f32 %v1480_v20, %v1461_v21  ;;  %v1761_v20 = vld [vmem:[#allocation12 + $0x40] sm:$0xff] }
 0x1f8   :  { %1708 = vmatpush.msra.mxu3 %v1596_v32  ;;  %v1873_v21 = vld [vmem:[#allocation15 + $0xc0] sm:$0xff]  ;;  %1796 = vmatpush.msrb.mxu0 %v1761_v20  ;;  %v1874_v20 = vld [vmem:[#allocation15 + $0xc8] sm:$0xff] }
 0x1f9   :  { %1960 = vmatpush.msrb.mxu2 %v1873_v21  ;;  %v1758_v32 = vld [vmem:[#allocation12 + $0x28] sm:$0xff]  ;;  %v1875_v21 = vld [vmem:[#allocation15 + $0xd0] sm:$0xff] }
 0x1fa   :  { %1973 = vmatpush.msrb.mxu3 %v1942_v38  ;;  %1797 = vmatpush.msrb.mxu0 %v1760_v22  ;;  %v1774_v38 = vld [vmem:[#allocation12 + $0xa8] sm:$0xff]  ;;  %v1932_v22 = vld [vmem:[#allocation15 + $0x298] sm:$0xff] }
 0x1fc   :  { %1974 = vmatpush.msrb.mxu3 %v1939_v46  ;;  %1798 = vmatpush.msrb.mxu0 %v1759_v27  ;;  %v1773_v46 = vld [vmem:[#allocation12 + $0xa0] sm:$0xff] }
 0x1fd   :  { %v1929_v27 = vld [vmem:[#allocation15 + $0x280] sm:$0xff] }
 0x1fe   :  { %1975 = vmatpush.msrb.mxu3 %v1936_v48  ;;  %1799 = vmatpush.msrb.mxu0 %v1758_v32  ;;  %v1909_v48 = vld [vmem:[#allocation15 + $0x1e0] sm:$0xff] }
 0x1ff   :  { %v1869_v32 = vld [vmem:[#allocation15 + $0xa0] sm:$0xff] }
 0x200   :  { %1976 = vmatpush.msrb.mxu3 %v1933_v54  ;;  %1800 = vmatpush.msrb.mxu0 %v1757_v35  ;;  %v1906_v54 = vld [vmem:[#allocation15 + $0x1c8] sm:$0xff] }
 0x201   :  { %v1922_v35 = vld [vmem:[#allocation15 + $0x248] sm:$0xff] }
 0x231   :  { %v1420_v62 = vpop.f32.mrf.mxu2 }
 0x232   :  { %v1421_v13 = vadd.f32 %v1420_v62, %v1401_v6 }
 0x239   :  { %v1500_v24 = vpop.f32.mrf.mxu2 }
 0x23a   :  { %v1501_v29 = vadd.f32 %v1500_v24, %v1481_v25  ;;  %v1870_v24 = vld [vmem:[#allocation15 + $0xa8] sm:$0xff]  ;;  %v1927_v25 = vld [vmem:[#allocation15 + $0x270] sm:$0xff] }
 0x23b   :  { %1961 = vmatpush.msrb.mxu2 %v1870_v24  ;;  %v1928_v24 = vld [vmem:[#allocation15 + $0x278] sm:$0xff] }
 0x25c   :  { %v1440_v17 = vpop.f32.mrf.mxu3 }
 0x25d   :  { %v3042_v49 = vadd.f32 %v1440_v17, %v1421_v13 }
 0x25f   :  { %v2360_v55 = vmul.f32 -1.442695, %v3042_v49 }
 0x261   :  { %2415 = vpow2.f32 %v2360_v55  ;;  %v1930_v55 = vld [vmem:[#allocation15 + $0x288] sm:$0xff] }
 0x262   :  { %1977 = vmatpush.msrb.mxu3 %v1930_v55  ;;  %v1627_v55 = vld [vmem:[#allocation10] sm:$0x3] }
 0x264   :  { %v1520_v4 = vpop.f32.mrf.mxu3  ;;  %1978 = vmatpush.msrb.mxu3 %v1927_v25  ;;  %v1872_v25 = vld [vmem:[#allocation15 + $0xb8] sm:$0xff] }
 0x265   :  { %v3045_v33 = vadd.f32 %v1520_v4, %v1501_v29  ;;  %v1867_v29 = vld [vmem:[#allocation15 + $0x90] sm:$0xff]  ;;  %v1777_v4 = vld [vmem:[#allocation12 + $0xc0] sm:$0xff] }
 0x266   :  { %1962 = vmatpush.msrb.mxu2 %v1867_v29  ;;  %1979 = vmatpush.msrb.mxu3 %v1924_v31  ;;  %v1868_v29 = vld [vmem:[#allocation15 + $0x98] sm:$0xff]  ;;  %v1925_v31 = vld [vmem:[#allocation15 + $0x260] sm:$0xff] }
 0x267   :  { %v2416_v37 = vpop.eup %2415  ;;  %v2361_v39 = vmul.f32 -1.442695, %v3045_v33 }
 0x268   :  { %v1529_v41 = vadd.f32 1.0, %v2416_v37  ;;  %1980 = vmatpush.msrb.mxu3 %v1921_v34  ;;  %v1918_v37 = vld [vmem:[#allocation15 + $0x228] sm:$0xff]  ;;  %v1865_v34 = vld [vmem:[#allocation15 + $0x80] sm:$0xff] }
 0x269   :  { %2417 = vpow2.f32 %v2361_v39  ;;  %v1756_v39 = vld [vmem:[#allocation12 + $0x18] sm:$0xff] }
 0x26a   :  { %2419 = vrcp.f32 %v1529_v41  ;;  %v1542_v1 = vand.u32 2147483648, %v1529_v41  ;;  %v1540_v3 = vand.u32 2147483647, %v1529_v41  ;;  %vm1536_vm1 = vweird.f32 %v1529_v41  ;;  %1981 = vmatpush.msrb.mxu3 %v1918_v37  ;;  %1801 = vmatpush.msrb.mxu0 %v1756_v39  ;;  %v1862_v39 = vld [vmem:[#allocation15 + $0x68] sm:$0xff] }
 0x26c   :  { %v1543_v7 = vor.u32 1.1754944e-38, %v1542_v1  ;;  %vm1541_vm3 = vcmp.eq.f32.partialorder %v1540_v3, 8.507059e+37  ;;  %1982 = vmatpush.msrb.mxu3 %v1915_v26  ;;  %v1890_v1 = vld [vmem:[#allocation15 + $0x148] sm:$0xff]  ;;  %v1897_v3 = vld [vmem:[#allocation15 + $0x180] sm:$0xff] }
 0x26e   :  { %1983 = vmatpush.msrb.mxu3 %v1912_v43  ;;  %v1859_v43 = vld [vmem:[#allocation15 + $0x50] sm:$0xff] }
 0x26f   :  { %v2418_v58 = vpop.eup %2417 }
 0x270   :  { %v2420_v61 = vpop.eup %2419  ;;  %v1530_v62 = vadd.f32 1.0, %v2418_v58  ;;  %1984 = vmatpush.msrb.mxu3 %v1909_v48  ;;  %v1771_v58 = vld [vmem:[#allocation12 + $0x90] sm:$0xff]  ;;  %v1917_v48 = vld [vmem:[#allocation15 + $0x220] sm:$0xff] }
 0x271   :  { %v1532_v63 = vmul.f32 %v2420_v61, %v1529_v41  ;;  %vm1537_vm0 = vweird.f32 %v2420_v61  ;;  %v1755_v41 = vld [vmem:[#allocation12 + $0x10] sm:$0xff] }
 0x272   :  { %2421 = vrcp.f32 %v1530_v62  ;;  %vm1538_vm2 = vmor %vm1536_vm1, %vm1537_vm0  ;;  %v1557_v14 = vand.u32 2147483648, %v1530_v62  ;;  %v1555_v44 = vand.u32 2147483647, %v1530_v62  ;;  %vm1551_vm5 = vweird.f32 %v1530_v62  ;;  %1802 = vmatpush.msrb.mxu0 %v1755_v41  ;;  %1985 = vmatpush.msrb.mxu3 %v1906_v54  ;;  %v1920_v41 = vld [vmem:[#allocation15 + $0x238] sm:$0xff]  ;;  %v1857_v54 = vld [vmem:[#allocation15 + $0x40] sm:$0xff] }
 0x273   :  { %v1533_v0 = vsub.f32 1.0, %v1532_v63  ;;  %v1900_v63 = vld [vmem:[#allocation15 + $0x198] sm:$0xff]  ;;  %vm2083_vm0 = vcmask 1043458   ;;  %vm2078_vm1 = vcmask 1041408  }
 0x274   :  { %v1558_v17 = vor.u32 1.1754944e-38, %v1557_v14  ;;  %vm1556_vm7 = vcmp.eq.f32.partialorder %v1555_v44, 8.507059e+37  ;;  %1803 = vmatpush.msrb.mxu0 %v1754_v45  ;;  %1986 = vmatpush.msrb.mxu3 %v1903_v59  ;;  %v1880_v14 = vld [vmem:[#allocation15 + $0xf8] sm:$0xff]  ;;  %v1881_v44 = vld [vmem:[#allocation15 + $0x100] sm:$0xff]  ;;  %v1910_v59 = vld [vmem:[#allocation15 + $0x1e8] sm:$0xff] }
 0x275   :  { %v1534_v2 = vmul.f32 %v2420_v61, %v1533_v0  ;;  %v1889_v0 = vld [vmem:[#allocation15 + $0x140] sm:$0xff]  ;;  %v1916_v45 = vld [vmem:[#allocation15 + $0x218] sm:$0xff] }
 0x276   :  { %1804 = vmatpush.msrb.mxu0 %v1753_v51  ;;  %1987 = vmatpush.msrb.mxu3 %v1900_v63 }
 0x277   :  { %v1535_v5 = vadd.f32 %v2420_v61, %v1534_v2  ;;  %v1769_v2 = vld [vmem:[#allocation12 + $0x80] sm:$0xff] }
 0x278   :  { %v2422_v6 = vpop.eup %2421  ;;  %1988 = vmatpush.msrb.mxu3 %v1897_v3  ;;  %v1908_v3 = vld [vmem:[#allocation15 + $0x1d8] sm:$0xff] }
 0x279   :  { %v1539_v8 = vsel %vm1538_vm2, %v2420_v61, %v1535_v5  ;;  %v1547_v10 = vmul.f32 %v2422_v6, %v1530_v62  ;;  %vm1552_vm4 = vweird.f32 %v2422_v6  ;;  %v1893_v61 = vld [vmem:[#allocation15 + $0x160] sm:$0xff]  ;;  %v1886_v5 = vld [vmem:[#allocation15 + $0x128] sm:$0xff]  ;;  %vm2084_vm2 = vmor %vm2083_vm0, %vm2078_vm1 }
 0x27a   :  { %v1544_v11 = vsel %vm1541_vm3, %v1543_v7, %v1539_v8  ;;  %vm1553_vm6 = vmor %vm1551_vm5, %vm1552_vm4  ;;  %v1770_v62 = vld [vmem:[#allocation12 + $0x88] sm:$0xff]  ;;  %v1887_v7 = vld [vmem:[#allocation15 + $0x130] sm:$0xff]  ;;  %vm2085_vm3 = vcmask 652292   ;;  %vm2080_vm4 = vcmask 1043456  }
 0x27b   :  { %v1561_v12 = vmul.f32 %v1544_v11, %v3042_v49  ;;  %v1548_v13 = vsub.f32 1.0, %v1547_v10  ;;  %v1780_v49 = vld [vmem:[#allocation12 + $0xd8] sm:$0xff]  ;;  %vm3064_vm5 = vmor %vm2085_vm3, %vm2084_vm2 }
 0x27c   :  { %1813 = vmatpush.msrb.mxu1 %v1780_v49  ;;  %v1944_v8 = vld [vmem:[#allocation15 + $0x2f8] sm:$0xff]  ;;  %v1883_v10 = vld [vmem:[#allocation15 + $0x110] sm:$0xff] }
 0x27d   :  { %v1549_v15 = vmul.f32 %v2422_v6, %v1548_v13  ;;  %1649 = vmatmul.f32.vlgmr.msra.gmra.mxu0 %v1561_v12  ;;  %1689 = vmatmul.f32.vlgmr.msra.gmra.mxu2 %v1561_v12  ;;  %v1940_v11 = vld [vmem:[#allocation15 + $0x2d8] sm:$0xff]  ;;  %v1941_v13 = vld [vmem:[#allocation15 + $0x2e0] sm:$0xff]  ;;  %v1931_v49 = vld [vmem:[#allocation15 + $0x290] sm:$0xff] }
 0x27e   :  { %1814 = vmatpush.msrb.mxu1 %v1779_v23  ;;  %1993 = vmatpush.msra.mxu0 %v1895_v56  ;;  %v1884_v12 = vld [vmem:[#allocation15 + $0x118] sm:$0xff]  ;;  %v1871_v23 = vld [vmem:[#allocation15 + $0xb0] sm:$0xff]  ;;  %v1914_v56 = vld [vmem:[#allocation15 + $0x208] sm:$0xff] }
 0x27f   :  { %v1550_v16 = vadd.f32 %v2422_v6, %v1549_v15  ;;  %v1937_v15 = vld [vmem:[#allocation15 + $0x2c0] sm:$0xff] }
 0x280   :  { %1815 = vmatpush.msrb.mxu1 %v1778_v28  ;;  %1994 = vmatpush.msra.mxu0 %v1892_v60  ;;  %v1629_v28 = vperm.slane %v1627_v55, 0  ;;  %v1854_v60 = vld [vmem:[#allocation15 + $0x28] sm:$0xff] }
 0x281   :  { %v1554_v18 = vsel %vm1553_vm6, %v2422_v6, %v1550_v16  ;;  %v1943_v6 = vld [vmem:[#allocation15 + $0x2f0] sm:$0xff]  ;;  %v1938_v16 = vld [vmem:[#allocation15 + $0x2c8] sm:$0xff] }
 0x282   :  { %v1559_v50 = vsel %vm1556_vm7, %v1558_v17, %v1554_v18  ;;  %1816 = vmatpush.msrb.mxu1 %v1777_v4  ;;  %1995 = vmatpush.msra.mxu0 %v1889_v0  ;;  %v1877_v17 = vld [vmem:[#allocation15 + $0xe0] sm:$0xff]  ;;  %v1934_v18 = vld [vmem:[#allocation15 + $0x2a8] sm:$0xff] }
 0x283   :  { %v1562_v19 = vmul.f32 %v1559_v50, %v3045_v33  ;;  %v1864_v33 = vld [vmem:[#allocation15 + $0x78] sm:$0xff]  ;;  %v1878_v50 = vld [vmem:[#allocation15 + $0xe8] sm:$0xff] }
 0x284   :  { %1963 = vmatpush.msrb.mxu2 %v1864_v33  ;;  %1817 = vmatpush.msrb.mxu1 %v1776_v36  ;;  %v1926_v33 = vld [vmem:[#allocation15 + $0x268] sm:$0xff] }
 0x285   :  { %1669 = vmatmul.f32.vlgmr.msra.gmra.mxu1 %v1562_v19  ;;  %1709 = vmatmul.f32.vlgmr.msra.gmra.mxu3 %v1562_v19  ;;  %v1935_v19 = vld [vmem:[#allocation15 + $0x2b0] sm:$0xff]  ;;  %v1866_v36 = vld [vmem:[#allocation15 + $0x88] sm:$0xff] }
 0x286   :  { %1964 = vmatpush.msrb.mxu2 %v1861_v9  ;;  %1818 = vmatpush.msrb.mxu1 %v1775_v30  ;;  %v1923_v9 = vld [vmem:[#allocation15 + $0x250] sm:$0xff]  ;;  %v1850_v0 = vld [vmem:[#allocation15 + $0x8] sm:$0xff] }
 0x287   :  { %1996 = vmatpush.msra.mxu0 %v1886_v5  ;;  %2053 = vmatpush.msra.mxu3 %v1944_v8  ;;  %v1919_v30 = vld [vmem:[#allocation15 + $0x230] sm:$0xff]  ;;  %v1901_v8 = vld [vmem:[#allocation15 + $0x1a0] sm:$0xff] }
 0x288   :  { %1965 = vmatpush.msrb.mxu2 %v1858_v40  ;;  %1819 = vmatpush.msrb.mxu1 %v1774_v38  ;;  %v1863_v40 = vld [vmem:[#allocation15 + $0x70] sm:$0xff]  ;;  %v1630_v38 = vperm.slane %v1627_v55, 1 }
 0x289   :  { %1997 = vmatpush.msra.mxu0 %v1883_v10  ;;  %2054 = vmatpush.msra.mxu3 %v1941_v13  ;;  %v1898_v13 = vld [vmem:[#allocation15 + $0x188] sm:$0xff] }
 0x28a   :  { %1966 = vmatpush.msrb.mxu2 %v1855_v42  ;;  %1820 = vmatpush.msrb.mxu1 %v1773_v46  ;;  %v1860_v46 = vld [vmem:[#allocation15 + $0x58] sm:$0xff] }
 0x28b   :  { %1998 = vmatpush.msra.mxu0 %v1880_v14  ;;  %2055 = vmatpush.msra.mxu3 %v1938_v16  ;;  %v1899_v14 = vld [vmem:[#allocation15 + $0x190] sm:$0xff] }
 0x28c   :  { %1967 = vmatpush.msrb.mxu2 %v1852_v47  ;;  %1821 = vmatpush.msrb.mxu1 %v1772_v52  ;;  %v1856_v52 = vld [vmem:[#allocation15 + $0x38] sm:$0xff] }
 0x28d   :  { %1999 = vmatpush.msra.mxu0 %v1877_v17  ;;  %2056 = vmatpush.msra.mxu3 %v1935_v19 }
 0x28e   :  { %1968 = vmatpush.msrb.mxu2 %v1849_v53  ;;  %1822 = vmatpush.msrb.mxu1 %v1771_v58  ;;  %v1913_v53 = vld [vmem:[#allocation15 + $0x200] sm:$0xff] }
 0x28f   :  { %2000 = vmatpush.msra.mxu0 %v1874_v20  ;;  %2057 = vmatpush.msra.mxu3 %v1932_v22  ;;  %v1853_v58 = vld [vmem:[#allocation15 + $0x20] sm:$0xff] }
 0x290   :  { %2033 = vmatpush.msra.mxu2 %v1896_v57  ;;  %1823 = vmatpush.msrb.mxu1 %v1770_v62  ;;  %v1911_v62 = vld [vmem:[#allocation15 + $0x1f0] sm:$0xff] }
 0x291   :  { %2001 = vmatpush.msra.mxu0 %v1871_v23  ;;  %2058 = vmatpush.msra.mxu3 %v1929_v27 }
 0x292   :  { %2034 = vmatpush.msra.mxu2 %v1893_v61  ;;  %1824 = vmatpush.msrb.mxu1 %v1769_v2  ;;  %v1851_v2 = vld [vmem:[#allocation15 + $0x10] sm:$0xff] }
 0x293   :  { %2002 = vmatpush.msra.mxu0 %v1868_v29  ;;  %2059 = vmatpush.msra.mxu3 %v1926_v33 }
 0x294   :  { %2035 = vmatpush.msra.mxu2 %v1890_v1  ;;  %2013 = vmatpush.msra.mxu1 %v1943_v6  ;;  %v1907_v1 = vld [vmem:[#allocation15 + $0x1d0] sm:$0xff]  ;;  %v1904_v6 = vld [vmem:[#allocation15 + $0x1b8] sm:$0xff] }
 0x295   :  { %2003 = vmatpush.msra.mxu0 %v1865_v34  ;;  %2060 = vmatpush.msra.mxu3 %v1923_v9  ;;  %v2262_v9 = vld [vmem:[#allocation19 + $0x70] sm:$0xff] }
 0x296   :  { %2036 = vmatpush.msra.mxu2 %v1887_v7  ;;  %2014 = vmatpush.msra.mxu1 %v1940_v11  ;;  %v1905_v7 = vld [vmem:[#allocation15 + $0x1c0] sm:$0xff]  ;;  %v1902_v11 = vld [vmem:[#allocation15 + $0x1a8] sm:$0xff] }
 0x297   :  { %2004 = vmatpush.msra.mxu0 %v1862_v39  ;;  %2061 = vmatpush.msra.mxu3 %v1920_v41  ;;  %v2260_v39 = vld [vmem:[#allocation19 + $0x60] sm:$0xff] }
 0x298   :  { %2037 = vmatpush.msra.mxu2 %v1884_v12  ;;  %2015 = vmatpush.msra.mxu1 %v1937_v15  ;;  %v2256_v41 = vld [vmem:[#allocation19 + $0x40] sm:$0xff] }
 0x299   :  { %2005 = vmatpush.msra.mxu0 %v1859_v43  ;;  %2062 = vmatpush.msra.mxu3 %v1917_v48  ;;  %v2253_v43 = vld [vmem:[#allocation19 + $0x28] sm:$0xff]  ;;  %v2251_v48 = vld [vmem:[#allocation19 + $0x18] sm:$0xff] }
 0x29a   :  { %2038 = vmatpush.msra.mxu2 %v1881_v44  ;;  %2016 = vmatpush.msra.mxu1 %v1934_v18 }
 0x29b   :  { %2006 = vmatpush.msra.mxu0 %v1856_v52  ;;  %2063 = vmatpush.msra.mxu3 %v1914_v56  ;;  %v1945_v52 = vld [vmem:[#allocation16] sm:$0x7] }
 0x29c   :  { %2039 = vmatpush.msra.mxu2 %v1878_v50  ;;  %2017 = vmatpush.msra.mxu1 %v1931_v49 }
 0x29d   :  { %2007 = vmatpush.msra.mxu0 %v1853_v58  ;;  %2064 = vmatpush.msra.mxu3 %v1911_v62  ;;  %v1948_v62 = vperm.slane %v1945_v52, 1 }
 0x29e   :  { %2040 = vmatpush.msra.mxu2 %v1875_v21  ;;  %2018 = vmatpush.msra.mxu1 %v1928_v24 }
 0x29f   :  { %2008 = vmatpush.msra.mxu0 %v1850_v0  ;;  %2065 = vmatpush.msra.mxu3 %v1908_v3 }
 0x2a0   :  { %2041 = vmatpush.msra.mxu2 %v1872_v25  ;;  %2019 = vmatpush.msra.mxu1 %v1925_v31 }
 0x2a1   :  { %2066 = vmatpush.msra.mxu3 %v1905_v7 }
 0x2a2   :  { %2042 = vmatpush.msra.mxu2 %v1869_v32  ;;  %2020 = vmatpush.msra.mxu1 %v1922_v35 }
 0x2a3   :  { %2067 = vmatpush.msra.mxu3 %v1902_v11 }
 0x2a4   :  { %2043 = vmatpush.msra.mxu2 %v1866_v36  ;;  %2021 = vmatpush.msra.mxu1 %v1919_v30  ;;  %v2263_v36 = vld [vmem:[#allocation19 + $0x78] sm:$0xff] }
 0x2a5   :  { %2068 = vmatpush.msra.mxu3 %v1899_v14  ;;  %v2259_v30 = vld [vmem:[#allocation19 + $0x58] sm:$0xff] }
 0x2a6   :  { %2044 = vmatpush.msra.mxu2 %v1863_v40  ;;  %2022 = vmatpush.msra.mxu1 %v1916_v45  ;;  %v2258_v40 = vld [vmem:[#allocation19 + $0x50] sm:$0xff]  ;;  %v2252_v45 = vld [vmem:[#allocation19 + $0x20] sm:$0xff] }
 0x2a8   :  { %2045 = vmatpush.msra.mxu2 %v1860_v46  ;;  %2023 = vmatpush.msra.mxu1 %v1913_v53 }
 0x2aa   :  { %2046 = vmatpush.msra.mxu2 %v1857_v54  ;;  %2024 = vmatpush.msra.mxu1 %v1910_v59  ;;  %v2249_v54 = vld [vmem:[#allocation19 + $0x8] sm:$0xff]  ;;  %v1947_v59 = vperm.slane %v1945_v52, 0 }
 0x2ac   :  { %2047 = vmatpush.msra.mxu2 %v1854_v60  ;;  %2025 = vmatpush.msra.mxu1 %v1907_v1  ;;  %v2248_v60 = vld [vmem:[#allocation19] sm:$0xff] }
 0x2ae   :  { %2048 = vmatpush.msra.mxu2 %v1851_v2  ;;  %2026 = vmatpush.msra.mxu1 %v1904_v6 }
 0x2b0   :  { %2027 = vmatpush.msra.mxu1 %v1901_v8  ;;  %v1949_v8 = vperm.slane %v1945_v52, 2 }
 0x2b2   :  { %2028 = vmatpush.msra.mxu1 %v1898_v13 }
 0x2fa   :  { %v1650_v4 = vpop.f32.mrf.mxu0 }
 0x2fb   :  { %v1651_v37 = vadd.f32 %v1650_v4, %v1629_v28 }
 0x300   :  { %v1690_v47 = vpop.f32.mrf.mxu2 }
 0x301   :  { %v1691_v57 = vadd.f32 %v1690_v47, %v1630_v38  ;;  %v2255_v38 = vld [vmem:[#allocation19 + $0x38] sm:$0xff]  ;;  %v2397_v47 = vld [vmem:[#allocation13] ss:$0 sm:$0xff] }
 0x302   :  { %v1670_v26 = vpop.f32.mrf.mxu1 }
 0x303   :  { %v3050_v42 = vadd.f32 %v1670_v26, %v1651_v37  ;;  %v2261_v37 = vld [vmem:[#allocation19 + $0x68] sm:$0xff] }
 0x304   :  { %v2257_v26 = vld [vmem:[#allocation19 + $0x48] sm:$0xff] }
 0x305   :  { %v2362_v51 = vmul.f32 -1.442695, %v3050_v42 }
 0x307   :  { %2423 = vpow2.f32 %v2362_v51  ;;  %v2250_v51 = vld [vmem:[#allocation19 + $0x10] sm:$0xff] }
 0x308   :  { %v1710_v61 = vpop.f32.mrf.mxu3 }
 0x309   :  { %v3053_v63 = vadd.f32 %v1710_v61, %v1691_v57 }
 0x30b   :  { %v2363_v5 = vmul.f32 -1.442695, %v3053_v63 }
 0x30d   :  { %v2424_v10 = vpop.eup %2423  ;;  %2425 = vpow2.f32 %v2363_v5 }
 0x30e   :  { %v1719_v12 = vadd.f32 1.0, %v2424_v10 }
 0x310   :  { %2427 = vrcp.f32 %v1719_v12  ;;  %v1732_v50 = vand.u32 2147483648, %v1719_v12  ;;  %v1730_v20 = vand.u32 2147483647, %v1719_v12  ;;  %vm1726_vm9 = vweird.f32 %v1719_v12 }
 0x312   :  { %v1733_v22 = vor.u32 1.1754944e-38, %v1732_v50  ;;  %vm1731_vm11 = vcmp.eq.f32.partialorder %v1730_v20, 8.507059e+37 }
 0x313   :  { %v2426_v15 = vpop.eup %2425 }
 0x314   :  { %v1720_v44 = vadd.f32 1.0, %v2426_v15 }
 0x316   :  { %v2428_v16 = vpop.eup %2427  ;;  %2429 = vrcp.f32 %v1720_v44  ;;  %v1747_v27 = vand.u32 2147483648, %v1720_v44  ;;  %v1745_v31 = vand.u32 2147483647, %v1720_v44  ;;  %vm1741_vm13 = vweird.f32 %v1720_v44 }
 0x317   :  { %v1722_v17 = vmul.f32 %v2428_v16, %v1719_v12  ;;  %vm1727_vm8 = vweird.f32 %v2428_v16 }
 0x318   :  { %vm1728_vm10 = vmor %vm1726_vm9, %vm1727_vm8  ;;  %v1748_v4 = vor.u32 1.1754944e-38, %v1747_v27  ;;  %vm1746_vm15 = vcmp.eq.f32.partialorder %v1745_v31, 8.507059e+37 }
 0x319   :  { %v1723_v18 = vsub.f32 1.0, %v1722_v17 }
 0x31b   :  { %v1724_v19 = vmul.f32 %v2428_v16, %v1723_v18  ;;  %v3062_v18 = vld [vmem:[#allocation18] sm:$0xff] }
 0x31c   :  { %v2430_v49 = vpop.eup %2429 }
 0x31d   :  { %v1725_v21 = vadd.f32 %v2428_v16, %v1724_v19  ;;  %v1737_v55 = vmul.f32 %v2430_v49, %v1720_v44  ;;  %vm1742_vm12 = vweird.f32 %v2430_v49 }
 0x31e   :  { %vm1743_vm14 = vmor %vm1741_vm13, %vm1742_vm12 }
 0x31f   :  { %v1729_v23 = vsel %vm1728_vm10, %v2428_v16, %v1725_v21  ;;  %v1738_v24 = vsub.f32 1.0, %v1737_v55 }
 0x320   :  { %v1734_v25 = vsel %vm1731_vm11, %v1733_v22, %v1729_v23 }
 0x321   :  { %v1751_v28 = vmul.f32 %v1734_v25, %v3050_v42  ;;  %v1739_v29 = vmul.f32 %v2430_v49, %v1738_v24  ;;  %v2254_v42 = vld [vmem:[#allocation19 + $0x30] sm:$0xff]  ;;  %v2212_v24 = vsub.f32 1.0, %v3062_v18  ;;  %v2371_v25 = vrot.slane %v3062_v18, 9 }
 0x323   :  { %v1740_v32 = vadd.f32 %v2430_v49, %v1739_v29  ;;  %1805 = vmatmul.f32.vlgmr.msrb.gmra.mxu0 %v1751_v28  ;;  %1969 = vmatmul.f32.vlgmr.msrb.gmra.mxu2 %v1751_v28 }
 0x324   :  { %2268 = vmatpush.msrb.mxu0 %v2263_v36 }
 0x325   :  { %v1744_v33 = vsel %vm1743_vm14, %v2430_v49, %v1740_v32  ;;  %v3083_v32 = vsub.f32 %v2212_v24, %v2371_v25 }
 0x326   :  { %v1749_v34 = vsel %vm1746_vm15, %v1748_v4, %v1744_v33  ;;  %2269 = vmatpush.msrb.mxu0 %v2262_v9  ;;  %v2155_v9 = vperm.slane %v3062_v18, 0 }
 0x327   :  { %v1752_v35 = vmul.f32 %v1749_v34, %v3053_v63 }
 0x328   :  { %2270 = vmatpush.msrb.mxu0 %v2261_v37  ;;  %v2225_v37 = vperm.slane %v3083_v32, 6 }
 0x329   :  { %1825 = vmatmul.f32.vlgmr.msrb.gmra.mxu1 %v1752_v35  ;;  %1989 = vmatmul.f32.vlgmr.msrb.gmra.mxu3 %v1752_v35 }
 0x32a   :  { %2271 = vmatpush.msrb.mxu0 %v2260_v39 }
 0x32b   :  { %2009 = vmatmul.f32.vlgmr.msra.gmra.mxu0 %v1751_v28  ;;  %2049 = vmatmul.f32.vlgmr.msra.gmra.mxu2 %v1751_v28 }
 0x32c   :  { %2272 = vmatpush.msrb.mxu0 %v2259_v30 }
 0x32e   :  { %2273 = vmatpush.msrb.mxu0 %v2258_v40 }
 0x330   :  { %2274 = vmatpush.msrb.mxu0 %v2257_v26  ;;  %v2173_v26 = vperm.slane %v3062_v18, 1 }
 0x331   :  { %2029 = vmatmul.f32.vlgmr.msra.gmra.mxu1 %v1752_v35  ;;  %2069 = vmatmul.f32.vlgmr.msra.gmra.mxu3 %v1752_v35  ;;  %v3085_v35 = vld [vmem:[#allocation18 + $0x8] sm:$0xf] }
 0x332   :  { %2275 = vmatpush.msrb.mxu0 %v2256_v41 }
 0x334   :  { %2276 = vmatpush.msrb.mxu0 %v2255_v38  ;;  %v2213_v38 = vsub.f32 1.0, %v3085_v35 }
 0x336   :  { %2277 = vmatpush.msrb.mxu0 %v2254_v42  ;;  %v2372_v42 = vrot.slane %v3085_v35, 9 }
 0x338   :  { %2278 = vmatpush.msrb.mxu0 %v2253_v43 }
 0x33a   :  { %2279 = vmatpush.msrb.mxu0 %v2252_v45 }
 0x33c   :  { %2280 = vmatpush.msrb.mxu0 %v2251_v48 }
 0x33e   :  { %2281 = vmatpush.msrb.mxu0 %v2250_v51 }
 0x340   :  { %2282 = vmatpush.msrb.mxu0 %v2249_v54 }
 0x342   :  { %2283 = vmatpush.msrb.mxu0 %v2248_v60  ;;  %v2174_v60 = vperm.slane %v3062_v18, 5 }
 0x3a0   :  { %v1806_v46 = vpop.f32.mrf.mxu0 }
 0x3a1   :  { %v1807_v53 = vadd.f32 %v2397_v47, %v1806_v46  ;;  %v2156_v47 = vperm.slane %v3062_v18, 4 }
 0x3a6   :  { %v1826_v56 = vpop.f32.mrf.mxu1  ;;  %v1970_v57 = vpop.f32.mrf.mxu2 }
 0x3a7   :  { %v3058_v58 = vadd.f32 %v1826_v56, %v1807_v53  ;;  %v1971_v0 = vadd.f32 %v1970_v57, %v1947_v59  ;;  %v2161_v53 = vperm.slane %v2155_v9, 0  ;;  %v2221_v9 = vsub.f32 %v2213_v38, %v2372_v42 }
 0x3a8   :  { %v2010_v63 = vpop.f32.mrf.mxu0 }
 0x3a9   :  { %v2364_v61 = vmul.f32 -1.442695, %v3058_v58  ;;  %v2011_v2 = vadd.f32 %v2010_v63, %v1948_v62  ;;  %v2197_v62 = vperm.slane %v3062_v18, 3  ;;  %v2226_v38 = vperm.slane %v2221_v9, 2 }
 0x3ab   :  { %2431 = vpow2.f32 %v2364_v61  ;;  %v3102_v61 = vperm.slane %v2173_v26, 1 }
 0x3ac   :  { %v1990_v1 = vpop.f32.mrf.mxu3 }
 0x3ad   :  { %v1991_v3 = vadd.f32 %v1990_v1, %v1971_v0  ;;  %v2162_v1 = vperm.slane %v2156_v47, 0 }
 0x3ae   :  { %v2030_v5 = vpop.f32.mrf.mxu1  ;;  %v2050_v10 = vpop.f32.mrf.mxu2 }
 0x3af   :  { %v2365_v6 = vmul.f32 -1.442695, %v1991_v3  ;;  %v2031_v7 = vadd.f32 %v2030_v5, %v2011_v2  ;;  %v2051_v14 = vadd.f32 %v2050_v10, %v1949_v8 }
 0x3b1   :  { %v2432_v11 = vpop.eup %2431  ;;  %2433 = vpow2.f32 %v2365_v6  ;;  %v2366_v12 = vmul.f32 -1.442695, %v2031_v7  ;;  %v2076_v15 = vrot.slane %v2031_v7, 6  ;;  %v2198_v7 = vperm.slane %v3062_v18, 7 }
 0x3b2   :  { %v1832_v13 = vadd.f32 1.0, %v2432_v11 }
 0x3b3   :  { %2435 = vpow2.f32 %v2366_v12  ;;  %v2079_v21 = vsel %vm2078_vm1, %v1991_v3, %v2076_v15  ;;  %v2186_v12 = vperm.slane %v3062_v18, 6  ;;  %v2180_v15 = vperm.slane %v2174_v60, 1 }
 0x3b4   :  { %2437 = vrcp.f32 %v1832_v13  ;;  %v2070_v44 = vpop.f32.mrf.mxu3  ;;  %v1844_v31 = vand.u32 2147483648, %v1832_v13  ;;  %v1842_v34 = vand.u32 2147483647, %v1832_v13  ;;  %vm1838_vm7 = vweird.f32 %v1832_v13 }
 0x3b5   :  { %v2071_v16 = vadd.f32 %v2070_v44, %v2051_v14  ;;  %v2204_v24 = vperm.slane %v2198_v7, 3 }
 0x3b6   :  { %v1845_v41 = vor.u32 1.1754944e-38, %v1844_v31  ;;  %vm1843_vm9 = vcmp.eq.f32.partialorder %v1842_v34, 8.507059e+37 }
 0x3b7   :  { %v2434_v17 = vpop.eup %2433  ;;  %v2077_v50 = vrot.slane %v2071_v16, 4  ;;  %v2367_v20 = vmul.f32 -1.442695, %v2071_v16 }
 0x3b8   :  { %v3068_v49 = vadd.f32 1.0, %v2434_v17 }
 0x3b9   :  { %v2436_v55 = vpop.eup %2435  ;;  %v2081_v22 = vsel %vm2080_vm4, %v2079_v21, %v2077_v50  ;;  %2439 = vpow2.f32 %v2367_v20 }
 0x3ba   :  { %v2438_v23 = vpop.eup %2437  ;;  %2441 = vrcp.f32 %v3068_v49  ;;  %2087 = vst.msk [vmem:[%s3164_s15] sm:$0x3f] %vm3064_vm5, %v2081_v22  ;;  %v3080_v28 = vadd.f32 1.0, %v2436_v55  ;;  %v2113_v51 = vand.u32 2147483648, %v3068_v49  ;;  %v2111_v57 = vand.u32 2147483647, %v3068_v49 }
 0x3bb   :  { %v1834_v27 = vmul.f32 %v2438_v23, %v1832_v13  ;;  %vm1839_vm6 = vweird.f32 %v2438_v23  ;;  %vm2107_vm11 = vweird.f32 %v3068_v49  ;;  %v2185_v22 = vperm.slane %v3062_v18, 2 }
 0x3bc   :  { %2443 = vrcp.f32 %v3080_v28  ;;  %vm1840_vm8 = vmor %vm1838_vm7, %vm1839_vm6  ;;  %v2128_v0 = vand.u32 2147483648, %v3080_v28  ;;  %v2126_v5 = vand.u32 2147483647, %v3080_v28  ;;  %vm2112_vm14 = vcmp.eq.f32.partialorder %v2111_v57, 8.507059e+37 }
 0x3bd   :  { %v1835_v29 = vsub.f32 1.0, %v1834_v27  ;;  %vm2122_vm15 = vweird.f32 %v3080_v28  ;;  %v2157_v27 = vperm.slane %v3085_v35, 0 }
 0x3be   :  { %v2129_v13 = vor.u32 1.1754944e-38, %v2128_v0  ;;  %vm2127_vm2 = vcmp.eq.f32.partialorder %v2126_v5, 8.507059e+37  ;;  %v2232_v5 = vperm.slane %v2226_v38, 2 }
 0x3bf   :  { %v2440_v4 = vpop.eup %2439  ;;  %v1836_v33 = vmul.f32 %v2438_v23, %v1835_v29 }
 0x3c0   :  { %v2442_v36 = vpop.eup %2441  ;;  %v3089_v39 = vadd.f32 1.0, %v2440_v4 }
 0x3c1   :  { %v1837_v30 = vadd.f32 %v2438_v23, %v1836_v33  ;;  %v2103_v40 = vmul.f32 %v2442_v36, %v3068_v49  ;;  %vm2108_vm10 = vweird.f32 %v2442_v36 }
 0x3c2   :  { %2445 = vrcp.f32 %v3089_v39  ;;  %v2444_v43 = vpop.eup %2443  ;;  %vm2109_vm12 = vmor %vm2107_vm11, %vm2108_vm10  ;;  %v2141_v17 = vand.u32 2147483647, %v3089_v39  ;;  %v2143_v50 = vand.u32 2147483648, %v3089_v39  ;;  %vm2137_vm6 = vweird.f32 %v3089_v39 }
 0x3c3   :  { %v1841_v45 = vsel %vm1840_vm8, %v2438_v23, %v1837_v30  ;;  %v2104_v46 = vsub.f32 1.0, %v2103_v40  ;;  %v2118_v52 = vmul.f32 %v2444_v43, %v3080_v28  ;;  %vm2123_vm13 = vweird.f32 %v2444_v43 }
 0x3c4   :  { %v1846_v48 = vsel %vm1843_vm9, %v1845_v41, %v1841_v45  ;;  %vm2124_vm0 = vmor %vm2122_vm15, %vm2123_vm13  ;;  %v2192_v23 = vperm.slane %v2186_v12, 2  ;;  %v2175_v28 = vperm.slane %v3085_v35, 1  ;;  %v2144_v33 = vor.u32 1.1754944e-38, %v2143_v50  ;;  %v2398_v50 = vld [vmem:[#allocation21] ss:$0 sm:$0xff] }
 0x3c5   :  { %v1848_v54 = vmul.f32 %v1846_v48, %v3058_v58  ;;  %v2105_v56 = vmul.f32 %v2442_v36, %v2104_v46  ;;  %v2119_v59 = vsub.f32 1.0, %v2118_v52  ;;  %v2114_v58 = vor.u32 1.1754944e-38, %v2113_v51 }
 0x3c6   :  { %vm2142_vm8 = vcmp.eq.f32.partialorder %v2141_v17, 8.507059e+37  ;;  %v2181_v45 = vperm.slane %v2175_v28, 1  ;;  %v2187_v46 = vperm.slane %v3085_v35, 2  ;;  %v2191_v51 = vperm.slane %v2185_v22, 2  ;;  %v2290_v28 = vld [vmem:[#allocation22] sm:$0xf] }
 0x3c7   :  { %v2106_v63 = vadd.f32 %v2442_v36, %v2105_v56  ;;  %2284 = vmatmul.f32.vlgmr.msrb.gmra.mxu0 %v1848_v54  ;;  %v2120_v3 = vmul.f32 %v2444_v43, %v2119_v59  ;;  %v2231_v52 = vperm.slane %v2225_v37, 2  ;;  %v2203_v59 = vperm.slane %v2197_v62, 3 }
 0x3c8   :  { %v2446_v2 = vpop.eup %2445  ;;  %v2193_v0 = vperm.slane %v2187_v46, 2  ;;  %vm2288_vm9 = vcmask 680960   ;;  %v2318_v46 = vperm.slane %v2290_v28, 2 }
 0x3c9   :  { %v2110_v6 = vsel %vm2109_vm12, %v2442_v36, %v2106_v63  ;;  %v2133_v8 = vmul.f32 %v2446_v2, %v3089_v39  ;;  %v2121_v11 = vadd.f32 %v2444_v43, %v2120_v3  ;;  %vm2138_vm3 = vweird.f32 %v2446_v2 }
 0x3ca   :  { %v3110_v10 = vsel %vm2112_vm14, %v2114_v58, %v2110_v6  ;;  %vm2139_vm7 = vmor %vm2137_vm6, %vm2138_vm3  ;;  %v2199_v36 = vperm.slane %v3085_v35, 3 }
 0x3cb   :  { %v2147_v14 = vmul.f32 2.0, %v3110_v10  ;;  %v2134_v44 = vsub.f32 1.0, %v2133_v8  ;;  %v2125_v16 = vsel %vm2124_vm0, %v2444_v43, %v2121_v11  ;;  %v2163_v43 = vperm.slane %v2157_v27, 0 }
 0x3cc   :  { %v2130_v20 = vsel %vm2127_vm2, %v2129_v13, %v2125_v16 }
 0x3cd   :  { %v2368_v49 = vadd.f32 -0.5, %v2147_v14  ;;  %v2135_v21 = vmul.f32 %v2446_v2, %v2134_v44  ;;  %v2148_v55 = vmul.f32 2.0, %v2130_v20  ;;  %v2170_v39 = vmul.f32 %v2147_v14, %v2147_v14 }
 0x3ce   :  { %v2234_v3 = vmul.f32 %v2231_v52, %v2130_v20 }
 0x3cf   :  { %v2136_v25 = vadd.f32 %v2446_v2, %v2135_v21  ;;  %v2369_v29 = vadd.f32 -0.5, %v2148_v55  ;;  %v2164_v31 = vadd.f32 %v2368_v49, %v2161_v53  ;;  %v2171_v4 = vmul.f32 %v2148_v55, %v2148_v55 }
 0x3d0   :  { %v2224_v53 = vperm.slane %v3083_v32, 2  ;;  %v2182_v42 = vmul.f32 %v3102_v61, %v2170_v39  ;;  %v2316_v39 = vperm.slane %v2290_v28, 1 }
 0x3d1   :  { %v2140_v34 = vsel %vm2139_vm7, %v2446_v2, %v2136_v25  ;;  %v2165_v30 = vadd.f32 %v2369_v29, %v2162_v1  ;;  %v2183_v40 = vmul.f32 %v2180_v15, %v2171_v4  ;;  %v2167_v47 = vmul.f32 4.0, %v2164_v31 }
 0x3d2   :  { %v2145_v26 = vsel %vm2142_vm8, %v2144_v33, %v2140_v34  ;;  %v2205_v1 = vperm.slane %v2199_v36, 3  ;;  %v2206_v32 = vmul.f32 %v2203_v59, %v2182_v42  ;;  %v2230_v6 = vperm.slane %v2224_v53, 2 }
 0x3d3   :  { %v2149_v41 = vmul.f32 2.0, %v2145_v26  ;;  %v2168_v48 = vmul.f32 4.0, %v2165_v30  ;;  %v2207_v60 = vmul.f32 %v2204_v24, %v2183_v40  ;;  %v2194_v2 = vmul.f32 %v2191_v51, %v2167_v47 }
 0x3d4   :  { %v2235_v13 = vmul.f32 %v2232_v5, %v2145_v26  ;;  %v2233_v18 = vmul.f32 %v2230_v6, %v3110_v10  ;;  %v2323_v33 = vsub.f32 1.0, %v2290_v28  ;;  %v2325_v34 = vrot.slane %v2290_v28, 1 }
 0x3d5   :  { %v2370_v54 = vadd.f32 -0.5, %v2149_v41  ;;  %v2172_v56 = vmul.f32 %v2149_v41, %v2149_v41  ;;  %v2195_v57 = vmul.f32 %v2192_v23, %v2168_v48  ;;  %v2209_v61 = vadd.f32 %v2206_v32, %v2194_v2 }
 0x3d6   :  { %v2312_v30 = vperm.slane %v2290_v28, 0  ;;  %v2327_v41 = vsub.f32 %v2323_v33, %v2325_v34  ;;  %v2320_v47 = vperm.slane %v2290_v28, 3 }
 0x3d7   :  { %v2166_v63 = vadd.f32 %v2370_v54, %v2163_v43  ;;  %v2184_v35 = vmul.f32 %v2181_v45, %v2172_v56  ;;  %v2210_v58 = vadd.f32 %v2207_v60, %v2195_v57  ;;  %v2236_v15 = vadd.f32 %v2233_v18, %v2209_v61 }
 0x3d8   :  { %v2328_v51 = vperm.slane %v2327_v41, 2 }
 0x3d9   :  { %v2169_v37 = vmul.f32 4.0, %v2166_v63  ;;  %v2237_v7 = vadd.f32 %v2234_v3, %v2210_v58  ;;  %v2208_v11 = vmul.f32 %v2205_v1, %v2184_v35 }
 0x3db   :  { %v2196_v8 = vmul.f32 %v2193_v0, %v2169_v37  ;;  %v2242_v62 = vrot.slane %v2237_v7, 6 }
 0x3dd   :  { %v2211_v12 = vadd.f32 %v2208_v11, %v2196_v8  ;;  %v2244_v16 = vsel %vm2078_vm1, %v2236_v15, %v2242_v62 }
 0x3df   :  { %v2238_v14 = vadd.f32 %v2235_v13, %v2211_v12 }
 0x3e1   :  { %v2243_v44 = vrot.slane %v2238_v14, 4 }
 0x3e3   :  { %v2245_v17 = vsel %vm2080_vm4, %v2244_v16, %v2243_v44 }
 0x3e4   :  { %2247 = vst.msk [vmem:[%s3166_s17] sm:$0x3f] %vm3064_vm5, %v2245_v17 }
 0x444   :  { %v2285_v20 = vpop.f32.mrf.mxu0 }
 0x445   :  { %v2286_v49 = vadd.f32 %v2398_v50, %v2285_v20 }
 0x447   :  { %2289 = vst.msk [vmem:[%s3165_s16] sm:$0x3] %vm2288_vm9, %v2286_v49  ;;  %v2373_v10 = vmul.f32 -1.442695, %v2286_v49 }
 0x449   :  { %2447 = vpow2.f32 %v2373_v10 }
 0x44f   :  { %v2448_v21 = vpop.eup %2447 }
 0x450   :  { %v2294_v55 = vadd.f32 1.0, %v2448_v21 }
 0x452   :  { %2449 = vrcp.f32 %v2294_v55  ;;  %v2306_v24 = vand.u32 2147483648, %v2294_v55  ;;  %v2304_v27 = vand.u32 2147483647, %v2294_v55  ;;  %vm2300_vm4 = vweird.f32 %v2294_v55 }
 0x454   :  { %v2307_v31 = vor.u32 1.1754944e-38, %v2306_v24  ;;  %vm2305_vm10 = vcmp.eq.f32.partialorder %v2304_v27, 8.507059e+37 }
 0x458   :  { %v2450_v22 = vpop.eup %2449 }
 0x459   :  { %v2296_v19 = vmul.f32 %v2450_v22, %v2294_v55  ;;  %vm2301_vm1 = vweird.f32 %v2450_v22 }
 0x45a   :  { %vm2302_vm5 = vmor %vm2300_vm4, %vm2301_vm1 }
 0x45b   :  { %v2297_v23 = vsub.f32 1.0, %v2296_v19 }
 0x45d   :  { %v2298_v25 = vmul.f32 %v2450_v22, %v2297_v23 }
 0x45f   :  { %v2299_v29 = vadd.f32 %v2450_v22, %v2298_v25 }
 0x461   :  { %v2303_v4 = vsel %vm2302_vm5, %v2450_v22, %v2299_v29 }
 0x462   :  { %v2308_v36 = vsel %vm2305_vm10, %v2307_v31, %v2303_v4 }
 0x463   :  { %v2310_v9 = vmul.f32 2.0, %v2308_v36  ;;  %v2329_v56 = vmul.f32 %v2328_v51, %v2308_v36 }
 0x465   :  { %v2374_v40 = vadd.f32 -0.5, %v2310_v9  ;;  %v2315_v26 = vmul.f32 %v2310_v9, %v2310_v9 }
 0x467   :  { %v2313_v43 = vadd.f32 %v2374_v40, %v2312_v30  ;;  %v2317_v45 = vmul.f32 %v2316_v39, %v2315_v26 }
 0x469   :  { %v2314_v48 = vmul.f32 8.0, %v2313_v43  ;;  %v2321_v53 = vmul.f32 %v2320_v47, %v2317_v45 }
 0x46b   :  { %v2319_v52 = vmul.f32 %v2318_v46, %v2314_v48 }
 0x46d   :  { %v2322_v54 = vadd.f32 %v2321_v53, %v2319_v52 }
 0x46f   :  { %v2330_v38 = vadd.f32 %v2329_v56, %v2322_v54 }
 0x471   :  { %2331 = vst.msk [vmem:[%s3167_s18] sm:$0x3] %vm2288_vm9, %v2330_v38 }
 0x472   :  { %2348 = vsyncpa [#allocation3], 1 }
 0x473   :  { %2349 = vsyncpa [#allocation5], 1 }
 0x474   :  { %2350 = vsyncpa [#allocation8], 1 }
 0x475   :  { %2351 = vsyncpa [#allocation11], 1 }
 0x476   :  { %2352 = vsyncpa [#allocation14], 1 }
 0x477   :  { %2353 = vsyncpa [#allocation17], 1 }
 0x478   :  { %2354 = vsyncpa [#allocation20], 1 }
 0x479   :  { %2355 = vsyncpa [#allocation23], 1 }

</bundles_post_ra>
